<compile_context>
chip_gen: v7x
topology: tpu7x:2x2x1
jax: 0.10.0
libtpu: 0.0.40
codegen_flags: <defaults>
</compile_context>

<pallas_src>
import functools

import jax
import jax.numpy as jnp
from jax.experimental import pallas as pl
from jax.experimental.pallas import tpu as pltpu

NEG_SLOPE = 0.21
MASK_VAL = -60000.0
LN_EPS = 1e-5


def _leaky_relu(x, slope=NEG_SLOPE):
    # 0 < slope < 1  =>  leaky_relu(x) == max(x, slope * x)  (one mul + one max)
    return jnp.maximum(x, slope * x)


# ----------------------------------------------------------------------------
# Fused forward kernel: one batch element per grid step, everything in VMEM.
# ----------------------------------------------------------------------------
def _gatv2_fused_kernel(x_ref, bias_ref,
                        w1_ref, a1_ref, w2_ref, a2_ref, w3_ref, a3_ref,
                        w4_ref, b4_ref, lng_ref, lnb_ref,
                        o_ref, *, n_heads, n_hidden):
    hh = n_heads * n_hidden
    x = x_ref[0]            # (N, f_in)
    bias = bias_ref[0]      # (N, N) additive attention-mask bias (0 or MASK_VAL)
    lng = lng_ref[...]      # (1, hh)  shared layernorm2 gamma
    lnb = lnb_ref[...]      # (1, hh)  shared layernorm2 beta

    def layer_norm(v):
        mean = jnp.mean(v, axis=-1, keepdims=True)
        vc = v - mean
        var = jnp.mean(vc * vc, axis=-1, keepdims=True)
        return vc * jax.lax.rsqrt(var + LN_EPS) * lng + lnb

    def gat(h, w_ref, attn_ref):
        # Single projection for both linear_l and linear_r: w = [W_l^T | W_r^T].
        g = jnp.dot(h, w_ref[...], preferred_element_type=jnp.float32)   # (N, 2*hh)
        gl = g[:, :hh]                                                   # (N, hh)
        gr = g[:, hh:]                                                   # (N, hh)
        # attn_ref is the per-head attention vector pre-tiled to (1, hh) on host.
        # Pairwise scores for ALL heads at once (lane-dense along hh):
        #   p[i, j, :] = leaky_relu(gl[j] + gr[i]) * attn
        p = _leaky_relu(gl[None, :, :] + gr[:, None, :]) * attn_ref[...][None, :, :]
        outs = []
        for k in range(n_heads):
            sl = slice(k * n_hidden, (k + 1) * n_hidden)
            e = jnp.sum(p[:, :, sl], axis=-1) + bias                     # (N, N)
            # softmax over j (lane axis); reciprocal on the EUP (approx)
            e_max = jnp.max(e, axis=-1, keepdims=True)
            z = jnp.exp(e - e_max)
            inv = pl.reciprocal(jnp.sum(z, axis=-1, keepdims=True), approx=True)
            a = z * inv
            # dropout on attention weights is identity (eval semantics)
            outs.append(jnp.dot(a, gr[:, sl], preferred_element_type=jnp.float32))
        return jnp.concatenate(outs, axis=-1)                            # (N, hh)

    h = layer_norm(gat(x, w1_ref, a1_ref))
    h = layer_norm(gat(h, w2_ref, a2_ref) + h)
    h = layer_norm(gat(h, w3_ref, a3_ref) + h)
    y = jnp.dot(h, w4_ref[...], preferred_element_type=jnp.float32) + b4_ref[...]
    o_ref[0] = _leaky_relu(y)


def gatv2_forward(params, x, adj, n_heads):
    """Full GATv2 forward (glob=False path) as one pallas_call."""
    B, N, f_in = x.shape
    hh = params["l1_w"].shape[1] // 2
    n_hidden = hh // n_heads
    out_dim = params["l4_w"].shape[1]

    # Additive mask bias (adj is binary; rows with at least one neighbor give the
    # same softmax as masked_fill(-60000) since exp(-60000 + O(1)) underflows to 0).
    bias = jnp.where(adj == 0.0, jnp.float32(MASK_VAL), jnp.float32(0.0))

    # The torch module shares one attn vector across heads: pre-tile to hh lanes.
    def tiled_attn(a):
        return jnp.tile(a, (1, n_heads))                                 # (1, hh)

    kernel = functools.partial(_gatv2_fused_kernel,
                               n_heads=n_heads, n_hidden=n_hidden)

    def full(shape):
        return pl.BlockSpec(shape, lambda b: (0,) * len(shape))

    out = pl.pallas_call(
        kernel,
        out_shape=jax.ShapeDtypeStruct((B, N, out_dim), jnp.float32),
        grid=(B,),
        in_specs=[
            pl.BlockSpec((1, N, f_in), lambda b: (b, 0, 0)),   # x
            pl.BlockSpec((1, N, N), lambda b: (b, 0, 0)),      # additive mask bias
            full((f_in, 2 * hh)), full((1, hh)),               # layer1
            full((hh, 2 * hh)), full((1, hh)),                 # layer2
            full((hh, 2 * hh)), full((1, hh)),                 # layer3
            full((hh, out_dim)), full((1, out_dim)),           # layer4 (linear)
            full((1, hh)), full((1, hh)),                      # shared layernorm2
        ],
        out_specs=pl.BlockSpec((1, N, out_dim), lambda b: (b, 0, 0)),
        compiler_params=pltpu.CompilerParams(
            dimension_semantics=("parallel",),
            vmem_limit_bytes=32 * 1024 * 1024,
        ),
    )(x, bias,
      params["l1_w"], tiled_attn(params["l1_attn"]),
      params["l2_w"], tiled_attn(params["l2_attn"]),
      params["l3_w"], tiled_attn(params["l3_attn"]),
      params["l4_w"], params["l4_b"].reshape(1, out_dim),
      params["ln2_g"].reshape(1, hh), params["ln2_b"].reshape(1, hh))
    return jnp.squeeze(out)


# ----------------------------------------------------------------------------
# Pure-JAX reference (mirrors the PyTorch code) for validation
# ----------------------------------------------------------------------------
def _gat_layer_ref(h, adj, w_lr, attn_w, n_heads):
    B, N, _ = h.shape
    hh = w_lr.shape[1] // 2
    hid = hh // n_heads
    wl, wr = w_lr[:, :hh], w_lr[:, hh:]
    gl = (h @ wl).reshape(B, N, n_heads, hid)
    gr = (h @ wr).reshape(B, N, n_heads, hid)
    gsum = gl[:, None, :, :, :] + gr[:, :, None, :, :]   # [b,i,j,h,f] = gl[b,j]+gr[b,i]
    e = jnp.einsum("bijhf,f->bijh", _leaky_relu(gsum), attn_w.reshape(-1))
    e = jnp.where(adj[..., None] == 0.0, MASK_VAL, e)
    a = jax.nn.softmax(e, axis=2)
    out = jnp.einsum("bijh,bjhf->bihf", a, gr)
    return out.reshape(B, N, hh)


def _layernorm_ref(x, g, b):
    mean = jnp.mean(x, axis=-1, keepdims=True)
    var = jnp.mean((x - mean) ** 2, axis=-1, keepdims=True)
    return (x - mean) * jax.lax.rsqrt(var + LN_EPS) * g + b


def gatv2_forward_ref(params, x, adj, n_heads):
    g, b = params["ln2_g"], params["ln2_b"]
    h = _gat_layer_ref(x, adj, params["l1_w"], params["l1_attn"], n_heads)
    h = _layernorm_ref(h, g, b)
    h = _gat_layer_ref(h, adj, params["l2_w"], params["l2_attn"], n_heads) + h
    h = _layernorm_ref(h, g, b)
    h = _gat_layer_ref(h, adj, params["l3_w"], params["l3_attn"], n_heads) + h
    h = _layernorm_ref(h, g, b)
    y = _leaky_relu(h @ params["l4_w"] + params["l4_b"])
    return jnp.squeeze(y)


# ----------------------------------------------------------------------------
def init_params(key, in_dim, hidden_dim, out_dim, n_heads):
    n_hidden = hidden_dim // n_heads
    ks = jax.random.split(key, 12)
    it = iter(range(12))

    def uni(k, shape, fan_in):
        bound = 1.0 / jnp.sqrt(jnp.float32(fan_in))
        return jax.random.uniform(k, shape, jnp.float32, -bound, bound)

    p = {}
    # GAT weights pre-transposed and packed: w = [W_l^T | W_r^T], shape (f_in, 2*hh)
    p["l1_w"] = jnp.concatenate(
        [uni(ks[next(it)], (in_dim, hidden_dim), in_dim),
         uni(ks[next(it)], (in_dim, hidden_dim), in_dim)], axis=1)
    p["l1_attn"] = uni(ks[next(it)], (1, n_hidden), n_hidden)
    for name in ("l2", "l3"):
        p[f"{name}_w"] = jnp.concatenate(
            [uni(ks[next(it)], (hidden_dim, hidden_dim), hidden_dim),
             uni(ks[next(it)], (hidden_dim, hidden_dim), hidden_dim)], axis=1)
        p[f"{name}_attn"] = uni(ks[next(it)], (1, n_hidden), n_hidden)
    p["l4_w"] = uni(ks[next(it)], (hidden_dim, out_dim), hidden_dim)
    p["l4_b"] = uni(ks[next(it)], (out_dim,), hidden_dim)
    # layernorm2 (PyTorch default init), shared across the three norms
    p["ln2_g"] = jnp.ones((hidden_dim,), jnp.float32)
    p["ln2_b"] = jnp.zeros((hidden_dim,), jnp.float32)
    return p


if __name__ == "__main__":
    B, N = 2, 8
    in_dim, hidden_dim, out_dim, n_heads = 16, 32, 1, 4

    key = jax.random.PRNGKey(0)
    kx, ka, kp = jax.random.split(key, 3)

    x = jax.random.normal(kx, (B, N, in_dim), jnp.float32)
    adj = (jax.random.uniform(ka, (B, N, N)) > 0.4).astype(jnp.float32)
    idx = jnp.arange(N)
    adj = adj.at[:, idx, idx].set(1.0)   # self-loops so every row has a neighbor

    params = init_params(kp, in_dim, hidden_dim, out_dim, n_heads)

    out = jax.block_until_ready(gatv2_forward(params, x, adj, n_heads))
    ref = jax.block_until_ready(gatv2_forward_ref(params, x, adj, n_heads))

    assert out.shape == (B, N), out.shape
    # tolerance covers the approximate EUP reciprocal used in the softmax
    assert jnp.allclose(out, ref, rtol=2e-2, atol=5e-3), (
        f"max abs diff {jnp.max(jnp.abs(out - ref))}")

    print("KERNEL_OK")
</pallas_src>

<mosaic_0001>
module attributes {stable_mosaic.version = 11 : i64} {
  func.func @_gatv2_fused_kernel(%arg0: i32, %arg1: memref<1x8x16xf32, #tpu.memory_space<vmem>>, %arg2: memref<1x8x8xf32, #tpu.memory_space<vmem>>, %arg3: memref<16x64xf32, #tpu.memory_space<vmem>>, %arg4: memref<1x32xf32, #tpu.memory_space<vmem>>, %arg5: memref<32x64xf32, #tpu.memory_space<vmem>>, %arg6: memref<1x32xf32, #tpu.memory_space<vmem>>, %arg7: memref<32x64xf32, #tpu.memory_space<vmem>>, %arg8: memref<1x32xf32, #tpu.memory_space<vmem>>, %arg9: memref<32x1xf32, #tpu.memory_space<vmem>>, %arg10: memref<1x1xf32, #tpu.memory_space<vmem>>, %arg11: memref<1x32xf32, #tpu.memory_space<vmem>>, %arg12: memref<1x32xf32, #tpu.memory_space<vmem>>, %arg13: memref<1x8x1xf32, #tpu.memory_space<vmem>>) attributes {dimension_semantics = [#tpu.dimension_semantics<parallel>], iteration_bounds = array<i64: 2>, scalar_prefetch = 0 : i64, scratch_operands = 0 : i64, tpu.core_type = #tpu.core_type<tc>, window_params = [{transform_indices = @transform_0, window_bounds = array<i64: 1, 8, 16>}, {transform_indices = @transform_1, window_bounds = array<i64: 1, 8, 8>}, {pipeline_mode = #tpu.pipeline_mode<synchronous>, transform_indices = @transform_2, window_bounds = array<i64: 16, 64>}, {pipeline_mode = #tpu.pipeline_mode<synchronous>, transform_indices = @transform_3, window_bounds = array<i64: 1, 32>}, {pipeline_mode = #tpu.pipeline_mode<synchronous>, transform_indices = @transform_4, window_bounds = array<i64: 32, 64>}, {pipeline_mode = #tpu.pipeline_mode<synchronous>, transform_indices = @transform_5, window_bounds = array<i64: 1, 32>}, {pipeline_mode = #tpu.pipeline_mode<synchronous>, transform_indices = @transform_6, window_bounds = array<i64: 32, 64>}, {pipeline_mode = #tpu.pipeline_mode<synchronous>, transform_indices = @transform_7, window_bounds = array<i64: 1, 32>}, {pipeline_mode = #tpu.pipeline_mode<synchronous>, transform_indices = @transform_8, window_bounds = array<i64: 32, 1>}, {pipeline_mode = #tpu.pipeline_mode<synchronous>, transform_indices = @transform_9, window_bounds = array<i64: 1, 1>}, {pipeline_mode = #tpu.pipeline_mode<synchronous>, transform_indices = @transform_10, window_bounds = array<i64: 1, 32>}, {pipeline_mode = #tpu.pipeline_mode<synchronous>, transform_indices = @transform_11, window_bounds = array<i64: 1, 32>}, {transform_indices = @transform_12, window_bounds = array<i64: 1, 8, 1>}]} {
    %c0 = arith.constant 0 : index
    %c0_0 = arith.constant 0 : index
    %c0_1 = arith.constant 0 : index
    %0 = vector.load %arg1[%c0, %c0_0, %c0_1] : memref<1x8x16xf32, #tpu.memory_space<vmem>>, vector<1x8x16xf32>
    %1 = vector.shape_cast %0 : vector<1x8x16xf32> to vector<8x16xf32>
    %c0_2 = arith.constant 0 : index
    %c0_3 = arith.constant 0 : index
    %c0_4 = arith.constant 0 : index
    %2 = vector.load %arg2[%c0_2, %c0_3, %c0_4] : memref<1x8x8xf32, #tpu.memory_space<vmem>>, vector<1x8x8xf32>
    %3 = vector.shape_cast %2 : vector<1x8x8xf32> to vector<8x8xf32>
    %c0_5 = arith.constant 0 : index
    %c0_6 = arith.constant 0 : index
    %4 = vector.load %arg11[%c0_5, %c0_6] : memref<1x32xf32, #tpu.memory_space<vmem>>, vector<1x32xf32>
    %c0_7 = arith.constant 0 : index
    %c0_8 = arith.constant 0 : index
    %5 = vector.load %arg12[%c0_7, %c0_8] : memref<1x32xf32, #tpu.memory_space<vmem>>, vector<1x32xf32>
    %c0_9 = arith.constant 0 : index
    %c0_10 = arith.constant 0 : index
    %6 = vector.load %arg3[%c0_9, %c0_10] : memref<16x64xf32, #tpu.memory_space<vmem>>, vector<16x64xf32>
    %cst = arith.constant dense<0.000000e+00> : vector<8x64xf32>
    %7 = tpu.matmul %1, %6, %cst {dimension_numbers = #tpu.dot_dimension_numbers<[1], [0], [0], [1], [0, 0, 1, 1], [], []>} : vector<8x16xf32>, vector<16x64xf32>, vector<8x64xf32> -> vector<8x64xf32>
    %8 = vector.extract_strided_slice %7 {offsets = [0, 0], sizes = [8, 32], strides = [1, 1]} : vector<8x64xf32> to vector<8x32xf32>
    %9 = vector.extract_strided_slice %7 {offsets = [0, 32], sizes = [8, 32], strides = [1, 1]} : vector<8x64xf32> to vector<8x32xf32>
    %10 = vector.shape_cast %8 : vector<8x32xf32> to vector<1x8x32xf32>
    %11 = vector.shape_cast %9 : vector<8x32xf32> to vector<8x1x32xf32>
    %12 = vector.broadcast %10 : vector<1x8x32xf32> to vector<8x8x32xf32>
    %13 = vector.broadcast %11 : vector<8x1x32xf32> to vector<8x8x32xf32>
    %14 = arith.addf %12, %13 : vector<8x8x32xf32>
    %cst_11 = arith.constant 2.100000e-01 : f32
    %15 = vector.broadcast %cst_11 : f32 to vector<8x8x32xf32>
    %16 = arith.mulf %15, %14 : vector<8x8x32xf32>
    %17 = arith.maximumf %14, %16 : vector<8x8x32xf32>
    %c0_12 = arith.constant 0 : index
    %c0_13 = arith.constant 0 : index
    %18 = vector.load %arg4[%c0_12, %c0_13] : memref<1x32xf32, #tpu.memory_space<vmem>>, vector<1x32xf32>
    %19 = vector.shape_cast %18 : vector<1x32xf32> to vector<1x1x32xf32>
    %20 = vector.broadcast %19 : vector<1x1x32xf32> to vector<8x8x32xf32>
    %21 = arith.mulf %17, %20 : vector<8x8x32xf32>
    %22 = vector.extract_strided_slice %21 {offsets = [0, 0, 0], sizes = [8, 8, 8], strides = [1, 1, 1]} : vector<8x8x32xf32> to vector<8x8x8xf32>
    %cst_14 = arith.constant dense<0.000000e+00> : vector<8x8xf32>
    %23 = vector.multi_reduction <add>, %22, %cst_14 [2] : vector<8x8x8xf32> to vector<8x8xf32>
    %24 = arith.addf %23, %3 : vector<8x8xf32>
    %cst_15 = arith.constant dense<0xFF800000> : vector<8xf32>
    %25 = vector.multi_reduction <maximumf>, %24, %cst_15 [1] : vector<8x8xf32> to vector<8xf32>
    %26 = vector.shape_cast %25 : vector<8xf32> to vector<8x1xf32>
    %27 = vector.broadcast %26 : vector<8x1xf32> to vector<8x8xf32>
    %28 = arith.subf %24, %27 : vector<8x8xf32>
    %29 = math.exp %28 : vector<8x8xf32>
    %cst_16 = arith.constant dense<0.000000e+00> : vector<8xf32>
    %30 = vector.multi_reduction <add>, %29, %cst_16 [1] : vector<8x8xf32> to vector<8xf32>
    %31 = vector.shape_cast %30 : vector<8xf32> to vector<8x1xf32>
    %32 = tpu.reciprocal %31 {approx = true} : vector<8x1xf32> -> vector<8x1xf32>
    %33 = vector.broadcast %32 : vector<8x1xf32> to vector<8x8xf32>
    %34 = arith.mulf %29, %33 : vector<8x8xf32>
    %35 = vector.extract_strided_slice %9 {offsets = [0, 0], sizes = [8, 8], strides = [1, 1]} : vector<8x32xf32> to vector<8x8xf32>
    %cst_17 = arith.constant dense<0.000000e+00> : vector<8x8xf32>
    %36 = tpu.matmul %34, %35, %cst_17 {dimension_numbers = #tpu.dot_dimension_numbers<[1], [0], [0], [1], [0, 0, 1, 1], [], []>} : vector<8x8xf32>, vector<8x8xf32>, vector<8x8xf32> -> vector<8x8xf32>
    %37 = vector.extract_strided_slice %21 {offsets = [0, 0, 8], sizes = [8, 8, 8], strides = [1, 1, 1]} : vector<8x8x32xf32> to vector<8x8x8xf32>
    %cst_18 = arith.constant dense<0.000000e+00> : vector<8x8xf32>
    %38 = vector.multi_reduction <add>, %37, %cst_18 [2] : vector<8x8x8xf32> to vector<8x8xf32>
    %39 = arith.addf %38, %3 : vector<8x8xf32>
    %cst_19 = arith.constant dense<0xFF800000> : vector<8xf32>
    %40 = vector.multi_reduction <maximumf>, %39, %cst_19 [1] : vector<8x8xf32> to vector<8xf32>
    %41 = vector.shape_cast %40 : vector<8xf32> to vector<8x1xf32>
    %42 = vector.broadcast %41 : vector<8x1xf32> to vector<8x8xf32>
    %43 = arith.subf %39, %42 : vector<8x8xf32>
    %44 = math.exp %43 : vector<8x8xf32>
    %cst_20 = arith.constant dense<0.000000e+00> : vector<8xf32>
    %45 = vector.multi_reduction <add>, %44, %cst_20 [1] : vector<8x8xf32> to vector<8xf32>
    %46 = vector.shape_cast %45 : vector<8xf32> to vector<8x1xf32>
    %47 = tpu.reciprocal %46 {approx = true} : vector<8x1xf32> -> vector<8x1xf32>
    %48 = vector.broadcast %47 : vector<8x1xf32> to vector<8x8xf32>
    %49 = arith.mulf %44, %48 : vector<8x8xf32>
    %50 = vector.extract_strided_slice %9 {offsets = [0, 8], sizes = [8, 8], strides = [1, 1]} : vector<8x32xf32> to vector<8x8xf32>
    %cst_21 = arith.constant dense<0.000000e+00> : vector<8x8xf32>
    %51 = tpu.matmul %49, %50, %cst_21 {dimension_numbers = #tpu.dot_dimension_numbers<[1], [0], [0], [1], [0, 0, 1, 1], [], []>} : vector<8x8xf32>, vector<8x8xf32>, vector<8x8xf32> -> vector<8x8xf32>
    %52 = vector.extract_strided_slice %21 {offsets = [0, 0, 16], sizes = [8, 8, 8], strides = [1, 1, 1]} : vector<8x8x32xf32> to vector<8x8x8xf32>
    %cst_22 = arith.constant dense<0.000000e+00> : vector<8x8xf32>
    %53 = vector.multi_reduction <add>, %52, %cst_22 [2] : vector<8x8x8xf32> to vector<8x8xf32>
    %54 = arith.addf %53, %3 : vector<8x8xf32>
    %cst_23 = arith.constant dense<0xFF800000> : vector<8xf32>
    %55 = vector.multi_reduction <maximumf>, %54, %cst_23 [1] : vector<8x8xf32> to vector<8xf32>
    %56 = vector.shape_cast %55 : vector<8xf32> to vector<8x1xf32>
    %57 = vector.broadcast %56 : vector<8x1xf32> to vector<8x8xf32>
    %58 = arith.subf %54, %57 : vector<8x8xf32>
    %59 = math.exp %58 : vector<8x8xf32>
    %cst_24 = arith.constant dense<0.000000e+00> : vector<8xf32>
    %60 = vector.multi_reduction <add>, %59, %cst_24 [1] : vector<8x8xf32> to vector<8xf32>
    %61 = vector.shape_cast %60 : vector<8xf32> to vector<8x1xf32>
    %62 = tpu.reciprocal %61 {approx = true} : vector<8x1xf32> -> vector<8x1xf32>
    %63 = vector.broadcast %62 : vector<8x1xf32> to vector<8x8xf32>
    %64 = arith.mulf %59, %63 : vector<8x8xf32>
    %65 = vector.extract_strided_slice %9 {offsets = [0, 16], sizes = [8, 8], strides = [1, 1]} : vector<8x32xf32> to vector<8x8xf32>
    %cst_25 = arith.constant dense<0.000000e+00> : vector<8x8xf32>
    %66 = tpu.matmul %64, %65, %cst_25 {dimension_numbers = #tpu.dot_dimension_numbers<[1], [0], [0], [1], [0, 0, 1, 1], [], []>} : vector<8x8xf32>, vector<8x8xf32>, vector<8x8xf32> -> vector<8x8xf32>
    %67 = vector.extract_strided_slice %21 {offsets = [0, 0, 24], sizes = [8, 8, 8], strides = [1, 1, 1]} : vector<8x8x32xf32> to vector<8x8x8xf32>
    %cst_26 = arith.constant dense<0.000000e+00> : vector<8x8xf32>
    %68 = vector.multi_reduction <add>, %67, %cst_26 [2] : vector<8x8x8xf32> to vector<8x8xf32>
    %69 = arith.addf %68, %3 : vector<8x8xf32>
    %cst_27 = arith.constant dense<0xFF800000> : vector<8xf32>
    %70 = vector.multi_reduction <maximumf>, %69, %cst_27 [1] : vector<8x8xf32> to vector<8xf32>
    %71 = vector.shape_cast %70 : vector<8xf32> to vector<8x1xf32>
    %72 = vector.broadcast %71 : vector<8x1xf32> to vector<8x8xf32>
    %73 = arith.subf %69, %72 : vector<8x8xf32>
    %74 = math.exp %73 : vector<8x8xf32>
    %cst_28 = arith.constant dense<0.000000e+00> : vector<8xf32>
    %75 = vector.multi_reduction <add>, %74, %cst_28 [1] : vector<8x8xf32> to vector<8xf32>
    %76 = vector.shape_cast %75 : vector<8xf32> to vector<8x1xf32>
    %77 = tpu.reciprocal %76 {approx = true} : vector<8x1xf32> -> vector<8x1xf32>
    %78 = vector.broadcast %77 : vector<8x1xf32> to vector<8x8xf32>
    %79 = arith.mulf %74, %78 : vector<8x8xf32>
    %80 = vector.extract_strided_slice %9 {offsets = [0, 24], sizes = [8, 8], strides = [1, 1]} : vector<8x32xf32> to vector<8x8xf32>
    %cst_29 = arith.constant dense<0.000000e+00> : vector<8x8xf32>
    %81 = tpu.matmul %79, %80, %cst_29 {dimension_numbers = #tpu.dot_dimension_numbers<[1], [0], [0], [1], [0, 0, 1, 1], [], []>} : vector<8x8xf32>, vector<8x8xf32>, vector<8x8xf32> -> vector<8x8xf32>
    %82 = tpu.concatenate %36, %51, %66, %81 in 1 : vector<8x8xf32>, vector<8x8xf32>, vector<8x8xf32>, vector<8x8xf32> -> vector<8x32xf32>
    %cst_30 = arith.constant dense<0.000000e+00> : vector<8xf32>
    %83 = vector.multi_reduction <add>, %82, %cst_30 [1] : vector<8x32xf32> to vector<8xf32>
    %84 = vector.shape_cast %83 : vector<8xf32> to vector<8x1xf32>
    %cst_31 = arith.constant 3.200000e+01 : f32
    %85 = vector.broadcast %cst_31 : f32 to vector<8x1xf32>
    %86 = arith.divf %84, %85 : vector<8x1xf32>
    %87 = vector.broadcast %86 : vector<8x1xf32> to vector<8x32xf32>
    %88 = arith.subf %82, %87 : vector<8x32xf32>
    %89 = arith.mulf %88, %88 : vector<8x32xf32>
    %cst_32 = arith.constant dense<0.000000e+00> : vector<8xf32>
    %90 = vector.multi_reduction <add>, %89, %cst_32 [1] : vector<8x32xf32> to vector<8xf32>
    %91 = vector.shape_cast %90 : vector<8xf32> to vector<8x1xf32>
    %cst_33 = arith.constant 3.200000e+01 : f32
    %92 = vector.broadcast %cst_33 : f32 to vector<8x1xf32>
    %93 = arith.divf %91, %92 : vector<8x1xf32>
    %cst_34 = arith.constant 9.99999974E-6 : f32
    %94 = vector.broadcast %cst_34 : f32 to vector<8x1xf32>
    %95 = arith.addf %93, %94 : vector<8x1xf32>
    %96 = math.rsqrt %95 : vector<8x1xf32>
    %97 = vector.broadcast %96 : vector<8x1xf32> to vector<8x32xf32>
    %98 = arith.mulf %88, %97 : vector<8x32xf32>
    %99 = vector.broadcast %4 : vector<1x32xf32> to vector<8x32xf32>
    %100 = arith.mulf %98, %99 : vector<8x32xf32>
    %101 = vector.broadcast %5 : vector<1x32xf32> to vector<8x32xf32>
    %102 = arith.addf %100, %101 : vector<8x32xf32>
    %c0_35 = arith.constant 0 : index
    %c0_36 = arith.constant 0 : index
    %103 = vector.load %arg5[%c0_35, %c0_36] : memref<32x64xf32, #tpu.memory_space<vmem>>, vector<32x64xf32>
    %cst_37 = arith.constant dense<0.000000e+00> : vector<8x64xf32>
    %104 = tpu.matmul %102, %103, %cst_37 {dimension_numbers = #tpu.dot_dimension_numbers<[1], [0], [0], [1], [0, 0, 1, 1], [], []>} : vector<8x32xf32>, vector<32x64xf32>, vector<8x64xf32> -> vector<8x64xf32>
    %105 = vector.extract_strided_slice %104 {offsets = [0, 0], sizes = [8, 32], strides = [1, 1]} : vector<8x64xf32> to vector<8x32xf32>
    %106 = vector.extract_strided_slice %104 {offsets = [0, 32], sizes = [8, 32], strides = [1, 1]} : vector<8x64xf32> to vector<8x32xf32>
    %107 = vector.shape_cast %105 : vector<8x32xf32> to vector<1x8x32xf32>
    %108 = vector.shape_cast %106 : vector<8x32xf32> to vector<8x1x32xf32>
    %109 = vector.broadcast %107 : vector<1x8x32xf32> to vector<8x8x32xf32>
    %110 = vector.broadcast %108 : vector<8x1x32xf32> to vector<8x8x32xf32>
    %111 = arith.addf %109, %110 : vector<8x8x32xf32>
    %cst_38 = arith.constant 2.100000e-01 : f32
    %112 = vector.broadcast %cst_38 : f32 to vector<8x8x32xf32>
    %113 = arith.mulf %112, %111 : vector<8x8x32xf32>
    %114 = arith.maximumf %111, %113 : vector<8x8x32xf32>
    %c0_39 = arith.constant 0 : index
    %c0_40 = arith.constant 0 : index
    %115 = vector.load %arg6[%c0_39, %c0_40] : memref<1x32xf32, #tpu.memory_space<vmem>>, vector<1x32xf32>
    %116 = vector.shape_cast %115 : vector<1x32xf32> to vector<1x1x32xf32>
    %117 = vector.broadcast %116 : vector<1x1x32xf32> to vector<8x8x32xf32>
    %118 = arith.mulf %114, %117 : vector<8x8x32xf32>
    %119 = vector.extract_strided_slice %118 {offsets = [0, 0, 0], sizes = [8, 8, 8], strides = [1, 1, 1]} : vector<8x8x32xf32> to vector<8x8x8xf32>
    %cst_41 = arith.constant dense<0.000000e+00> : vector<8x8xf32>
    %120 = vector.multi_reduction <add>, %119, %cst_41 [2] : vector<8x8x8xf32> to vector<8x8xf32>
    %121 = arith.addf %120, %3 : vector<8x8xf32>
    %cst_42 = arith.constant dense<0xFF800000> : vector<8xf32>
    %122 = vector.multi_reduction <maximumf>, %121, %cst_42 [1] : vector<8x8xf32> to vector<8xf32>
    %123 = vector.shape_cast %122 : vector<8xf32> to vector<8x1xf32>
    %124 = vector.broadcast %123 : vector<8x1xf32> to vector<8x8xf32>
    %125 = arith.subf %121, %124 : vector<8x8xf32>
    %126 = math.exp %125 : vector<8x8xf32>
    %cst_43 = arith.constant dense<0.000000e+00> : vector<8xf32>
    %127 = vector.multi_reduction <add>, %126, %cst_43 [1] : vector<8x8xf32> to vector<8xf32>
    %128 = vector.shape_cast %127 : vector<8xf32> to vector<8x1xf32>
    %129 = tpu.reciprocal %128 {approx = true} : vector<8x1xf32> -> vector<8x1xf32>
    %130 = vector.broadcast %129 : vector<8x1xf32> to vector<8x8xf32>
    %131 = arith.mulf %126, %130 : vector<8x8xf32>
    %132 = vector.extract_strided_slice %106 {offsets = [0, 0], sizes = [8, 8], strides = [1, 1]} : vector<8x32xf32> to vector<8x8xf32>
    %cst_44 = arith.constant dense<0.000000e+00> : vector<8x8xf32>
    %133 = tpu.matmul %131, %132, %cst_44 {dimension_numbers = #tpu.dot_dimension_numbers<[1], [0], [0], [1], [0, 0, 1, 1], [], []>} : vector<8x8xf32>, vector<8x8xf32>, vector<8x8xf32> -> vector<8x8xf32>
    %134 = vector.extract_strided_slice %118 {offsets = [0, 0, 8], sizes = [8, 8, 8], strides = [1, 1, 1]} : vector<8x8x32xf32> to vector<8x8x8xf32>
    %cst_45 = arith.constant dense<0.000000e+00> : vector<8x8xf32>
    %135 = vector.multi_reduction <add>, %134, %cst_45 [2] : vector<8x8x8xf32> to vector<8x8xf32>
    %136 = arith.addf %135, %3 : vector<8x8xf32>
    %cst_46 = arith.constant dense<0xFF800000> : vector<8xf32>
    %137 = vector.multi_reduction <maximumf>, %136, %cst_46 [1] : vector<8x8xf32> to vector<8xf32>
    %138 = vector.shape_cast %137 : vector<8xf32> to vector<8x1xf32>
    %139 = vector.broadcast %138 : vector<8x1xf32> to vector<8x8xf32>
    %140 = arith.subf %136, %139 : vector<8x8xf32>
    %141 = math.exp %140 : vector<8x8xf32>
    %cst_47 = arith.constant dense<0.000000e+00> : vector<8xf32>
    %142 = vector.multi_reduction <add>, %141, %cst_47 [1] : vector<8x8xf32> to vector<8xf32>
    %143 = vector.shape_cast %142 : vector<8xf32> to vector<8x1xf32>
    %144 = tpu.reciprocal %143 {approx = true} : vector<8x1xf32> -> vector<8x1xf32>
    %145 = vector.broadcast %144 : vector<8x1xf32> to vector<8x8xf32>
    %146 = arith.mulf %141, %145 : vector<8x8xf32>
    %147 = vector.extract_strided_slice %106 {offsets = [0, 8], sizes = [8, 8], strides = [1, 1]} : vector<8x32xf32> to vector<8x8xf32>
    %cst_48 = arith.constant dense<0.000000e+00> : vector<8x8xf32>
    %148 = tpu.matmul %146, %147, %cst_48 {dimension_numbers = #tpu.dot_dimension_numbers<[1], [0], [0], [1], [0, 0, 1, 1], [], []>} : vector<8x8xf32>, vector<8x8xf32>, vector<8x8xf32> -> vector<8x8xf32>
    %149 = vector.extract_strided_slice %118 {offsets = [0, 0, 16], sizes = [8, 8, 8], strides = [1, 1, 1]} : vector<8x8x32xf32> to vector<8x8x8xf32>
    %cst_49 = arith.constant dense<0.000000e+00> : vector<8x8xf32>
    %150 = vector.multi_reduction <add>, %149, %cst_49 [2] : vector<8x8x8xf32> to vector<8x8xf32>
    %151 = arith.addf %150, %3 : vector<8x8xf32>
    %cst_50 = arith.constant dense<0xFF800000> : vector<8xf32>
    %152 = vector.multi_reduction <maximumf>, %151, %cst_50 [1] : vector<8x8xf32> to vector<8xf32>
    %153 = vector.shape_cast %152 : vector<8xf32> to vector<8x1xf32>
    %154 = vector.broadcast %153 : vector<8x1xf32> to vector<8x8xf32>
    %155 = arith.subf %151, %154 : vector<8x8xf32>
    %156 = math.exp %155 : vector<8x8xf32>
    %cst_51 = arith.constant dense<0.000000e+00> : vector<8xf32>
    %157 = vector.multi_reduction <add>, %156, %cst_51 [1] : vector<8x8xf32> to vector<8xf32>
    %158 = vector.shape_cast %157 : vector<8xf32> to vector<8x1xf32>
    %159 = tpu.reciprocal %158 {approx = true} : vector<8x1xf32> -> vector<8x1xf32>
    %160 = vector.broadcast %159 : vector<8x1xf32> to vector<8x8xf32>
    %161 = arith.mulf %156, %160 : vector<8x8xf32>
    %162 = vector.extract_strided_slice %106 {offsets = [0, 16], sizes = [8, 8], strides = [1, 1]} : vector<8x32xf32> to vector<8x8xf32>
    %cst_52 = arith.constant dense<0.000000e+00> : vector<8x8xf32>
    %163 = tpu.matmul %161, %162, %cst_52 {dimension_numbers = #tpu.dot_dimension_numbers<[1], [0], [0], [1], [0, 0, 1, 1], [], []>} : vector<8x8xf32>, vector<8x8xf32>, vector<8x8xf32> -> vector<8x8xf32>
    %164 = vector.extract_strided_slice %118 {offsets = [0, 0, 24], sizes = [8, 8, 8], strides = [1, 1, 1]} : vector<8x8x32xf32> to vector<8x8x8xf32>
    %cst_53 = arith.constant dense<0.000000e+00> : vector<8x8xf32>
    %165 = vector.multi_reduction <add>, %164, %cst_53 [2] : vector<8x8x8xf32> to vector<8x8xf32>
    %166 = arith.addf %165, %3 : vector<8x8xf32>
    %cst_54 = arith.constant dense<0xFF800000> : vector<8xf32>
    %167 = vector.multi_reduction <maximumf>, %166, %cst_54 [1] : vector<8x8xf32> to vector<8xf32>
    %168 = vector.shape_cast %167 : vector<8xf32> to vector<8x1xf32>
    %169 = vector.broadcast %168 : vector<8x1xf32> to vector<8x8xf32>
    %170 = arith.subf %166, %169 : vector<8x8xf32>
    %171 = math.exp %170 : vector<8x8xf32>
    %cst_55 = arith.constant dense<0.000000e+00> : vector<8xf32>
    %172 = vector.multi_reduction <add>, %171, %cst_55 [1] : vector<8x8xf32> to vector<8xf32>
    %173 = vector.shape_cast %172 : vector<8xf32> to vector<8x1xf32>
    %174 = tpu.reciprocal %173 {approx = true} : vector<8x1xf32> -> vector<8x1xf32>
    %175 = vector.broadcast %174 : vector<8x1xf32> to vector<8x8xf32>
    %176 = arith.mulf %171, %175 : vector<8x8xf32>
    %177 = vector.extract_strided_slice %106 {offsets = [0, 24], sizes = [8, 8], strides = [1, 1]} : vector<8x32xf32> to vector<8x8xf32>
    %cst_56 = arith.constant dense<0.000000e+00> : vector<8x8xf32>
    %178 = tpu.matmul %176, %177, %cst_56 {dimension_numbers = #tpu.dot_dimension_numbers<[1], [0], [0], [1], [0, 0, 1, 1], [], []>} : vector<8x8xf32>, vector<8x8xf32>, vector<8x8xf32> -> vector<8x8xf32>
    %179 = tpu.concatenate %133, %148, %163, %178 in 1 : vector<8x8xf32>, vector<8x8xf32>, vector<8x8xf32>, vector<8x8xf32> -> vector<8x32xf32>
    %180 = arith.addf %179, %102 : vector<8x32xf32>
    %cst_57 = arith.constant dense<0.000000e+00> : vector<8xf32>
    %181 = vector.multi_reduction <add>, %180, %cst_57 [1] : vector<8x32xf32> to vector<8xf32>
    %182 = vector.shape_cast %181 : vector<8xf32> to vector<8x1xf32>
    %cst_58 = arith.constant 3.200000e+01 : f32
    %183 = vector.broadcast %cst_58 : f32 to vector<8x1xf32>
    %184 = arith.divf %182, %183 : vector<8x1xf32>
    %185 = vector.broadcast %184 : vector<8x1xf32> to vector<8x32xf32>
    %186 = arith.subf %180, %185 : vector<8x32xf32>
    %187 = arith.mulf %186, %186 : vector<8x32xf32>
    %cst_59 = arith.constant dense<0.000000e+00> : vector<8xf32>
    %188 = vector.multi_reduction <add>, %187, %cst_59 [1] : vector<8x32xf32> to vector<8xf32>
    %189 = vector.shape_cast %188 : vector<8xf32> to vector<8x1xf32>
    %cst_60 = arith.constant 3.200000e+01 : f32
    %190 = vector.broadcast %cst_60 : f32 to vector<8x1xf32>
    %191 = arith.divf %189, %190 : vector<8x1xf32>
    %cst_61 = arith.constant 9.99999974E-6 : f32
    %192 = vector.broadcast %cst_61 : f32 to vector<8x1xf32>
    %193 = arith.addf %191, %192 : vector<8x1xf32>
    %194 = math.rsqrt %193 : vector<8x1xf32>
    %195 = vector.broadcast %194 : vector<8x1xf32> to vector<8x32xf32>
    %196 = arith.mulf %186, %195 : vector<8x32xf32>
    %197 = vector.broadcast %4 : vector<1x32xf32> to vector<8x32xf32>
    %198 = arith.mulf %196, %197 : vector<8x32xf32>
    %199 = vector.broadcast %5 : vector<1x32xf32> to vector<8x32xf32>
    %200 = arith.addf %198, %199 : vector<8x32xf32>
    %c0_62 = arith.constant 0 : index
    %c0_63 = arith.constant 0 : index
    %201 = vector.load %arg7[%c0_62, %c0_63] : memref<32x64xf32, #tpu.memory_space<vmem>>, vector<32x64xf32>
    %cst_64 = arith.constant dense<0.000000e+00> : vector<8x64xf32>
    %202 = tpu.matmul %200, %201, %cst_64 {dimension_numbers = #tpu.dot_dimension_numbers<[1], [0], [0], [1], [0, 0, 1, 1], [], []>} : vector<8x32xf32>, vector<32x64xf32>, vector<8x64xf32> -> vector<8x64xf32>
    %203 = vector.extract_strided_slice %202 {offsets = [0, 0], sizes = [8, 32], strides = [1, 1]} : vector<8x64xf32> to vector<8x32xf32>
    %204 = vector.extract_strided_slice %202 {offsets = [0, 32], sizes = [8, 32], strides = [1, 1]} : vector<8x64xf32> to vector<8x32xf32>
    %205 = vector.shape_cast %203 : vector<8x32xf32> to vector<1x8x32xf32>
    %206 = vector.shape_cast %204 : vector<8x32xf32> to vector<8x1x32xf32>
    %207 = vector.broadcast %205 : vector<1x8x32xf32> to vector<8x8x32xf32>
    %208 = vector.broadcast %206 : vector<8x1x32xf32> to vector<8x8x32xf32>
    %209 = arith.addf %207, %208 : vector<8x8x32xf32>
    %cst_65 = arith.constant 2.100000e-01 : f32
    %210 = vector.broadcast %cst_65 : f32 to vector<8x8x32xf32>
    %211 = arith.mulf %210, %209 : vector<8x8x32xf32>
    %212 = arith.maximumf %209, %211 : vector<8x8x32xf32>
    %c0_66 = arith.constant 0 : index
    %c0_67 = arith.constant 0 : index
    %213 = vector.load %arg8[%c0_66, %c0_67] : memref<1x32xf32, #tpu.memory_space<vmem>>, vector<1x32xf32>
    %214 = vector.shape_cast %213 : vector<1x32xf32> to vector<1x1x32xf32>
    %215 = vector.broadcast %214 : vector<1x1x32xf32> to vector<8x8x32xf32>
    %216 = arith.mulf %212, %215 : vector<8x8x32xf32>
    %217 = vector.extract_strided_slice %216 {offsets = [0, 0, 0], sizes = [8, 8, 8], strides = [1, 1, 1]} : vector<8x8x32xf32> to vector<8x8x8xf32>
    %cst_68 = arith.constant dense<0.000000e+00> : vector<8x8xf32>
    %218 = vector.multi_reduction <add>, %217, %cst_68 [2] : vector<8x8x8xf32> to vector<8x8xf32>
    %219 = arith.addf %218, %3 : vector<8x8xf32>
    %cst_69 = arith.constant dense<0xFF800000> : vector<8xf32>
    %220 = vector.multi_reduction <maximumf>, %219, %cst_69 [1] : vector<8x8xf32> to vector<8xf32>
    %221 = vector.shape_cast %220 : vector<8xf32> to vector<8x1xf32>
    %222 = vector.broadcast %221 : vector<8x1xf32> to vector<8x8xf32>
    %223 = arith.subf %219, %222 : vector<8x8xf32>
    %224 = math.exp %223 : vector<8x8xf32>
    %cst_70 = arith.constant dense<0.000000e+00> : vector<8xf32>
    %225 = vector.multi_reduction <add>, %224, %cst_70 [1] : vector<8x8xf32> to vector<8xf32>
    %226 = vector.shape_cast %225 : vector<8xf32> to vector<8x1xf32>
    %227 = tpu.reciprocal %226 {approx = true} : vector<8x1xf32> -> vector<8x1xf32>
    %228 = vector.broadcast %227 : vector<8x1xf32> to vector<8x8xf32>
    %229 = arith.mulf %224, %228 : vector<8x8xf32>
    %230 = vector.extract_strided_slice %204 {offsets = [0, 0], sizes = [8, 8], strides = [1, 1]} : vector<8x32xf32> to vector<8x8xf32>
    %cst_71 = arith.constant dense<0.000000e+00> : vector<8x8xf32>
    %231 = tpu.matmul %229, %230, %cst_71 {dimension_numbers = #tpu.dot_dimension_numbers<[1], [0], [0], [1], [0, 0, 1, 1], [], []>} : vector<8x8xf32>, vector<8x8xf32>, vector<8x8xf32> -> vector<8x8xf32>
    %232 = vector.extract_strided_slice %216 {offsets = [0, 0, 8], sizes = [8, 8, 8], strides = [1, 1, 1]} : vector<8x8x32xf32> to vector<8x8x8xf32>
    %cst_72 = arith.constant dense<0.000000e+00> : vector<8x8xf32>
    %233 = vector.multi_reduction <add>, %232, %cst_72 [2] : vector<8x8x8xf32> to vector<8x8xf32>
    %234 = arith.addf %233, %3 : vector<8x8xf32>
    %cst_73 = arith.constant dense<0xFF800000> : vector<8xf32>
    %235 = vector.multi_reduction <maximumf>, %234, %cst_73 [1] : vector<8x8xf32> to vector<8xf32>
    %236 = vector.shape_cast %235 : vector<8xf32> to vector<8x1xf32>
    %237 = vector.broadcast %236 : vector<8x1xf32> to vector<8x8xf32>
    %238 = arith.subf %234, %237 : vector<8x8xf32>
    %239 = math.exp %238 : vector<8x8xf32>
    %cst_74 = arith.constant dense<0.000000e+00> : vector<8xf32>
    %240 = vector.multi_reduction <add>, %239, %cst_74 [1] : vector<8x8xf32> to vector<8xf32>
    %241 = vector.shape_cast %240 : vector<8xf32> to vector<8x1xf32>
    %242 = tpu.reciprocal %241 {approx = true} : vector<8x1xf32> -> vector<8x1xf32>
    %243 = vector.broadcast %242 : vector<8x1xf32> to vector<8x8xf32>
    %244 = arith.mulf %239, %243 : vector<8x8xf32>
    %245 = vector.extract_strided_slice %204 {offsets = [0, 8], sizes = [8, 8], strides = [1, 1]} : vector<8x32xf32> to vector<8x8xf32>
    %cst_75 = arith.constant dense<0.000000e+00> : vector<8x8xf32>
    %246 = tpu.matmul %244, %245, %cst_75 {dimension_numbers = #tpu.dot_dimension_numbers<[1], [0], [0], [1], [0, 0, 1, 1], [], []>} : vector<8x8xf32>, vector<8x8xf32>, vector<8x8xf32> -> vector<8x8xf32>
    %247 = vector.extract_strided_slice %216 {offsets = [0, 0, 16], sizes = [8, 8, 8], strides = [1, 1, 1]} : vector<8x8x32xf32> to vector<8x8x8xf32>
    %cst_76 = arith.constant dense<0.000000e+00> : vector<8x8xf32>
    %248 = vector.multi_reduction <add>, %247, %cst_76 [2] : vector<8x8x8xf32> to vector<8x8xf32>
    %249 = arith.addf %248, %3 : vector<8x8xf32>
    %cst_77 = arith.constant dense<0xFF800000> : vector<8xf32>
    %250 = vector.multi_reduction <maximumf>, %249, %cst_77 [1] : vector<8x8xf32> to vector<8xf32>
    %251 = vector.shape_cast %250 : vector<8xf32> to vector<8x1xf32>
    %252 = vector.broadcast %251 : vector<8x1xf32> to vector<8x8xf32>
    %253 = arith.subf %249, %252 : vector<8x8xf32>
    %254 = math.exp %253 : vector<8x8xf32>
    %cst_78 = arith.constant dense<0.000000e+00> : vector<8xf32>
    %255 = vector.multi_reduction <add>, %254, %cst_78 [1] : vector<8x8xf32> to vector<8xf32>
    %256 = vector.shape_cast %255 : vector<8xf32> to vector<8x1xf32>
    %257 = tpu.reciprocal %256 {approx = true} : vector<8x1xf32> -> vector<8x1xf32>
    %258 = vector.broadcast %257 : vector<8x1xf32> to vector<8x8xf32>
    %259 = arith.mulf %254, %258 : vector<8x8xf32>
    %260 = vector.extract_strided_slice %204 {offsets = [0, 16], sizes = [8, 8], strides = [1, 1]} : vector<8x32xf32> to vector<8x8xf32>
    %cst_79 = arith.constant dense<0.000000e+00> : vector<8x8xf32>
    %261 = tpu.matmul %259, %260, %cst_79 {dimension_numbers = #tpu.dot_dimension_numbers<[1], [0], [0], [1], [0, 0, 1, 1], [], []>} : vector<8x8xf32>, vector<8x8xf32>, vector<8x8xf32> -> vector<8x8xf32>
    %262 = vector.extract_strided_slice %216 {offsets = [0, 0, 24], sizes = [8, 8, 8], strides = [1, 1, 1]} : vector<8x8x32xf32> to vector<8x8x8xf32>
    %cst_80 = arith.constant dense<0.000000e+00> : vector<8x8xf32>
    %263 = vector.multi_reduction <add>, %262, %cst_80 [2] : vector<8x8x8xf32> to vector<8x8xf32>
    %264 = arith.addf %263, %3 : vector<8x8xf32>
    %cst_81 = arith.constant dense<0xFF800000> : vector<8xf32>
    %265 = vector.multi_reduction <maximumf>, %264, %cst_81 [1] : vector<8x8xf32> to vector<8xf32>
    %266 = vector.shape_cast %265 : vector<8xf32> to vector<8x1xf32>
    %267 = vector.broadcast %266 : vector<8x1xf32> to vector<8x8xf32>
    %268 = arith.subf %264, %267 : vector<8x8xf32>
    %269 = math.exp %268 : vector<8x8xf32>
    %cst_82 = arith.constant dense<0.000000e+00> : vector<8xf32>
    %270 = vector.multi_reduction <add>, %269, %cst_82 [1] : vector<8x8xf32> to vector<8xf32>
    %271 = vector.shape_cast %270 : vector<8xf32> to vector<8x1xf32>
    %272 = tpu.reciprocal %271 {approx = true} : vector<8x1xf32> -> vector<8x1xf32>
    %273 = vector.broadcast %272 : vector<8x1xf32> to vector<8x8xf32>
    %274 = arith.mulf %269, %273 : vector<8x8xf32>
    %275 = vector.extract_strided_slice %204 {offsets = [0, 24], sizes = [8, 8], strides = [1, 1]} : vector<8x32xf32> to vector<8x8xf32>
    %cst_83 = arith.constant dense<0.000000e+00> : vector<8x8xf32>
    %276 = tpu.matmul %274, %275, %cst_83 {dimension_numbers = #tpu.dot_dimension_numbers<[1], [0], [0], [1], [0, 0, 1, 1], [], []>} : vector<8x8xf32>, vector<8x8xf32>, vector<8x8xf32> -> vector<8x8xf32>
    %277 = tpu.concatenate %231, %246, %261, %276 in 1 : vector<8x8xf32>, vector<8x8xf32>, vector<8x8xf32>, vector<8x8xf32> -> vector<8x32xf32>
    %278 = arith.addf %277, %200 : vector<8x32xf32>
    %cst_84 = arith.constant dense<0.000000e+00> : vector<8xf32>
    %279 = vector.multi_reduction <add>, %278, %cst_84 [1] : vector<8x32xf32> to vector<8xf32>
    %280 = vector.shape_cast %279 : vector<8xf32> to vector<8x1xf32>
    %cst_85 = arith.constant 3.200000e+01 : f32
    %281 = vector.broadcast %cst_85 : f32 to vector<8x1xf32>
    %282 = arith.divf %280, %281 : vector<8x1xf32>
    %283 = vector.broadcast %282 : vector<8x1xf32> to vector<8x32xf32>
    %284 = arith.subf %278, %283 : vector<8x32xf32>
    %285 = arith.mulf %284, %284 : vector<8x32xf32>
    %cst_86 = arith.constant dense<0.000000e+00> : vector<8xf32>
    %286 = vector.multi_reduction <add>, %285, %cst_86 [1] : vector<8x32xf32> to vector<8xf32>
    %287 = vector.shape_cast %286 : vector<8xf32> to vector<8x1xf32>
    %cst_87 = arith.constant 3.200000e+01 : f32
    %288 = vector.broadcast %cst_87 : f32 to vector<8x1xf32>
    %289 = arith.divf %287, %288 : vector<8x1xf32>
    %cst_88 = arith.constant 9.99999974E-6 : f32
    %290 = vector.broadcast %cst_88 : f32 to vector<8x1xf32>
    %291 = arith.addf %289, %290 : vector<8x1xf32>
    %292 = math.rsqrt %291 : vector<8x1xf32>
    %293 = vector.broadcast %292 : vector<8x1xf32> to vector<8x32xf32>
    %294 = arith.mulf %284, %293 : vector<8x32xf32>
    %295 = vector.broadcast %4 : vector<1x32xf32> to vector<8x32xf32>
    %296 = arith.mulf %294, %295 : vector<8x32xf32>
    %297 = vector.broadcast %5 : vector<1x32xf32> to vector<8x32xf32>
    %298 = arith.addf %296, %297 : vector<8x32xf32>
    %c0_89 = arith.constant 0 : index
    %c0_90 = arith.constant 0 : index
    %299 = vector.load %arg9[%c0_89, %c0_90] : memref<32x1xf32, #tpu.memory_space<vmem>>, vector<32x1xf32>
    %cst_91 = arith.constant dense<0.000000e+00> : vector<8x1xf32>
    %300 = tpu.matmul %298, %299, %cst_91 {dimension_numbers = #tpu.dot_dimension_numbers<[1], [0], [0], [1], [0, 0, 1, 1], [], []>} : vector<8x32xf32>, vector<32x1xf32>, vector<8x1xf32> -> vector<8x1xf32>
    %c0_92 = arith.constant 0 : index
    %c0_93 = arith.constant 0 : index
    %301 = vector.load %arg10[%c0_92, %c0_93] : memref<1x1xf32, #tpu.memory_space<vmem>>, vector<1x1xf32>
    %302 = vector.broadcast %301 : vector<1x1xf32> to vector<8x1xf32>
    %303 = arith.addf %300, %302 : vector<8x1xf32>
    %cst_94 = arith.constant 2.100000e-01 : f32
    %304 = vector.broadcast %cst_94 : f32 to vector<8x1xf32>
    %305 = arith.mulf %304, %303 : vector<8x1xf32>
    %306 = arith.maximumf %303, %305 : vector<8x1xf32>
    %c0_95 = arith.constant 0 : index
    %c0_96 = arith.constant 0 : index
    %c0_97 = arith.constant 0 : index
    %307 = vector.load %arg13[%c0_95, %c0_96, %c0_97] : memref<1x8x1xf32, #tpu.memory_space<vmem>>, vector<1x8x1xf32>
    %308 = vector.shape_cast %307 : vector<1x8x1xf32> to vector<8x1xf32>
    %309 = vector.shape_cast %306 : vector<8x1xf32> to vector<1x8x1xf32>
    tpu.vector_store %arg13[%c0_95, %c0_96, %c0_97], %309 {strides = array<i32>} : memref<1x8x1xf32, #tpu.memory_space<vmem>>, vector<1x8x1xf32>,
    return
  }
  func.func @transform_0(%arg0: i32) -> (i32, i32, i32) {
    %c0_i32 = arith.constant 0 : i32
    %c0_i32_0 = arith.constant 0 : i32
    %c0_i32_1 = arith.constant 0 : i32
    return %arg0, %c0_i32, %c0_i32_0 : i32, i32, i32
  }
  func.func @transform_1(%arg0: i32) -> (i32, i32, i32) {
    %c0_i32 = arith.constant 0 : i32
    %c0_i32_0 = arith.constant 0 : i32
    %c0_i32_1 = arith.constant 0 : i32
    return %arg0, %c0_i32, %c0_i32_0 : i32, i32, i32
  }
  func.func @transform_2(%arg0: i32) -> (i32, i32) {
    %c0_i32 = arith.constant 0 : i32
    %c0_i32_0 = arith.constant 0 : i32
    %c0_i32_1 = arith.constant 0 : i32
    return %c0_i32, %c0_i32_0 : i32, i32
  }
  func.func @transform_3(%arg0: i32) -> (i32, i32) {
    %c0_i32 = arith.constant 0 : i32
    %c0_i32_0 = arith.constant 0 : i32
    %c0_i32_1 = arith.constant 0 : i32
    return %c0_i32, %c0_i32_0 : i32, i32
  }
  func.func @transform_4(%arg0: i32) -> (i32, i32) {
    %c0_i32 = arith.constant 0 : i32
    %c0_i32_0 = arith.constant 0 : i32
    %c0_i32_1 = arith.constant 0 : i32
    return %c0_i32, %c0_i32_0 : i32, i32
  }
  func.func @transform_5(%arg0: i32) -> (i32, i32) {
    %c0_i32 = arith.constant 0 : i32
    %c0_i32_0 = arith.constant 0 : i32
    %c0_i32_1 = arith.constant 0 : i32
    return %c0_i32, %c0_i32_0 : i32, i32
  }
  func.func @transform_6(%arg0: i32) -> (i32, i32) {
    %c0_i32 = arith.constant 0 : i32
    %c0_i32_0 = arith.constant 0 : i32
    %c0_i32_1 = arith.constant 0 : i32
    return %c0_i32, %c0_i32_0 : i32, i32
  }
  func.func @transform_7(%arg0: i32) -> (i32, i32) {
    %c0_i32 = arith.constant 0 : i32
    %c0_i32_0 = arith.constant 0 : i32
    %c0_i32_1 = arith.constant 0 : i32
    return %c0_i32, %c0_i32_0 : i32, i32
  }
  func.func @transform_8(%arg0: i32) -> (i32, i32) {
    %c0_i32 = arith.constant 0 : i32
    %c0_i32_0 = arith.constant 0 : i32
    %c0_i32_1 = arith.constant 0 : i32
    return %c0_i32, %c0_i32_0 : i32, i32
  }
  func.func @transform_9(%arg0: i32) -> (i32, i32) {
    %c0_i32 = arith.constant 0 : i32
    %c0_i32_0 = arith.constant 0 : i32
    %c0_i32_1 = arith.constant 0 : i32
    return %c0_i32, %c0_i32_0 : i32, i32
  }
  func.func @transform_10(%arg0: i32) -> (i32, i32) {
    %c0_i32 = arith.constant 0 : i32
    %c0_i32_0 = arith.constant 0 : i32
    %c0_i32_1 = arith.constant 0 : i32
    return %c0_i32, %c0_i32_0 : i32, i32
  }
  func.func @transform_11(%arg0: i32) -> (i32, i32) {
    %c0_i32 = arith.constant 0 : i32
    %c0_i32_0 = arith.constant 0 : i32
    %c0_i32_1 = arith.constant 0 : i32
    return %c0_i32, %c0_i32_0 : i32, i32
  }
  func.func @transform_12(%arg0: i32) -> (i32, i32, i32) {
    %c0_i32 = arith.constant 0 : i32
    %c0_i32_0 = arith.constant 0 : i32
    %c0_i32_1 = arith.constant 0 : i32
    return %arg0, %c0_i32, %c0_i32_0 : i32, i32, i32
  }
}

</mosaic_0001>

<bundles_post_ra>
// kernel: tpu_custom_call.1
= control target key start
LH: loop header
LB: loop body
LE: loop exit
PB: predicated region body
PF: predicated region fallthrough
CT: control target
= control target key end

     0   :  { %s10203_s0 = inlined_call_operand.vmem [shape: f32[2,8,16], index: 0, kind: input, shape index: {}]   ;;  %s10204_s1 = inlined_call_operand.hbm [shape: f32[2,8,8], index: 1, kind: input, shape index: {}]   ;;  %s10205_s2 = inlined_call_operand.hbm [shape: f32[16,64], index: 2, kind: input, shape index: {}]   ;;  %s10206_s3 = inlined_call_operand.vmem [shape: f32[1,32], index: 3, kind: input, shape index: {}]   ;;  %s10207_s4 = inlined_call_operand.vmem [shape: f32[32,64], index: 4, kind: input, shape index: {}]   ;;  %s10208_s5 = inlined_call_operand.vmem [shape: f32[1,32], index: 5, kind: input, shape index: {}]   ;;  %s10209_s6 = inlined_call_operand.hbm [shape: f32[32,64], index: 6, kind: input, shape index: {}]   ;;  %s10210_s7 = inlined_call_operand.vmem [shape: f32[1,32], index: 7, kind: input, shape index: {}]   ;;  %s10211_s8 = inlined_call_operand.vmem [shape: f32[32,1], index: 8, kind: input, shape index: {}]   ;;  %s10212_s9 = inlined_call_operand.<no memory space> [shape: f32[1,1], index: 9, kind: input, shape index: {}]   ;;  %s10213_s10 = inlined_call_operand.vmem [shape: f32[1,32], index: 10, kind: input, shape index: {}]   ;;  %s10214_s11 = inlined_call_operand.vmem [shape: f32[1,32], index: 11, kind: input, shape index: {}]   ;;  %s10215_s12 = inlined_call_operand.vmem [shape: f32[2,8,1], index: 12, kind: output, shape index: {}]  }
   0x1   :  { %10285 = sst [smem:[#allocation26_spill]] %s10215_s12  ;;  %v17_v0 = vstv %s10212_s9 }
   0x2   :  { %18 = vst [vmem:[#allocation2] sm:$0x1] %v17_v0 }
   0x3   :  { %19 = vsyncpa [#allocation4], 0 }
   0x4   :  { %21 = vsyncpa [#allocation4 + $0x1], 0 }
   0x5   :  { %22 = vsyncpa [#allocation6], 0  ;;  %s7787_s23 = smov 0   ;;  %s7789_s24 = smov 0  }
   0x6   :  { %s7791_s25 = smov 0   ;;  %s7793_s26 = smov 0  }
   0x7 LB: > { %s7806_s9 = sadd.s32 4294967295, %s7697_s26   ;;  %p74_p0 = scmp.ne.s32.totalorder %s7689_s24, %s7685_s23  ;;  %s7697_s26 = sphi %s7793_s26, %s10381_s26   ;;  %s7693_s25 = sphi %s7791_s25, %s10380_s25   ;;  %s7689_s24 = sphi %s7789_s24, %s10379_s24   ;;  %s7685_s23 = sphi %s7787_s23, %s10378_s23  }
   0x8   : > { %p10216_p1 = scmp.eq.s32.totalorder %s7806_s9, 0  ;;  %p7069_p2 = scmp.ge.s32.totalorder %s7697_s26, 1 }
   0x9   : > { %p321_p3 = scmp.lt.s32.totalorder %s7697_s26, 3  ;;  %s7699_s29 = smov [#allocation5]  }
   0xa   : > { %p7814_p4 = por %p10216_p1, %p74_p0  ;;  %s333_s30 = sshll.u32 %s7699_s29, 4  ;;  %s334_s30 = int_to_ptr.vmem [resolvable:$true] %s333_s30 }
   0xb   : > { %p7818_p5 = pnand %p7069_p2, %p321_p3  ;;  %s7700_s14 = smov [#allocation7]  }
   0xc   : > { %s10286_s27 = scalar_select %p7814_p4, 1, 0 }
   0xd   : > { %s10287_s28 = scalar_select %p7818_p5, 1, 0 }
   0xe   : > { %p7278_p6 = pneg %p7818_p5  ;;  %s355_s15 = sshll.u32 %s7700_s14, 4  ;;  %s7830_s15 = int_to_ptr.vmem [resolvable:$true] %s355_s15 }
   0xf   : > { %s7573_s18 = scalar_lea.hbm %s10205_s2, 256 }
  0x10   : > { %p7826_p7 = pnand %p7278_p6, %p10216_p1  ;;  %p7574_p8 = scmp.ne.s32.totalorder %s10205_s2, %s7573_s18 }
  0x11   : > { %p7580_p12 = scmp.lt.u32.totalorder %s7573_s18, %s10205_s2 }
  0x12   : > { %p7575_p9 = pneg %p7826_p7 }
  0x14   : > { %p7576_p10 = pnand %p7575_p9, %p7574_p8 }
  0x16   : > { %p7577_p11 = pneg %p7576_p10 }
  0x18   : > { %p7582_p13 = pnand %p7580_p12, %p7577_p11 }
  0x1a   : > { %7585 = shalt.err (!%p7582_p13)
}
  0x1b   : > { %s7586_s23 = scalar_lea.vmem %s334_s30, 256  ;;  %p7594_p6 = scmp.lt.s32.totalorder %s334_s30, %s334_s30 }
  0x1c   : > { %p7587_p0 = scmp.ne.s32.totalorder %s334_s30, %s7586_s23  ;;  %p7595_p1 = scmp.lt.s32.totalorder %s7586_s23, %s7586_s23 }
  0x1e   : > { %p7589_p2 = pnand %p7587_p0, %p7575_p9  ;;  %p7596_p4 = por %p7595_p1, %p7594_p6 }
  0x20   : > { %p7590_p3 = pneg %p7589_p2 }
  0x22   : > { %p7597_p5 = pnand %p7596_p4, %p7590_p3 }
  0x24   : > { %7600 = shalt.err (!%p7597_p5)
}
  0x25   : > { %s7701_s29 = smov 128   ;;  %s7702_s14 = smov 8  }
  0x26   : > { %7281 = dma.hbm_to_vmem [thread:$0]  (!%p7826_p7), %s10205_s2, 256, %s334_s30, [#allocation6], %s7701_s29, %s7701_s29, %s7702_s14  }
  0x27   : > { %s7601_s20 = scalar_lea.hbm %s10209_s6, 512 }
  0x28   : > { %p7602_p8 = scmp.ne.s32.totalorder %s10209_s6, %s7601_s20  ;;  %p7608_p5 = scmp.lt.u32.totalorder %s7601_s20, %s10209_s6 }
  0x2a   : > { %p7604_p1 = pnand %p7602_p8, %p7575_p9 }
  0x2c   : > { %p7605_p4 = pneg %p7604_p1 }
  0x2e   : > { %p7610_p10 = pnand %p7608_p5, %p7605_p4 }
  0x30   : > { %7613 = shalt.err (!%p7610_p10)
}
  0x31   : > { %s7614_s30 = scalar_lea.vmem %s7830_s15, 512  ;;  %p7622_p0 = scmp.lt.s32.totalorder %s7830_s15, %s7830_s15 }
  0x32   : > { %p7615_p11 = scmp.ne.s32.totalorder %s7830_s15, %s7614_s30  ;;  %p7623_p2 = scmp.lt.s32.totalorder %s7614_s30, %s7614_s30 }
  0x34   : > { %p7617_p12 = pnand %p7615_p11, %p7575_p9  ;;  %p7624_p3 = por %p7623_p2, %p7622_p0 }
  0x36   : > { %p7618_p13 = pneg %p7617_p12 }
  0x38   : > { %p7625_p6 = pnand %p7624_p3, %p7618_p13 }
  0x3a   : > { %7628 = shalt.err (!%p7625_p6)
}
  0x3b   : > { %7284 = dma.hbm_to_vmem [thread:$0]  (!%p7826_p7), %s10209_s6, 512, %s7830_s15, [#allocation6], %s7701_s29, %s7701_s29, %s7702_s14  }
  0x3c   : > { %s7880_s17 = sadd.s32 1, %s7697_s26   ;;  %s61_s18 = sadd.s32 1, %s7693_s25 }
  0x3d   : > { %s58_s13 = ssub.s32 %s7697_s26, %s7880_s17  ;;  %p68_p9 = scmp.ne.s32.totalorder %s7693_s25, %s7689_s24 }
  0x3e   : > { %p59_p8 = scmp.eq.s32.totalorder %s58_s13, 0  ;;  %p69_p1 = scmp.eq.s32.totalorder %s7697_s26, 0 }
  0x3f   : > { %p7291_p4 = scmp.lt.s32.totalorder %s7697_s26, 2  ;;  %s391_s19 = sand.u32 1, %s7693_s25  }
  0x40   : > { %s7891_s20 = scalar_select %p59_p8, %s7693_s25, %s61_s18  }
  0x41   : > { %p70_p5 = por %p69_p1, %p68_p9  ;;  %s7073_s21 = sshll.u32 %s391_s19, 3 }
  0x42   : > { %s7074_s22 = sshll.u32 %s7697_s26, 7  ;;  %s395_s15 = scalar_lea.vmem [#allocation3], %s7073_s21 }
  0x43   : > { %s7897_s12 = scalar_lea.hbm %s10204_s1, %s7074_s22  ;;  %s402_s29 = sshll.u32 %s395_s15, 4  ;;  %s7903_s29 = int_to_ptr.vmem [resolvable:$true] %s402_s29 }
  0x44   : > { %p7899_p7 = pnand %p7291_p4, %p70_p5  ;;  %s392_s26 = scalar_lea.sflag [#allocation4], %s391_s19 }
  0x45   : > { %s7629_s16 = scalar_lea.hbm %s7897_s12, 128  ;;  %s7634_s21 = scalar_lea.hbm %s10204_s1, 256 }
  0x46   : > { %p7630_p10 = scmp.ne.s32.totalorder %s7897_s12, %s7629_s16  ;;  %p7631_p11 = pneg %p7899_p7 }
  0x47   : > { %p7635_p0 = scmp.lt.u32.totalorder %s7897_s12, %s10204_s1  ;;  %p7636_p2 = scmp.lt.u32.totalorder %s7634_s21, %s7629_s16 }
  0x48   : > { %p7632_p12 = pnand %p7631_p11, %p7630_p10  ;;  %p7638_p6 = scmp.lt.u32.totalorder %s7629_s16, %s7897_s12 }
  0x49   : > { %p7637_p3 = por %p7636_p2, %p7635_p0 }
  0x4a   : > { %p7633_p13 = pneg %p7632_p12 }
  0x4b   : > { %p7639_p9 = por %p7638_p6, %p7637_p3 }
  0x4d   : > { %p7640_p8 = pnand %p7639_p9, %p7633_p13 }
  0x4f   : > { %7643 = shalt.err (!%p7640_p8)
}
  0x50   : > { %s7644_s19 = scalar_lea.vmem %s7903_s29, 128  ;;  %s7703_s30 = smov [#allocation3]  }
  0x51   : > { %p7645_p1 = scmp.ne.s32.totalorder %s7903_s29, %s7644_s19  ;;  %s7649_s15 = sshll.u32 %s7703_s30, 4  ;;  %s7650_s15 = int_to_ptr.vmem [resolvable:$false] %s7649_s15 }
  0x52   : > { %s7651_s18 = scalar_lea.vmem %s7650_s15, 256  ;;  %p7652_p10 = scmp.lt.s32.totalorder %s7903_s29, %s7650_s15 }
  0x53   : > { %p7647_p4 = pnand %p7645_p1, %p7631_p11  ;;  %p7653_p12 = scmp.lt.s32.totalorder %s7651_s18, %s7644_s19 }
  0x55   : > { %p7648_p5 = pneg %p7647_p4  ;;  %p7654_p0 = por %p7653_p12, %p7652_p10 }
  0x57   : > { %p7655_p2 = pnand %p7654_p0, %p7648_p5 }
  0x59   : > { %7658 = shalt.err (!%p7655_p2)
}
  0x5a   : > { %7288 = dma.hbm_to_vmem [thread:$0]  (!%p7899_p7), %s7897_s12, 128, %s7903_s29, %s392_s26  }
  0x5b   : > { %p10290_p13 = scmp.ne.s32.totalorder %s10287_s28, 0 }
  0x5d   : > { %411 = sbr.rel (%p10290_p13) target bundleno = 7012 (0x1b64), region = 68 }
  0x64   : > { %s413_s16 = sand.u32 1, %s7689_s24   ;;  %p10291_p11 = scmp.ne.s32.totalorder %s10286_s27, 0 }
  0x65   : > { %s7076_s13 = sshll.u32 %s413_s16, 3  ;;  %s414_s21 = scalar_lea.sflag [#allocation4], %s413_s16 }
  0x66   : > { %s417_s22 = scalar_lea.vmem [#allocation3], %s7076_s13 }
  0x67   : > { %7676 = dma.done.wait (%p10291_p11), %s414_s21, 128  }
  0x68   : > { %7678 = vsyncadd (%p10291_p11), %s414_s21, 4294967168  ;;  %p10292_p3 = scmp.eq.s32.totalorder %s7806_s9, 0 }
  0x6a   : > { %7680 = dma.done.wait (%p10292_p3), [#allocation6], 768   ;;  %p10293_p6 = pmov %p10292_p3 }
  0x6b   : > { %p469_p7 = scmp.lt.s32.totalorder %s7806_s9, 1  ;;  %v562_v1 = vlaneseq  ;;  %v10219_v2 = vmov 0.0|0.0   ;;  %vm7705_vm0 = vmmov 0   ;;  %v10221_v3 = vmov 0.0   ;;  %v481_v7 = vld [vmem:[#allocation5] sm:$0xff]  ;;  %v482_v8 = vld [vmem:[#allocation5 + $0x8] sm:$0xff] }
  0x6c   : > { %7682 = vsyncadd (%p10293_p6), [#allocation6], 4294966528  ;;  %7247 = vmatprep.subr.bf16.mxu0 %v10219_v2  ;;  %7151 = vmatprep.mubr.msk.f32.mxu0 %vm7705_vm0, %v10221_v3  ;;  %v7248_v11 = vpack.c.bf16 %v482_v8, %v481_v7  ;;  %v478_v12 = vld [vmem:[%s417_s22] sm:$0xff]  ;;  %vm483_vm1 = vcmask 130048   ;;  %v7707_v26 = vmov 1966171168  }
  0x6d   : > { %s10383_s9 = smov (!%p469_p7, %s7806_s9), 1  ;;  %v7949_v4 = vshrl.u32 %v562_v1, 7  ;;  %7154 = vmatprep.subr.mxu1 %v10221_v3  ;;  %7156 = vmatprep.mubr.msk.f32.mxu1 %vm7705_vm0, %v10221_v3  ;;  %v560_v27 = vunpack.c.l.s4 %v7707_v26  ;;  %s7708_s14 = smov 96   ;;  %v7082_v7 = vld [vmem:[%s10206_s3] ss:$0 sm:$0xff]  ;;  %vm702_vm2 = vcmask 64512  }
  0x6e   : > { %s10248_s27 = sshll.u32 %s10383_s9, 3  ;;  %7249 = vmatpush3.bf16.msra.mxu0 %v7248_v11  ;;  %s7709_s19 = smov 120   ;;  %vm866_vm3 = vcmask 1041409   ;;  %vm868_vm4 = vcmask 1042434   ;;  %vm870_vm5 = vcmask 1043459   ;;  %vm872_vm6 = vcmask 1044484  }
  0x6f   : > { %v7956_v5 = vsub.s32 0, %v7949_v4  ;;  %v7959_v6 = vsub.s32 1, %v7949_v4  ;;  %s472_s29 = scalar_lea.vmem %s10203_s0, %s10248_s27  ;;  %v7967_v9 = vsub.s32 3, %v7949_v4  ;;  %v7970_v10 = vsub.s32 2, %v7949_v4  ;;  %7250 = vmatprep.subr.bf16.mxu0 %v10219_v2  ;;  %s7710_s30 = smov 112  }
  0x70   : > { %v477_v15 = vld [vmem:[%s472_s29] sm:$0xff]  ;;  %v7977_v18 = vsub.s32 4, %v7949_v4  ;;  %v7985_v20 = vsub.s32 5, %v7949_v4  ;;  %v7989_v22 = vsub.s32 6, %v7949_v4  ;;  %v7993_v24 = vsub.s32 7, %v7949_v4  ;;  %s7711_s15 = smov 104  }
  0x71   : > { %v738_v13 = vrot.slane %v478_v12, %v7959_v6  ;;  %v731_v14 = vrot.slane %v478_v12, %v7956_v5  ;;  %v752_v16 = vrot.slane %v478_v12, %v7967_v9  ;;  %v745_v17 = vrot.slane %v478_v12, %v7970_v10  ;;  %7152 = vmatmul.mubr.msk.f32.vlgmr.msra.gmra.mrb[0].mxu0 %vm483_vm1, %v477_v15  ;;  %s7713_s18 = smov 88   ;;  %s7714_s16 = smov 80  }
  0x72   : > { %7182 = vmatprep.mubr.msk.f32.mxu0 %vm7705_vm0, %v10221_v3  ;;  %v759_v19 = vrot.slane %v478_v12, %v7977_v18  ;;  %v766_v21 = vrot.slane %v478_v12, %v7985_v20  ;;  %v773_v23 = vrot.slane %v478_v12, %v7989_v22  ;;  %v780_v25 = vrot.slane %v478_v12, %v7993_v24  ;;  %s7715_s13 = smov 72   ;;  %s10253_s21 = smov 8  }
  0x73   : > { %740 = vbcast.lane.b32.xlu0 %v738_v13, 256  ;;  %733 = vbcast.lane.b32.xlu1 %v731_v14, 256  ;;  %v561_v28 = vunpack.c.0.s8 %v560_v27  ;;  %vm874_vm7 = vcmask 1045509   ;;  %vm876_vm8 = vcmask 1046534   ;;  %vm878_vm9 = vcmask 1047559   ;;  %s10251_s22 = smov 16  }
  0x74   : > { %s10249_s28 = smov 24   ;;  %vm2643_vm10 = vcmask 195584   ;;  %vm2645_vm11 = vcmask 261120   ;;  %s10341_s26 = smov 8   ;;  %vm6970_vm12 = vcmask 7168  }
  0x75   : > { %v7997_v29 = vsub.s32 %v561_v28, %v7949_v4  ;;  %s10342_s23 = smov 16   ;;  %s10343_s12 = smov 24  }
  0x77   : > { %754 = vbcast.lane.b32.xlu0 %v752_v16, 256  ;;  %747 = vbcast.lane.b32.xlu1 %v745_v17, 256  ;;  %10294 = vst [vmem:[#allocation10_spill] sm:$0xff] %v7997_v29 }
  0x7b   : > { %761 = vbcast.lane.b32.xlu0 %v759_v19, 256  ;;  %768 = vbcast.lane.b32.xlu1 %v766_v21, 256 }
  0x7f   : > { %775 = vbcast.lane.b32.xlu0 %v773_v23, 256  ;;  %782 = vbcast.lane.b32.xlu1 %v780_v25, 256 }
  0xe5   : > { %v8026_v53 = vpop.permute.xlu0 %740  ;;  %v8028_v54 = vpop.permute.xlu1 %733 }
  0xe6   : > { %10296 = vst [vmem:[#allocation12_spill] sm:$0xff] %v8026_v53  ;;  %10297 = vst [vmem:[#allocation13_spill] sm:$0xff] %v8028_v54 }
  0xe9   : > { %v8030_v55 = vpop.permute.xlu0 %754  ;;  %v8032_v56 = vpop.permute.xlu1 %747 }
  0xea   : > { %10298 = vst [vmem:[#allocation14_spill] sm:$0xff] %v8030_v55  ;;  %10299 = vst [vmem:[#allocation15_spill] sm:$0xff] %v8032_v56 }
  0xed   : > { %v8034_v57 = vpop.permute.xlu0 %761  ;;  %v8036_v58 = vpop.permute.xlu1 %768 }
  0xee   : > { %10300 = vst [vmem:[#allocation16_spill] sm:$0xff] %v8034_v57  ;;  %10301 = vst [vmem:[#allocation17_spill] sm:$0xff] %v8036_v58 }
  0xf1   : > { %v8038_v59 = vpop.permute.xlu0 %775  ;;  %v8040_v60 = vpop.permute.xlu1 %782 }
  0xf2   : > { %10302 = vst [vmem:[#allocation18_spill] sm:$0xff] %v8038_v59  ;;  %10303 = vst [vmem:[#allocation19_spill] sm:$0xff] %v8040_v60 }
 0x144   : > { %v7999_v30 = vpop.f32.mrb[0].mxu0 }
 0x145   : > { %10295 = vst [vmem:[#allocation11_spill] sm:$0xff] %v7999_v30  ;;  %v7153_v31 = vpop.f32.mrb[1].mxu0  ;;  %v565_v32 = vrot.slane %v7999_v30, %v7997_v29  ;;  %v558_v33 = vcombine.high %v7999_v30, %v7999_v30 }
 0x147   : > { %v581_v34 = vrot.slane %v565_v32, %v7997_v29  ;;  %v573_v35 = vcombine.high %v565_v32, %v565_v32  ;;  %v572_v36 = vrot.slane %v558_v33, %v7997_v29 }
 0x149   : > { %v610_v37 = vrot.slane %v581_v34, %v7956_v5  ;;  %v603_v38 = vcombine.high %v581_v34, %v581_v34  ;;  %v595_v39 = vrot.slane %v573_v35, %v7997_v29  ;;  %v574_v42 = vcombine.high %v572_v36, %v572_v36 }
 0x14a   : > { %v588_v44 = vrot.slane %v572_v36, %v7997_v29 }
 0x14b   : > { %639 = vrot.lane.b32.xlu0 %v610_v37, %s7708_s14  ;;  %v618_v40 = vrot.slane %v603_v38, %v7956_v5  ;;  %v605_v41 = vcombine.high %v595_v39, %v595_v39  ;;  %v614_v43 = vrot.slane %v595_v39, %v7956_v5  ;;  %v602_v46 = vrot.slane %v574_v42, %v7997_v29 }
 0x14c   : > { %v626_v47 = vrot.slane %v588_v44, %v7956_v5  ;;  %v604_v48 = vcombine.high %v588_v44, %v588_v44 }
 0x14d   : > { %643 = vrot.lane.b32.xlu1 %v618_v40, %s7708_s14  ;;  %v622_v45 = vrot.slane %v605_v41, %v7956_v5  ;;  %v630_v49 = vrot.slane %v602_v46, %v7956_v5  ;;  %v606_v50 = vcombine.high %v602_v46, %v602_v46 }
 0x14e   : > { %v634_v51 = vrot.slane %v604_v48, %v7956_v5 }
 0x14f   : > { %641 = vrot.lane.b32.xlu0 %v614_v43, %s7708_s14  ;;  %v638_v52 = vrot.slane %v606_v50, %v7956_v5 }
 0x151   : > { %645 = vrot.lane.b32.xlu1 %v622_v45, %s7708_s14 }
 0x153   : > { %647 = vrot.lane.b32.xlu0 %v626_v47, %s7708_s14 }
 0x155   : > { %649 = vrot.lane.b32.xlu1 %v630_v49, %s7708_s14 }
 0x157   : > { %651 = vrot.lane.b32.xlu0 %v634_v51, %s7708_s14 }
 0x159   : > { %653 = vrot.lane.b32.xlu1 %v638_v52, %s7708_s14 }
 0x1bd   : > { %v640_v61 = vpop.permute.xlu0 %639 }
 0x1be   : > { %v663_v62 = vadd.f32 %v640_v61, %v7999_v30 }
 0x1bf   : > { %v644_v63 = vpop.permute.xlu1 %643 }
 0x1c0   : > { %v671_v0 = vmul.f32 0.21, %v663_v62  ;;  %v665_v15 = vadd.f32 %v644_v63, %v7999_v30 }
 0x1c1   : > { %v642_v8 = vpop.permute.xlu0 %641 }
 0x1c2   : > { %v679_v11 = vmax.f32 %v663_v62, %v671_v0  ;;  %v664_v12 = vadd.f32 %v642_v8, %v7999_v30  ;;  %v673_v26 = vmul.f32 0.21, %v665_v15 }
 0x1c3   : > { %v646_v13 = vpop.permute.xlu1 %645 }
 0x1c4   : > { %v694_v14 = vmul.f32 %v7082_v7, %v679_v11  ;;  %v672_v16 = vmul.f32 0.21, %v664_v12  ;;  %v666_v17 = vadd.f32 %v646_v13, %v7999_v30  ;;  %v681_v37 = vmax.f32 %v665_v15, %v673_v26 }
 0x1c5   : > { %v648_v19 = vpop.permute.xlu0 %647 }
 0x1c6   : > { %v680_v21 = vmax.f32 %v664_v12, %v672_v16  ;;  %v674_v23 = vmul.f32 0.21, %v666_v17  ;;  %1228 = vrot.lane.b32.xlu0 %v694_v14, %s7709_s19  ;;  %v696_v44 = vmul.f32 %v7082_v7, %v681_v37  ;;  %v703_v48 = vsel %vm702_vm2, %v694_v14, 0.0 }
 0x1c7   : > { %v650_v25 = vpop.permute.xlu1 %649  ;;  %v667_v49 = vadd.f32 %v648_v19, %v7999_v30 }
 0x1c8   : > { %v695_v27 = vmul.f32 %v7082_v7, %v680_v21  ;;  %v682_v28 = vmax.f32 %v666_v17, %v674_v23  ;;  %v668_v31 = vadd.f32 %v650_v25, %v7999_v30  ;;  %v709_v63 = vsel %vm702_vm2, %v696_v44, 0.0 }
 0x1c9   : > { %v652_v32 = vpop.permute.xlu0 %651  ;;  %v675_v50 = vmul.f32 0.21, %v667_v49 }
 0x1ca   : > { %v697_v33 = vmul.f32 %v7082_v7, %v682_v28  ;;  %v676_v34 = vmul.f32 0.21, %v668_v31  ;;  %v669_v35 = vadd.f32 %v652_v32, %v7999_v30  ;;  %1695 = vrot.lane.b32.xlu0 %v694_v14, %s7710_s30  ;;  %1230 = vrot.lane.b32.xlu1 %v695_v27, %s7709_s19  ;;  %v706_v61 = vsel %vm702_vm2, %v695_v27, 0.0 }
 0x1cb   : > { %v654_v36 = vpop.permute.xlu1 %653  ;;  %v683_v51 = vmax.f32 %v667_v49, %v675_v50 }
 0x1cc   : > { %v684_v38 = vmax.f32 %v668_v31, %v676_v34  ;;  %v677_v39 = vmul.f32 0.21, %v669_v35  ;;  %v670_v40 = vadd.f32 %v654_v36, %v7999_v30  ;;  %v712_v8 = vsel %vm702_vm2, %v697_v33, 0.0 }
 0x1cd   : > { %v698_v52 = vmul.f32 %v7082_v7, %v683_v51 }
 0x1ce   : > { %v699_v41 = vmul.f32 %v7082_v7, %v684_v38  ;;  %v685_v42 = vmax.f32 %v669_v35, %v677_v39  ;;  %v678_v43 = vmul.f32 0.21, %v670_v40  ;;  %2162 = vrot.lane.b32.xlu0 %v694_v14, %s7711_s15  ;;  %1697 = vrot.lane.b32.xlu1 %v695_v27, %s7710_s30 }
 0x1cf   : > { %v715_v62 = vsel %vm702_vm2, %v698_v52, 0.0 }
 0x1d0   : > { %v700_v45 = vmul.f32 %v7082_v7, %v685_v42  ;;  %v686_v46 = vmax.f32 %v670_v40, %v678_v43  ;;  %v718_v12 = vsel %vm702_vm2, %v699_v41, 0.0 }
 0x1d2   : > { %v701_v47 = vmul.f32 %v7082_v7, %v686_v46  ;;  %1699 = vrot.lane.b32.xlu1 %v696_v44, %s7710_s30  ;;  %v721_v0 = vsel %vm702_vm2, %v700_v45, 0.0  ;;  %v7712_v7 = vmov 0  }
 0x1d3   : > { %7346 = vset.pattern.permute.xlu0 %v7712_v7  ;;  %7345 = vset.pattern.permute.xlu1 %v7712_v7 }
 0x1d4   : > { %v724_v17 = vsel %vm702_vm2, %v701_v47, 0.0 }
 0x1d6   : > { %2164 = vrot.lane.b32.xlu1 %v695_v27, %s7711_s15 }
 0x1da   : > { %2166 = vrot.lane.b32.xlu1 %v696_v44, %s7711_s15 }
 0x1ed   : > { %704 = vadd.xlane.f32.xlu0 %v703_v48 }
 0x1fe   : > { %707 = vadd.xlane.f32.xlu1 %v706_v61 }
 0x202   : > { %716 = vadd.xlane.f32.xlu1 %v715_v62 }
 0x203   : > { %1232 = vrot.lane.b32.xlu0 %v696_v44, %s7709_s19 }
 0x207   : > { %1236 = vrot.lane.b32.xlu0 %v698_v52, %s7709_s19 }
 0x20b   : > { %1703 = vrot.lane.b32.xlu0 %v698_v52, %s7710_s30 }
 0x20f   : > { %2170 = vrot.lane.b32.xlu0 %v698_v52, %s7711_s15 }
 0x213   : > { %1234 = vrot.lane.b32.xlu1 %v697_v33, %s7709_s19 }
 0x217   : > { %1238 = vrot.lane.b32.xlu1 %v699_v41, %s7709_s19 }
 0x21b   : > { %1701 = vrot.lane.b32.xlu1 %v697_v33, %s7710_s30 }
 0x21f   : > { %1705 = vrot.lane.b32.xlu1 %v699_v41, %s7710_s30 }
 0x223   : > { %2168 = vrot.lane.b32.xlu1 %v697_v33, %s7711_s15 }
 0x227   : > { %2172 = vrot.lane.b32.xlu1 %v699_v41, %s7711_s15 }
 0x22e   : > { %710 = vadd.xlane.f32.xlu0 %v709_v63 }
 0x238   : > { %v1229_v11 = vpop.permute.xlu0 %1228 }
 0x239   : > { %v1252_v19 = vsel %vm702_vm2, %v1229_v11, 0.0 }
 0x23c   : > { %v1696_v13 = vpop.permute.xlu0 %1695  ;;  %v1231_v16 = vpop.permute.xlu1 %1230 }
 0x23d   : > { %v1719_v25 = vsel %vm702_vm2, %v1696_v13, 0.0  ;;  %v1255_v39 = vsel %vm702_vm2, %v1231_v16, 0.0 }
 0x240   : > { %v2163_v14 = vpop.permute.xlu0 %2162  ;;  %v1698_v23 = vpop.permute.xlu1 %1697 }
 0x241   : > { %v2186_v28 = vsel %vm702_vm2, %v2163_v14, 0.0  ;;  %v1722_v42 = vsel %vm702_vm2, %v1698_v23, 0.0 }
 0x244   : > { %1240 = vrot.lane.b32.xlu0 %v700_v45, %s7709_s19  ;;  %v1700_v27 = vpop.permute.xlu1 %1699 }
 0x245   : > { %v1725_v44 = vsel %vm702_vm2, %v1700_v27, 0.0 }
 0x248   : > { %1707 = vrot.lane.b32.xlu0 %v700_v45, %s7710_s30  ;;  %v2165_v33 = vpop.permute.xlu1 %2164 }
 0x249   : > { %v2189_v46 = vsel %vm702_vm2, %v2165_v33, 0.0 }
 0x24b   : > { %722 = vadd.xlane.f32.xlu1 %v721_v0 }
 0x24c   : > { %2174 = vrot.lane.b32.xlu0 %v700_v45, %s7711_s15  ;;  %v2167_v35 = vpop.permute.xlu1 %2166 }
 0x24d   : > { %v2192_v49 = vsel %vm702_vm2, %v2167_v35, 0.0 }
 0x25c   : > { %2176 = vrot.lane.b32.xlu1 %v701_v47, %s7711_s15 }
 0x26b   : > { %713 = vadd.xlane.f32.xlu0 %v712_v8 }
 0x26f   : > { %719 = vadd.xlane.f32.xlu0 %v718_v12 }
 0x27a   : > { %v8082_v15 = vpop.xlane.xlu0 %704 }
 0x27e   : > { %v1233_v21 = vpop.permute.xlu0 %1232 }
 0x27f   : > { %v1258_v40 = vsel %vm702_vm2, %v1233_v21, 0.0 }
 0x280   : > { %725 = vadd.xlane.f32.xlu1 %v724_v17 }
 0x282   : > { %v1237_v26 = vpop.permute.xlu0 %1236 }
 0x283   : > { %v1264_v31 = vsel %vm702_vm2, %v1237_v26, 0.0 }
 0x284   : > { %1253 = vadd.xlane.f32.xlu1 %v1252_v19 }
 0x285   : > { %1242 = vrot.lane.b32.xlu0 %v701_v47, %s7709_s19 }
 0x286   : > { %v1704_v32 = vpop.permute.xlu0 %1703 }
 0x287   : > { %v1731_v34 = vsel %vm702_vm2, %v1704_v32, 0.0 }
 0x288   : > { %1720 = vadd.xlane.f32.xlu1 %v1719_v25 }
 0x289   : > { %1709 = vrot.lane.b32.xlu0 %v701_v47, %s7710_s30 }
 0x28a   : > { %v2171_v45 = vpop.permute.xlu0 %2170 }
 0x28b   : > { %v708_v36 = vpop.xlane.xlu1 %707  ;;  %v2198_v52 = vsel %vm702_vm2, %v2171_v45, 0.0 }
 0x28c   : > { %2187 = vadd.xlane.f32.xlu1 %v2186_v28  ;;  %v8121_v35 = vadd.f32 %v8026_v53, %v708_v36 }
 0x28f   : > { %v717_v37 = vpop.xlane.xlu1 %716 }
 0x290   : > { %1265 = vadd.xlane.f32.xlu1 %v1264_v31  ;;  %v8110_v25 = vadd.f32 %v8034_v57, %v717_v37 }
 0x293   : > { %v1235_v38 = vpop.permute.xlu1 %1234 }
 0x294   : > { %1732 = vadd.xlane.f32.xlu1 %v1731_v34  ;;  %v1261_v63 = vsel %vm702_vm2, %v1235_v38, 0.0  ;;  %v8117_v34 = vadd.f32 %v8028_v54, %v8082_v15 }
 0x297   : > { %v1239_v41 = vpop.permute.xlu1 %1238 }
 0x298   : > { %v1267_v8 = vsel %vm702_vm2, %v1239_v41, 0.0 }
 0x29b   : > { %v1702_v43 = vpop.permute.xlu1 %1701 }
 0x29c   : > { %v1728_v12 = vsel %vm702_vm2, %v1702_v43, 0.0 }
 0x29f   : > { %v1706_v47 = vpop.permute.xlu1 %1705 }
 0x2a0   : > { %v1734_v13 = vsel %vm702_vm2, %v1706_v47, 0.0 }
 0x2a3   : > { %v2169_v50 = vpop.permute.xlu1 %2168 }
 0x2a4   : > { %v2195_v14 = vsel %vm702_vm2, %v2169_v50, 0.0 }
 0x2a7   : > { %v2173_v7 = vpop.permute.xlu1 %2172 }
 0x2a8   : > { %1256 = vadd.xlane.f32.xlu0 %v1255_v39  ;;  %v2201_v11 = vsel %vm702_vm2, %v2173_v7, 0.0 }
 0x2ac   : > { %1259 = vadd.xlane.f32.xlu0 %v1258_v40 }
 0x2b0   : > { %1723 = vadd.xlane.f32.xlu0 %v1722_v42 }
 0x2b4   : > { %1726 = vadd.xlane.f32.xlu0 %v1725_v44 }
 0x2b8   : > { %2190 = vadd.xlane.f32.xlu0 %v2189_v46 }
 0x2bb   : > { %v711_v48 = vpop.xlane.xlu0 %710 }
 0x2bc   : > { %2193 = vadd.xlane.f32.xlu0 %v2192_v49  ;;  %v8125_v37 = vadd.f32 %v8032_v56, %v711_v48 }
 0x2bf   : > { %v1241_v51 = vpop.permute.xlu0 %1240 }
 0x2c0   : > { %2199 = vadd.xlane.f32.xlu0 %v2198_v52  ;;  %v1270_v61 = vsel %vm702_vm2, %v1241_v51, 0.0 }
 0x2c1   : > { %1271 = vadd.xlane.f32.xlu1 %v1270_v61 }
 0x2c3   : > { %v1708_v62 = vpop.permute.xlu0 %1707 }
 0x2c4   : > { %1262 = vadd.xlane.f32.xlu0 %v1261_v63  ;;  %v1737_v0 = vsel %vm702_vm2, %v1708_v62, 0.0 }
 0x2c5   : > { %1738 = vadd.xlane.f32.xlu1 %v1737_v0 }
 0x2c7   : > { %v2175_v16 = vpop.permute.xlu0 %2174 }
 0x2c8   : > { %1268 = vadd.xlane.f32.xlu0 %v1267_v8  ;;  %v2204_v17 = vsel %vm702_vm2, %v2175_v16, 0.0 }
 0x2c9   : > { %2202 = vadd.xlane.f32.xlu1 %v2201_v11 }
 0x2cc   : > { %1729 = vadd.xlane.f32.xlu0 %v1728_v12 }
 0x2d0   : > { %1735 = vadd.xlane.f32.xlu0 %v1734_v13 }
 0x2d4   : > { %2196 = vadd.xlane.f32.xlu0 %v2195_v14 }
 0x2d8   : > { %2205 = vadd.xlane.f32.xlu0 %v2204_v17  ;;  %v723_v19 = vpop.xlane.xlu1 %722 }
 0x2d9   : > { %v8137_v36 = vadd.f32 %v8038_v59, %v723_v19 }
 0x2dc   : > { %v2177_v21 = vpop.permute.xlu1 %2176 }
 0x2dd   : > { %v2207_v23 = vsel %vm702_vm2, %v2177_v21, 0.0 }
 0x2de   : > { %2208 = vadd.xlane.f32.xlu0 %v2207_v23 }
 0x2f4   : > { %821 = vperm.xlu0 %7346, %v8110_v25  }
 0x2f8   : > { %v714_v26 = vpop.xlane.xlu0 %713 }
 0x2f9   : > { %v8129_v39 = vadd.f32 %v8030_v55, %v714_v26 }
 0x2fc   : > { %v720_v27 = vpop.xlane.xlu0 %719 }
 0x2fd   : > { %v8133_v15 = vadd.f32 %v8036_v58, %v720_v27 }
 0x300   : > { %v1243_v28 = vpop.permute.xlu0 %1242 }
 0x301   : > { %v1273_v31 = vsel %vm702_vm2, %v1243_v28, 0.0 }
 0x302   : > { %1274 = vadd.xlane.f32.xlu1 %v1273_v31 }
 0x304   : > { %v1710_v32 = vpop.permute.xlu0 %1709 }
 0x305   : > { %v1740_v33 = vsel %vm702_vm2, %v1710_v32, 0.0 }
 0x306   : > { %1741 = vadd.xlane.f32.xlu1 %v1740_v33 }
 0x30d   : > { %v726_v38 = vpop.xlane.xlu1 %725 }
 0x30e   : > { %v8141_v42 = vadd.f32 %v8040_v60, %v726_v38 }
 0x311   : > { %v1254_v40 = vpop.xlane.xlu1 %1253 }
 0x312   : > { %v8145_v43 = vadd.f32 %v1254_v40, %v8028_v54 }
 0x315   : > { %v1721_v41 = vpop.xlane.xlu1 %1720 }
 0x316   : > { %v8149_v45 = vadd.f32 %v1721_v41, %v8028_v54 }
 0x317   : > { %809 = vperm.xlu1 %7345, %v8117_v34  }
 0x319   : > { %v2188_v44 = vpop.xlane.xlu1 %2187 }
 0x31a   : > { %v8157_v49 = vadd.f32 %v2188_v44, %v8028_v54 }
 0x31b   : > { %812 = vperm.xlu1 %7345, %v8121_v35  }
 0x31d   : > { %v1266_v48 = vpop.xlane.xlu1 %1265 }
 0x31e   : > { %v8165_v52 = vadd.f32 %v1266_v48, %v8034_v57 }
 0x31f   : > { %815 = vperm.xlu1 %7345, %v8125_v37  }
 0x321   : > { %v1733_v62 = vpop.xlane.xlu1 %1732 }
 0x322   : > { %v8173_v0 = vadd.f32 %v1733_v62, %v8034_v57 }
 0x323   : > { %818 = vperm.xlu1 %7345, %v8129_v39  }
 0x327   : > { %824 = vperm.xlu1 %7345, %v8133_v15  }
 0x32b   : > { %827 = vperm.xlu1 %7345, %v8137_v36  }
 0x32f   : > { %830 = vperm.xlu1 %7345, %v8141_v42  }
 0x333   : > { %1293 = vperm.xlu1 %7345, %v8145_v43  }
 0x335   : > { %v1257_v46 = vpop.xlane.xlu0 %1256 }
 0x336   : > { %v8152_v47 = vadd.f32 %v1257_v46, %v8026_v53 }
 0x337   : > { %1760 = vperm.xlu1 %7345, %v8149_v45  }
 0x338   : > { %1296 = vperm.xlu0 %7346, %v8152_v47  }
 0x339   : > { %v1260_v50 = vpop.xlane.xlu0 %1259 }
 0x33a   : > { %v8160_v51 = vadd.f32 %v1260_v50, %v8032_v56 }
 0x33b   : > { %2227 = vperm.xlu1 %7345, %v8157_v49  }
 0x33c   : > { %1299 = vperm.xlu0 %7346, %v8160_v51  }
 0x33d   : > { %v1724_v61 = vpop.xlane.xlu0 %1723 }
 0x33e   : > { %v8168_v63 = vadd.f32 %v1724_v61, %v8026_v53 }
 0x33f   : > { %1305 = vperm.xlu1 %7345, %v8165_v52  }
 0x340   : > { %1763 = vperm.xlu0 %7346, %v8168_v63  }
 0x341   : > { %v1727_v7 = vpop.xlane.xlu0 %1726 }
 0x342   : > { %v8176_v8 = vadd.f32 %v1727_v7, %v8032_v56 }
 0x343   : > { %1772 = vperm.xlu1 %7345, %v8173_v0  }
 0x344   : > { %1766 = vperm.xlu0 %7346, %v8176_v8  }
 0x345   : > { %v2191_v11 = vpop.xlane.xlu0 %2190 }
 0x346   : > { %v8181_v12 = vadd.f32 %v2191_v11, %v8026_v53 }
 0x348   : > { %2230 = vperm.xlu0 %7346, %v8181_v12  }
 0x349   : > { %v2194_v13 = vpop.xlane.xlu0 %2193 }
 0x34a   : > { %v8185_v14 = vadd.f32 %v2194_v13, %v8032_v56 }
 0x34c   : > { %10304 = vst [vmem:[#allocation20_spill] sm:$0xff] %v8185_v14  ;;  %2233 = vperm.xlu0 %7346, %v8185_v14  }
 0x34d   : > { %v2200_v16 = vpop.xlane.xlu0 %2199 }
 0x34e   : > { %v8189_v17 = vadd.f32 %v2200_v16, %v8034_v57  ;;  %v1272_v19 = vpop.xlane.xlu1 %1271 }
 0x34f   : > { %v8193_v23 = vadd.f32 %v1272_v19, %v8038_v59 }
 0x350   : > { %2239 = vperm.xlu1 %7345, %v8189_v17  }
 0x351   : > { %v1263_v21 = vpop.xlane.xlu0 %1262 }
 0x352   : > { %v8196_v26 = vadd.f32 %v1263_v21, %v8030_v55  ;;  %v1739_v27 = vpop.xlane.xlu1 %1738 }
 0x353   : > { %v8201_v31 = vadd.f32 %v1739_v27, %v8038_v59 }
 0x354   : > { %1302 = vperm.xlu0 %7346, %v8196_v26   ;;  %1311 = vperm.xlu1 %7345, %v8193_v23  }
 0x355   : > { %v1269_v28 = vpop.xlane.xlu0 %1268 }
 0x356   : > { %v8204_v32 = vadd.f32 %v1269_v28, %v8036_v58  ;;  %v2203_v48 = vpop.xlane.xlu1 %2202 }
 0x357   : > { %v8221_v50 = vadd.f32 %v2203_v48, %v8036_v58  ;;  %v833_v48 = vand.u32 127, %v562_v1 }
 0x358   : > { %1308 = vperm.xlu0 %7346, %v8204_v32   ;;  %1778 = vperm.xlu1 %7345, %v8201_v31  }
 0x359   : > { %v1730_v33 = vpop.xlane.xlu0 %1729  ;;  %10306 = vst [vmem:[#allocation22_spill] sm:$0xff] %v8221_v50 }
 0x35a   : > { %v8209_v38 = vadd.f32 %v1730_v33, %v8030_v55 }
 0x35c   : > { %1769 = vperm.xlu0 %7346, %v8209_v38  }
 0x35d   : > { %v1736_v40 = vpop.xlane.xlu0 %1735 }
 0x35e   : > { %v8213_v41 = vadd.f32 %v1736_v40, %v8036_v58 }
 0x360   : > { %1775 = vperm.xlu0 %7346, %v8213_v41  }
 0x361   : > { %v2197_v44 = vpop.xlane.xlu0 %2196 }
 0x362   : > { %v8217_v46 = vadd.f32 %v2197_v44, %v8030_v55 }
 0x364   : > { %10305 = vst [vmem:[#allocation21_spill] sm:$0xff] %v8217_v46  ;;  %2236 = vperm.xlu0 %7346, %v8217_v46  }
 0x365   : > { %v2206_v61 = vpop.xlane.xlu0 %2205 }
 0x366   : > { %v8237_v27 = vadd.f32 %v2206_v61, %v8038_v59 }
 0x368   : > { %2242 = vperm.xlu0 %7346, %v8221_v50   ;;  %10308 = vst [vmem:[#allocation24_spill] sm:$0xff] %v8237_v27 }
 0x36b   : > { %v2209_v62 = vpop.xlane.xlu0 %2208 }
 0x36c   : > { %v8225_v7 = vadd.f32 %v2209_v62, %v8040_v60  ;;  %v8242_v62 = vsub.s32 %v833_v48, %v7949_v4 }
 0x36e   : > { %10307 = vst [vmem:[#allocation23_spill] sm:$0xff] %v8225_v7  ;;  %2248 = vperm.xlu0 %7346, %v8225_v7  }
 0x373   : > { %v822_v58 = vpop.permute.xlu0 %821 }
 0x374   : > { %v853_v48 = vrot.slane %v822_v58, %v8242_v62 }
 0x38f   : > { %v1275_v11 = vpop.xlane.xlu1 %1274 }
 0x390   : > { %v8229_v13 = vadd.f32 %v1275_v11, %v8040_v60 }
 0x392   : > { %1314 = vperm.xlu1 %7345, %v8229_v13  }
 0x393   : > { %v1742_v16 = vpop.xlane.xlu1 %1741 }
 0x394   : > { %v8233_v19 = vadd.f32 %v1742_v16, %v8040_v60 }
 0x396   : > { %1781 = vperm.xlu1 %7345, %v8233_v19  }
 0x397   : > { %v810_v21 = vpop.permute.xlu1 %809 }
 0x398   : > { %v837_v61 = vrot.slane %v810_v21, %v8242_v62 }
 0x39a   : > { %2245 = vperm.xlu1 %7345, %v8237_v27  }
 0x39b   : > { %v813_v28 = vpop.permute.xlu1 %812 }
 0x39c   : > { %v841_v16 = vrot.slane %v813_v28, %v8242_v62 }
 0x39e   : > { %v867_v55 = vsel %vm866_vm3, %v841_v16, %v837_v61 }
 0x39f   : > { %v816_v33 = vpop.permute.xlu1 %815 }
 0x3a0   : > { %v845_v2 = vrot.slane %v816_v33, %v8242_v62 }
 0x3a2   : > { %v869_v1 = vsel %vm868_vm4, %v845_v2, %v867_v55 }
 0x3a3   : > { %v819_v40 = vpop.permute.xlu1 %818 }
 0x3a4   : > { %v849_v3 = vrot.slane %v819_v40, %v8242_v62 }
 0x3a6   : > { %v871_v4 = vsel %vm870_vm5, %v849_v3, %v869_v1 }
 0x3a7   : > { %v825_v44 = vpop.permute.xlu1 %824  ;;  %v873_v40 = vsel %vm872_vm6, %v853_v48, %v871_v4 }
 0x3a8   : > { %v857_v28 = vrot.slane %v825_v44, %v8242_v62 }
 0x3aa   : > { %v875_v16 = vsel %vm874_vm7, %v857_v28, %v873_v40 }
 0x3ab   : > { %v828_v11 = vpop.permute.xlu1 %827 }
 0x3ac   : > { %v861_v21 = vrot.slane %v828_v11, %v8242_v62 }
 0x3ae   : > { %v877_v2 = vsel %vm876_vm8, %v861_v21, %v875_v16 }
 0x3af   : > { %v831_v56 = vpop.permute.xlu1 %830 }
 0x3b0   : > { %v865_v33 = vrot.slane %v831_v56, %v8242_v62 }
 0x3b2   : > { %v879_v3 = vsel %vm878_vm9, %v865_v33, %v877_v2 }
 0x3b3   : > { %v881_v55 = vsel %vm702_vm2, %v879_v3, -inf  ;;  %v1294_v1 = vpop.permute.xlu1 %1293 }
 0x3b4   : > { %v1319_v3 = vrot.slane %v1294_v1, %v8242_v62 }
 0x3b7   : > { %v1297_v44 = vpop.permute.xlu0 %1296  ;;  %v1761_v54 = vpop.permute.xlu1 %1760 }
 0x3b8   : > { %v1323_v33 = vrot.slane %v1297_v44, %v8242_v62  ;;  %v1786_v46 = vrot.slane %v1761_v54, %v8242_v62 }
 0x3ba   : > { %v1348_v29 = vsel %vm866_vm3, %v1323_v33, %v1319_v3 }
 0x3bb   : > { %v1300_v58 = vpop.permute.xlu0 %1299  ;;  %v2228_v60 = vpop.permute.xlu1 %2227 }
 0x3bc   : > { %v1327_v16 = vrot.slane %v1300_v58, %v8242_v62 }
 0x3be   : > { %882 = vmax.xlane.f32.xlu1 %v881_v55  ;;  %v1349_v7 = vsel %vm868_vm4, %v1327_v16, %v1348_v29 }
 0x3bf   : > { %v1764_v61 = vpop.permute.xlu0 %1763  ;;  %v1306_v48 = vpop.permute.xlu1 %1305 }
 0x3c0   : > { %v1790_v30 = vrot.slane %v1764_v61, %v8242_v62  ;;  %v1335_v1 = vrot.slane %v1306_v48, %v8242_v62 }
 0x3c2   : > { %v1815_v14 = vsel %vm866_vm3, %v1790_v30, %v1786_v46 }
 0x3c3   : > { %v1767_v11 = vpop.permute.xlu0 %1766  ;;  %v1773_v28 = vpop.permute.xlu1 %1772 }
 0x3c4   : > { %v1794_v50 = vrot.slane %v1767_v11, %v8242_v62 }
 0x3c6   : > { %v1816_v61 = vsel %vm868_vm4, %v1794_v50, %v1815_v14  ;;  %v2253_v14 = vrot.slane %v2228_v60, %v8242_v62 }
 0x3c7   : > { %v2231_v56 = vpop.permute.xlu0 %2230 }
 0x3cb   : > { %v2234_v59 = vpop.permute.xlu0 %2233 }
 0x3cc   : > { %v2261_v30 = vrot.slane %v2234_v59, %v8242_v62 }
 0x3cf   : > { %v2240_v40 = vpop.permute.xlu1 %2239 }
 0x3d3   : > { %v1303_v4 = vpop.permute.xlu0 %1302  ;;  %v1312_v2 = vpop.permute.xlu1 %1311 }
 0x3d4   : > { %v1331_v55 = vrot.slane %v1303_v4, %v8242_v62  ;;  %v1343_v48 = vrot.slane %v1312_v2, %v8242_v62 }
 0x3d6   : > { %v1350_v44 = vsel %vm870_vm5, %v1331_v55, %v1349_v7 }
 0x3d7   : > { %v1309_v57 = vpop.permute.xlu0 %1308  ;;  %v1779_v4 = vpop.permute.xlu1 %1778  ;;  %v1351_v29 = vsel %vm872_vm6, %v1335_v1, %v1350_v44 }
 0x3d8   : > { %v1339_v58 = vrot.slane %v1309_v57, %v8242_v62  ;;  %v1802_v57 = vrot.slane %v1773_v28, %v8242_v62  ;;  %v1810_v55 = vrot.slane %v1779_v4, %v8242_v62 }
 0x3da   : > { %v1352_v11 = vsel %vm874_vm7, %v1339_v58, %v1351_v29  ;;  %v2269_v29 = vrot.slane %v2240_v40, %v8242_v62 }
 0x3db   : > { %v1770_v21 = vpop.permute.xlu0 %1769 }
 0x3dc   : > { %v1798_v27 = vrot.slane %v1770_v21, %v8242_v62  ;;  %v2257_v21 = vrot.slane %v2231_v56, %v8242_v62 }
 0x3de   : > { %v1817_v54 = vsel %vm870_vm5, %v1798_v27, %v1816_v61  ;;  %v1353_v27 = vsel %vm876_vm8, %v1343_v48, %v1352_v11  ;;  %v2282_v2 = vsel %vm866_vm3, %v2257_v21, %v2253_v14 }
 0x3df   : > { %v1776_v53 = vpop.permute.xlu0 %1775  ;;  %v1818_v50 = vsel %vm872_vm6, %v1802_v57, %v1817_v54  ;;  %v2283_v60 = vsel %vm868_vm4, %v2261_v30, %v2282_v2 }
 0x3e0   : > { %v1806_v7 = vrot.slane %v1776_v53, %v8242_v62 }
 0x3e2   : > { %v1819_v53 = vsel %vm874_vm7, %v1806_v7, %v1818_v50 }
 0x3e3   : > { %v2237_v33 = vpop.permute.xlu0 %2236  ;;  %v1820_v61 = vsel %vm876_vm8, %v1810_v55, %v1819_v53 }
 0x3e4   : > { %v2265_v3 = vrot.slane %v2237_v33, %v8242_v62 }
 0x3e6   : > { %v2284_v1 = vsel %vm870_vm5, %v2265_v3, %v2283_v60 }
 0x3e7   : > { %v2243_v28 = vpop.permute.xlu0 %2242  ;;  %v2285_v57 = vsel %vm872_vm6, %v2269_v29, %v2284_v1 }
 0x3e8   : > { %v2273_v33 = vrot.slane %v2243_v28, %v8242_v62 }
 0x3ea   : > { %v2286_v48 = vsel %vm874_vm7, %v2273_v33, %v2285_v57 }
 0x3ed   : > { %v2249_v11 = vpop.permute.xlu0 %2248 }
 0x411   : > { %v1315_v16 = vpop.permute.xlu1 %1314 }
 0x412   : > { %v1347_v46 = vrot.slane %v1315_v16, %v8242_v62  ;;  %v2281_v16 = vrot.slane %v2249_v11, %v8242_v62 }
 0x414   : > { %v1354_v56 = vsel %vm878_vm9, %v1347_v46, %v1353_v27 }
 0x415   : > { %v1782_v59 = vpop.permute.xlu1 %1781  ;;  %v1356_v44 = vsel %vm702_vm2, %v1354_v56, -inf }
 0x416   : > { %v1814_v58 = vrot.slane %v1782_v59, %v8242_v62  ;;  %1357 = vmax.xlane.f32.xlu0 %v1356_v44 }
 0x418   : > { %v1821_v54 = vsel %vm878_vm9, %v1814_v58, %v1820_v61 }
 0x419   : > { %v2246_v4 = vpop.permute.xlu1 %2245  ;;  %v1823_v7 = vsel %vm702_vm2, %v1821_v54, -inf }
 0x41a   : > { %v2277_v21 = vrot.slane %v2246_v4, %v8242_v62  ;;  %1824 = vmax.xlane.f32.xlu0 %v1823_v7 }
 0x41c   : > { %v2287_v30 = vsel %vm876_vm8, %v2277_v21, %v2286_v48 }
 0x41d   : > { %v2288_v46 = vsel %vm878_vm9, %v2281_v16, %v2287_v30 }
 0x41e   : > { %v2290_v40 = vsel %vm702_vm2, %v2288_v46, -inf }
 0x41f   : > { %2291 = vmax.xlane.f32.xlu1 %v2290_v40 }
 0x44b   : > { %v883_v14 = vpop.xlane.xlu1 %882 }
 0x44c   : > { %v888_v50 = vrot.slane %v883_v14, %v7956_v5  ;;  %v892_v3 = vrot.slane %v883_v14, %v7959_v6  ;;  %v896_v27 = vrot.slane %v883_v14, %v7970_v10  ;;  %v900_v53 = vrot.slane %v883_v14, %v7967_v9 }
 0x44d   : > { %v908_v28 = vrot.slane %v883_v14, %v7985_v20  ;;  %v904_v59 = vrot.slane %v883_v14, %v7977_v18  ;;  %v912_v61 = vrot.slane %v883_v14, %v7989_v22 }
 0x44e   : > { %v925_v56 = vsub.f32 %v8117_v34, %v888_v50  ;;  %v926_v2 = vsub.f32 %v8121_v35, %v892_v3  ;;  %v928_v55 = vsub.f32 %v8129_v39, %v900_v53  ;;  %v927_v44 = vsub.f32 %v8125_v37, %v896_v27 }
 0x44f   : > { %v930_v1 = vsub.f32 %v8133_v15, %v908_v28  ;;  %v929_v29 = vsub.f32 %v8110_v25, %v904_v59  ;;  %v916_v39 = vrot.slane %v883_v14, %v7993_v24  ;;  %v931_v11 = vsub.f32 %v8137_v36, %v912_v61 }
 0x450   : > { %v933_v60 = vmul.f32 1.442695, %v925_v56  ;;  %v935_v58 = vmul.f32 1.442695, %v926_v2  ;;  %v939_v33 = vmul.f32 1.442695, %v928_v55 }
 0x451   : > { %v937_v34 = vmul.f32 1.442695, %v927_v44  ;;  %v943_v35 = vmul.f32 1.442695, %v930_v1  ;;  %v941_v37 = vmul.f32 1.442695, %v929_v29  ;;  %v932_v54 = vsub.f32 %v8141_v42, %v916_v39 }
 0x452   : > { %7347 = vpow2.f32 %v933_v60  ;;  %v945_v15 = vmul.f32 1.442695, %v931_v11 }
 0x453   : > { %7349 = vpow2.f32 %v935_v58  ;;  %v947_v25 = vmul.f32 1.442695, %v932_v54 }
 0x454   : > { %7351 = vpow2.f32 %v939_v33 }
 0x455   : > { %7353 = vpow2.f32 %v937_v34 }
 0x456   : > { %7355 = vpow2.f32 %v943_v35 }
 0x457   : > { %7357 = vpow2.f32 %v941_v37 }
 0x458   : > { %7359 = vpow2.f32 %v945_v15 }
 0x459   : > { %7361 = vpow2.f32 %v947_v25 }
 0x45c   : > { %v8324_v4 = vpop.eup %7347 }
 0x45d   : > { %v8326_v7 = vpop.eup %7349  ;;  %958 = vperm.xlu0 %7346, %v8324_v4  }
 0x45e   : > { %961 = vperm.xlu1 %7345, %v8326_v7   ;;  %v8330_v57 = vpop.eup %7351 }
 0x45f   : > { %v8332_v36 = vpop.eup %7353 }
 0x460   : > { %v8336_v42 = vpop.eup %7355 }
 0x461   : > { %967 = vperm.xlu0 %7346, %v8330_v57   ;;  %v8338_v21 = vpop.eup %7357 }
 0x462   : > { %964 = vperm.xlu1 %7345, %v8332_v36   ;;  %v8342_v48 = vpop.eup %7359 }
 0x463   : > { %v8345_v16 = vpop.eup %7361 }
 0x465   : > { %973 = vperm.xlu0 %7346, %v8336_v42  }
 0x466   : > { %970 = vperm.xlu1 %7345, %v8338_v21  }
 0x46a   : > { %976 = vperm.xlu1 %7345, %v8342_v48  }
 0x46e   : > { %979 = vperm.xlu1 %7345, %v8345_v16  }
 0x4a3   : > { %v1358_v30 = vpop.xlane.xlu0 %1357 }
 0x4a4   : > { %v1363_v46 = vrot.slane %v1358_v30, %v7956_v5  ;;  %v1367_v40 = vrot.slane %v1358_v30, %v7959_v6  ;;  %v1371_v14 = vrot.slane %v1358_v30, %v7970_v10  ;;  %v1379_v50 = vrot.slane %v1358_v30, %v7977_v18 }
 0x4a5   : > { %v1375_v53 = vrot.slane %v1358_v30, %v7967_v9  ;;  %v1383_v60 = vrot.slane %v1358_v30, %v7985_v20  ;;  %v1387_v58 = vrot.slane %v1358_v30, %v7989_v22 }
 0x4a6   : > { %v1400_v3 = vsub.f32 %v8145_v43, %v1363_v46  ;;  %v1401_v27 = vsub.f32 %v8152_v47, %v1367_v40  ;;  %v1402_v28 = vsub.f32 %v8160_v51, %v1371_v14  ;;  %v1404_v56 = vsub.f32 %v8165_v52, %v1379_v50 }
 0x4a7   : > { %v8357_v2 = vpop.xlane.xlu0 %1824  ;;  %v1403_v47 = vsub.f32 %v8196_v26, %v1375_v53  ;;  %v1391_v52 = vrot.slane %v1358_v30, %v7993_v24  ;;  %v1405_v33 = vsub.f32 %v8204_v32, %v1383_v60  ;;  %v1406_v61 = vsub.f32 %v8193_v23, %v1387_v58 }
 0x4a8   : > { %v1408_v55 = vmul.f32 1.442695, %v1400_v3  ;;  %v1410_v59 = vmul.f32 1.442695, %v1401_v27  ;;  %v1830_v44 = vrot.slane %v8357_v2, %v7956_v5  ;;  %v1416_v43 = vmul.f32 1.442695, %v1404_v56 }
 0x4a9   : > { %v1412_v1 = vmul.f32 1.442695, %v1402_v28  ;;  %v1414_v29 = vmul.f32 1.442695, %v1403_v47  ;;  %v1834_v34 = vrot.slane %v8357_v2, %v7959_v6  ;;  %v1407_v39 = vsub.f32 %v8229_v13, %v1391_v52 }
 0x4aa   : > { %7363 = vpow2.f32 %v1408_v55  ;;  %v1867_v51 = vsub.f32 %v8149_v45, %v1830_v44  ;;  %v1420_v26 = vmul.f32 1.442695, %v1406_v61  ;;  %v1846_v11 = vrot.slane %v8357_v2, %v7977_v18 }
 0x4ab   : > { %7365 = vpow2.f32 %v1410_v59  ;;  %v1418_v45 = vmul.f32 1.442695, %v1405_v33  ;;  %v1838_v32 = vrot.slane %v8357_v2, %v7970_v10  ;;  %v1868_v23 = vsub.f32 %v8168_v63, %v1834_v34 }
 0x4ac   : > { %7367 = vpow2.f32 %v1416_v43  ;;  %v1875_v35 = vmul.f32 1.442695, %v1867_v51  ;;  %v8376_v37 = vpop.xlane.xlu1 %2291  ;;  %v1422_v13 = vmul.f32 1.442695, %v1407_v39  ;;  %v1871_v25 = vsub.f32 %v8173_v0, %v1846_v11 }
 0x4ad   : > { %7369 = vpow2.f32 %v1412_v1  ;;  %v2297_v30 = vrot.slane %v8376_v37, %v7956_v5  ;;  %v1842_v63 = vrot.slane %v8357_v2, %v7967_v9  ;;  %v1869_v46 = vsub.f32 %v8176_v8, %v1838_v32  ;;  %v10310_v32 = vld [vmem:[#allocation24_spill] sm:$0xff] }
 0x4ae   : > { %7371 = vpow2.f32 %v1875_v35  ;;  %v1877_v40 = vmul.f32 1.442695, %v1868_v23  ;;  %v1854_v0 = vrot.slane %v8357_v2, %v7989_v22  ;;  %v1883_v3 = vmul.f32 1.442695, %v1871_v25  ;;  %v10311_v25 = vld [vmem:[#allocation21_spill] sm:$0xff] }
 0x4af   : > { %7373 = vpow2.f32 %v1414_v29  ;;  %v2334_v27 = vsub.f32 %v8157_v49, %v2297_v30  ;;  %v1850_v53 = vrot.slane %v8357_v2, %v7985_v20  ;;  %v1870_v8 = vsub.f32 %v8209_v38, %v1842_v63 }
 0x4b0   : > { %7375 = vpow2.f32 %v1420_v26  ;;  %v1879_v28 = vmul.f32 1.442695, %v1869_v46  ;;  %v1858_v59 = vrot.slane %v8357_v2, %v7993_v24  ;;  %v1873_v49 = vsub.f32 %v8201_v31, %v1854_v0 }
 0x4b1   : > { %7377 = vpow2.f32 %v1418_v45  ;;  %v2342_v44 = vmul.f32 1.442695, %v2334_v27  ;;  %v1872_v60 = vsub.f32 %v8213_v41, %v1850_v53  ;;  %v1881_v38 = vmul.f32 1.442695, %v1870_v8  ;;  %v10312_v27 = vld [vmem:[#allocation22_spill] sm:$0xff] }
 0x4b2   : > { %7379 = vpow2.f32 %v1422_v13  ;;  %v2301_v58 = vrot.slane %v8376_v37, %v7959_v6  ;;  %v1874_v2 = vsub.f32 %v8233_v19, %v1858_v59  ;;  %v1887_v31 = vmul.f32 1.442695, %v1873_v49  ;;  %v10313_v49 = vld [vmem:[#allocation23_spill] sm:$0xff] }
 0x4b3   : > { %7381 = vpow2.f32 %v1877_v40  ;;  %v2313_v1 = vrot.slane %v8376_v37, %v7977_v18  ;;  %v1885_v41 = vmul.f32 1.442695, %v1872_v60  ;;  %v2305_v51 = vrot.slane %v8376_v37, %v7970_v10 }
 0x4b4   : > { %v8378_v54 = vpop.eup %7363  ;;  %7383 = vpow2.f32 %v1883_v3  ;;  %v2335_v52 = vsub.f32 %v8181_v12, %v2301_v58  ;;  %v1889_v19 = vmul.f32 1.442695, %v1874_v2  ;;  %v2321_v29 = vrot.slane %v8376_v37, %v7989_v22  ;;  %v10309_v12 = vld [vmem:[#allocation20_spill] sm:$0xff] }
 0x4b5   : > { %v8380_v15 = vpop.eup %7365  ;;  %1433 = vperm.xlu1 %7345, %v8378_v54   ;;  %7385 = vpow2.f32 %v1879_v28  ;;  %v2338_v34 = vsub.f32 %v8189_v17, %v2313_v1  ;;  %v2309_v35 = vrot.slane %v8376_v37, %v7967_v9  ;;  %v2336_v39 = vsub.f32 %v10309_v12, %v2305_v51 }
 0x4b6   : > { %1436 = vperm.xlu0 %7346, %v8380_v15   ;;  %v8390_v14 = vpop.eup %7367  ;;  %7387 = vpow2.f32 %v2342_v44  ;;  %v2344_v26 = vmul.f32 1.442695, %v2335_v52  ;;  %v2340_v23 = vsub.f32 %v10310_v32, %v2321_v29  ;;  %v2317_v17 = vrot.slane %v8376_v37, %v7985_v20 }
 0x4b7   : > { %v8392_v50 = vpop.eup %7369  ;;  %7389 = vpow2.f32 %v1881_v38  ;;  %v2350_v13 = vmul.f32 1.442695, %v2338_v34  ;;  %v2337_v30 = vsub.f32 %v10311_v25, %v2309_v35  ;;  %v2346_v63 = vmul.f32 1.442695, %v2336_v39 }
 0x4b8   : > { %v8402_v56 = vpop.eup %7371  ;;  %7391 = vpow2.f32 %v1887_v31  ;;  %v2354_v0 = vmul.f32 1.442695, %v2340_v23  ;;  %v2325_v3 = vrot.slane %v8376_v37, %v7993_v24  ;;  %v2339_v53 = vsub.f32 %v10312_v27, %v2317_v17 }
 0x4b9   : > { %1445 = vperm.xlu1 %7345, %v8390_v14   ;;  %v8404_v55 = vpop.eup %7373  ;;  %7393 = vpow2.f32 %v1885_v41  ;;  %v2348_v8 = vmul.f32 1.442695, %v2337_v30 }
 0x4ba   : > { %1439 = vperm.xlu0 %7346, %v8392_v50   ;;  %v8414_v43 = vpop.eup %7375  ;;  %7395 = vpow2.f32 %v1889_v19  ;;  %v2341_v44 = vsub.f32 %v10313_v49, %v2325_v3  ;;  %v2352_v60 = vmul.f32 1.442695, %v2339_v53 }
 0x4bb   : > { %v8416_v47 = vpop.eup %7377  ;;  %7397 = vpow2.f32 %v2344_v26 }
 0x4bc   : > { %v8426_v33 = vpop.eup %7379  ;;  %7399 = vpow2.f32 %v2350_v13  ;;  %v2356_v58 = vmul.f32 1.442695, %v2341_v44 }
 0x4bd   : > { %1900 = vperm.xlu1 %7345, %v8402_v56   ;;  %v8428_v61 = vpop.eup %7381  ;;  %7401 = vpow2.f32 %v2346_v63 }
 0x4be   : > { %1442 = vperm.xlu0 %7346, %v8404_v55   ;;  %v8438_v11 = vpop.eup %7383  ;;  %7403 = vpow2.f32 %v2354_v0 }
 0x4bf   : > { %v8440_v45 = vpop.eup %7385  ;;  %7405 = vpow2.f32 %v2348_v8 }
 0x4c0   : > { %v8448_v46 = vpop.eup %7387  ;;  %7407 = vpow2.f32 %v2352_v60 }
 0x4c1   : > { %1451 = vperm.xlu1 %7345, %v8414_v43   ;;  %v8450_v40 = vpop.eup %7389  ;;  %7409 = vpow2.f32 %v2356_v58 }
 0x4c2   : > { %1448 = vperm.xlu0 %7346, %v8416_v47   ;;  %v8457_v28 = vpop.eup %7391 }
 0x4c3   : > { %v8459_v59 = vpop.eup %7393 }
 0x4c4   : > { %v8464_v38 = vpop.eup %7395 }
 0x4c5   : > { %1454 = vperm.xlu1 %7345, %v8426_v33   ;;  %v8466_v37 = vpop.eup %7397 }
 0x4c6   : > { %1903 = vperm.xlu0 %7346, %v8428_v61   ;;  %v8470_v2 = vpop.eup %7399 }
 0x4c7   : > { %v8472_v31 = vpop.eup %7401 }
 0x4c8   : > { %v8476_v1 = vpop.eup %7403 }
 0x4c9   : > { %1912 = vperm.xlu1 %7345, %v8438_v11   ;;  %v8478_v41 = vpop.eup %7405 }
 0x4ca   : > { %1906 = vperm.xlu0 %7346, %v8440_v45   ;;  %v8482_v52 = vpop.eup %7407 }
 0x4cb   : > { %v8485_v29 = vpop.eup %7409 }
 0x4cd   : > { %2367 = vperm.xlu1 %7345, %v8448_v46  }
 0x4ce   : > { %1909 = vperm.xlu0 %7346, %v8450_v40  }
 0x4d1   : > { %1918 = vperm.xlu1 %7345, %v8457_v28  }
 0x4d2   : > { %1915 = vperm.xlu0 %7346, %v8459_v59  }
 0x4d5   : > { %1921 = vperm.xlu1 %7345, %v8464_v38  }
 0x4d6   : > { %2370 = vperm.xlu0 %7346, %v8466_v37  }
 0x4d9   : > { %2379 = vperm.xlu1 %7345, %v8470_v2  }
 0x4da   : > { %2373 = vperm.xlu0 %7346, %v8472_v31  }
 0x4dc   : > { %v959_v34 = vpop.permute.xlu0 %958 }
 0x4dd   : > { %2385 = vperm.xlu1 %7345, %v8476_v1   ;;  %v962_v51 = vpop.permute.xlu1 %961  ;;  %v984_v39 = vrot.slane %v959_v34, %v8242_v62 }
 0x4de   : > { %2376 = vperm.xlu0 %7346, %v8478_v41   ;;  %v988_v26 = vrot.slane %v962_v51, %v8242_v62 }
 0x4e0   : > { %v968_v12 = vpop.permute.xlu0 %967  ;;  %v1013_v13 = vsel %vm866_vm3, %v988_v26, %v984_v39 }
 0x4e1   : > { %v965_v19 = vpop.permute.xlu1 %964  ;;  %v996_v17 = vrot.slane %v968_v12, %v8242_v62 }
 0x4e2   : > { %2382 = vperm.xlu0 %7346, %v8482_v52   ;;  %v992_v32 = vrot.slane %v965_v19, %v8242_v62  ;;  %v10314_v19 = vld [vmem:[#allocation11_spill] sm:$0xff] }
 0x4e4   : > { %v1014_v25 = vsel %vm868_vm4, %v992_v32, %v1013_v13  ;;  %v974_v30 = vpop.permute.xlu0 %973 }
 0x4e5   : > { %v971_v35 = vpop.permute.xlu1 %970  ;;  %v1004_v3 = vrot.slane %v974_v30, %v8242_v62  ;;  %v1015_v27 = vsel %vm870_vm5, %v996_v17, %v1014_v25 }
 0x4e6   : > { %2388 = vperm.xlu0 %7346, %v8485_v29   ;;  %v1000_v63 = vrot.slane %v971_v35, %v8242_v62 }
 0x4e8   : > { %v1016_v53 = vsel %vm872_vm6, %v1000_v63, %v1015_v27 }
 0x4e9   : > { %v977_v23 = vpop.permute.xlu1 %976  ;;  %v1017_v44 = vsel %vm874_vm7, %v1004_v3, %v1016_v53 }
 0x4ea   : > { %v1008_v8 = vrot.slane %v977_v23, %v8242_v62 }
 0x4ec   : > { %v1018_v60 = vsel %vm876_vm8, %v1008_v8, %v1017_v44 }
 0x4ed   : > { %v980_v0 = vpop.permute.xlu1 %979 }
 0x4ee   : > { %v1012_v49 = vrot.slane %v980_v0, %v8242_v62 }
 0x4f0   : > { %v1019_v58 = vsel %vm878_vm9, %v1012_v49, %v1018_v60 }
 0x4f1   : > { %v1021_v51 = vsel %vm702_vm2, %v1019_v58, 0.0 }
 0x501   : > { %1022 = vadd.xlane.f32.xlu1 %v1021_v51 }
 0x512   : > { %1145 = vrot.lane.b32.xlu1 %v10314_v19, %s7708_s14 }
 0x534   : > { %v1434_v34 = vpop.permute.xlu1 %1433 }
 0x535   : > { %v1437_v35 = vpop.permute.xlu0 %1436  ;;  %v1459_v32 = vrot.slane %v1434_v34, %v8242_v62 }
 0x536   : > { %v1463_v26 = vrot.slane %v1437_v35, %v8242_v62 }
 0x538   : > { %v1446_v12 = vpop.permute.xlu1 %1445  ;;  %v1488_v25 = vsel %vm866_vm3, %v1463_v26, %v1459_v32 }
 0x539   : > { %v1440_v39 = vpop.permute.xlu0 %1439  ;;  %v1475_v27 = vrot.slane %v1446_v12, %v8242_v62 }
 0x53a   : > { %v1467_v23 = vrot.slane %v1440_v39, %v8242_v62 }
 0x53c   : > { %v1901_v13 = vpop.permute.xlu1 %1900  ;;  %v1489_v63 = vsel %vm868_vm4, %v1467_v23, %v1488_v25 }
 0x53d   : > { %v1443_v17 = vpop.permute.xlu0 %1442  ;;  %v1926_v25 = vrot.slane %v1901_v13, %v8242_v62 }
 0x53e   : > { %v1471_v30 = vrot.slane %v1443_v17, %v8242_v62 }
 0x540   : > { %v1490_v0 = vsel %vm870_vm5, %v1471_v30, %v1489_v63  ;;  %v1452_v3 = vpop.permute.xlu1 %1451 }
 0x541   : > { %v1449_v53 = vpop.permute.xlu0 %1448  ;;  %v1483_v49 = vrot.slane %v1452_v3, %v8242_v62  ;;  %v1491_v44 = vsel %vm872_vm6, %v1475_v27, %v1490_v0 }
 0x542   : > { %v1479_v8 = vrot.slane %v1449_v53, %v8242_v62 }
 0x544   : > { %v1492_v60 = vsel %vm874_vm7, %v1479_v8, %v1491_v44  ;;  %v1455_v58 = vpop.permute.xlu1 %1454 }
 0x545   : > { %v1904_v51 = vpop.permute.xlu0 %1903  ;;  %v1487_v34 = vrot.slane %v1455_v58, %v8242_v62  ;;  %v1493_v35 = vsel %vm876_vm8, %v1483_v49, %v1492_v60 }
 0x546   : > { %v1930_v23 = vrot.slane %v1904_v51, %v8242_v62 }
 0x547   : > { %v1494_v39 = vsel %vm878_vm9, %v1487_v34, %v1493_v35 }
 0x548   : > { %v1913_v26 = vpop.permute.xlu1 %1912  ;;  %v1496_v12 = vsel %vm702_vm2, %v1494_v39, 0.0  ;;  %v1955_v0 = vsel %vm866_vm3, %v1930_v23, %v1926_v25 }
 0x549   : > { %v1907_v32 = vpop.permute.xlu0 %1906  ;;  %1497 = vadd.xlane.f32.xlu0 %v1496_v12  ;;  %v1942_v49 = vrot.slane %v1913_v26, %v8242_v62 }
 0x54a   : > { %v1934_v17 = vrot.slane %v1907_v32, %v8242_v62 }
 0x54c   : > { %v2368_v30 = vpop.permute.xlu1 %2367  ;;  %v1956_v27 = vsel %vm868_vm4, %v1934_v17, %v1955_v0 }
 0x54d   : > { %v1910_v63 = vpop.permute.xlu0 %1909 }
 0x54e   : > { %v1938_v3 = vrot.slane %v1910_v63, %v8242_v62  ;;  %v2393_v63 = vrot.slane %v2368_v30, %v8242_v62 }
 0x550   : > { %v1957_v53 = vsel %vm870_vm5, %v1938_v3, %v1956_v27  ;;  %v1919_v8 = vpop.permute.xlu1 %1918 }
 0x551   : > { %v1916_v44 = vpop.permute.xlu0 %1915  ;;  %v1950_v58 = vrot.slane %v1919_v8, %v8242_v62  ;;  %v1958_v13 = vsel %vm872_vm6, %v1942_v49, %v1957_v53 }
 0x552   : > { %v1946_v60 = vrot.slane %v1916_v44, %v8242_v62 }
 0x554   : > { %v1959_v51 = vsel %vm874_vm7, %v1946_v60, %v1958_v13  ;;  %v1922_v34 = vpop.permute.xlu1 %1921 }
 0x555   : > { %v2371_v35 = vpop.permute.xlu0 %2370  ;;  %v1954_v39 = vrot.slane %v1922_v34, %v8242_v62  ;;  %v1960_v12 = vsel %vm876_vm8, %v1950_v58, %v1959_v51 }
 0x556   : > { %v2397_v17 = vrot.slane %v2371_v35, %v8242_v62 }
 0x557   : > { %v1961_v32 = vsel %vm878_vm9, %v1954_v39, %v1960_v12 }
 0x558   : > { %v1963_v23 = vsel %vm702_vm2, %v1961_v32, 0.0  ;;  %v2380_v0 = vpop.permute.xlu1 %2379  ;;  %v2422_v27 = vsel %vm866_vm3, %v2397_v17, %v2393_v63 }
 0x559   : > { %v2374_v26 = vpop.permute.xlu0 %2373  ;;  %1964 = vadd.xlane.f32.xlu0 %v1963_v23  ;;  %v2409_v44 = vrot.slane %v2380_v0, %v8242_v62 }
 0x55a   : > { %v2401_v25 = vrot.slane %v2374_v26, %v8242_v62 }
 0x55c   : > { %v2423_v8 = vsel %vm868_vm4, %v2401_v25, %v2422_v27  ;;  %v2386_v58 = vpop.permute.xlu1 %2385  ;;  %v10315_v25 = vmov 0.0  }
 0x55d   : > { %v2377_v3 = vpop.permute.xlu0 %2376  ;;  %v2417_v34 = vrot.slane %v2386_v58, %v8242_v62 }
 0x55e   : > { %v2405_v53 = vrot.slane %v2377_v3, %v8242_v62 }
 0x560   : > { %v2424_v49 = vsel %vm870_vm5, %v2405_v53, %v2423_v8 }
 0x561   : > { %v2383_v60 = vpop.permute.xlu0 %2382  ;;  %v2425_v51 = vsel %vm872_vm6, %v2409_v44, %v2424_v49 }
 0x562   : > { %v2413_v13 = vrot.slane %v2383_v60, %v8242_v62 }
 0x564   : > { %v2426_v30 = vsel %vm874_vm7, %v2413_v13, %v2425_v51 }
 0x565   : > { %v2389_v35 = vpop.permute.xlu0 %2388  ;;  %v2427_v12 = vsel %vm876_vm8, %v2417_v34, %v2426_v30 }
 0x566   : > { %v2421_v39 = vrot.slane %v2389_v35, %v8242_v62 }
 0x568   : > { %v2428_v32 = vsel %vm878_vm9, %v2421_v39, %v2427_v12 }
 0x569   : > { %v2430_v23 = vsel %vm702_vm2, %v2428_v32, 0.0 }
 0x56a   : > { %2431 = vadd.xlane.f32.xlu1 %v2430_v23 }
 0x58e   : > { %v1023_v26 = vpop.xlane.xlu1 %1022 }
 0x58f   : > { %7411 = vrcp.f32 %v1023_v26 }
 0x592   : > { %v1146_v17 = vpop.permute.xlu1 %1145 }
 0x593   : > { %7155 = vmatpush3.msra.mxu1 %v1146_v17 }
 0x594   : > { %7159 = vmatprep.subr.mxu1 %v10315_v25 }
 0x599   : > { %v7412_v63 = vpop.eup %7411 }
 0x59a   : > { %v1033_v0 = vrot.slane %v7412_v63, %v7959_v6  ;;  %v1029_v3 = vrot.slane %v7412_v63, %v7956_v5  ;;  %v1037_v8 = vrot.slane %v7412_v63, %v7970_v10  ;;  %v1041_v49 = vrot.slane %v7412_v63, %v7967_v9 }
 0x59b   : > { %v1045_v58 = vrot.slane %v7412_v63, %v7977_v18  ;;  %v1049_v13 = vrot.slane %v7412_v63, %v7985_v20  ;;  %v1053_v51 = vrot.slane %v7412_v63, %v7989_v22 }
 0x59c   : > { %v1067_v27 = vmul.f32 %v8326_v7, %v1033_v0  ;;  %v1066_v53 = vmul.f32 %v8324_v4, %v1029_v3  ;;  %v1068_v44 = vmul.f32 %v8332_v36, %v1037_v8  ;;  %v1069_v60 = vmul.f32 %v8330_v57, %v1041_v49 }
 0x59d   : > { %v1070_v7 = vmul.f32 %v8338_v21, %v1045_v58  ;;  %v1071_v4 = vmul.f32 %v8336_v42, %v1049_v13  ;;  %v1072_v30 = vmul.f32 %v8342_v48, %v1053_v51  ;;  %v1057_v36 = vrot.slane %v7412_v63, %v7993_v24 }
 0x59e   : > { %1086 = vperm.xlu1 %7345, %v1067_v27   ;;  %1083 = vperm.xlu0 %7346, %v1066_v53  }
 0x59f   : > { %v1073_v57 = vmul.f32 %v8345_v16, %v1057_v36 }
 0x5a2   : > { %1089 = vperm.xlu1 %7345, %v1068_v44   ;;  %1092 = vperm.xlu0 %7346, %v1069_v60  }
 0x5a6   : > { %1095 = vperm.xlu1 %7345, %v1070_v7   ;;  %1098 = vperm.xlu0 %7346, %v1071_v4  }
 0x5aa   : > { %1101 = vperm.xlu1 %7345, %v1072_v30  }
 0x5ae   : > { %1104 = vperm.xlu1 %7345, %v1073_v57  }
 0x5d6   : > { %v1498_v34 = vpop.xlane.xlu0 %1497 }
 0x5d7   : > { %7413 = vrcp.f32 %v1498_v34 }
 0x5e1   : > { %v7414_v35 = vpop.eup %7413 }
 0x5e2   : > { %v1504_v39 = vrot.slane %v7414_v35, %v7956_v5  ;;  %v1508_v21 = vrot.slane %v7414_v35, %v7959_v6  ;;  %v1520_v32 = vrot.slane %v7414_v35, %v7977_v18  ;;  %v1512_v48 = vrot.slane %v7414_v35, %v7970_v10 }
 0x5e3   : > { %v1516_v17 = vrot.slane %v7414_v35, %v7967_v9  ;;  %v1528_v53 = vrot.slane %v7414_v35, %v7989_v22  ;;  %v1532_v49 = vrot.slane %v7414_v35, %v7993_v24 }
 0x5e4   : > { %v1541_v42 = vmul.f32 %v8378_v54, %v1504_v39  ;;  %v1542_v12 = vmul.f32 %v8380_v15, %v1508_v21  ;;  %v1545_v16 = vmul.f32 %v8390_v14, %v1520_v32  ;;  %v1543_v26 = vmul.f32 %v8392_v50, %v1512_v48 }
 0x5e5   : > { %v1544_v54 = vmul.f32 %v8404_v55, %v1516_v17  ;;  %v1524_v15 = vrot.slane %v7414_v35, %v7985_v20 }
 0x5e6   : > { %v1965_v23 = vpop.xlane.xlu0 %1964  ;;  %1558 = vperm.xlu1 %7345, %v1541_v42   ;;  %1561 = vperm.xlu0 %7346, %v1542_v12  }
 0x5e7   : > { %7415 = vrcp.f32 %v1965_v23  ;;  %v1546_v63 = vmul.f32 %v8416_v47, %v1524_v15  ;;  %v1547_v47 = vmul.f32 %v8414_v43, %v1528_v53 }
 0x5ea   : > { %1570 = vperm.xlu1 %7345, %v1545_v16   ;;  %1564 = vperm.xlu0 %7346, %v1543_v26  }
 0x5ee   : > { %1567 = vperm.xlu0 %7346, %v1544_v54  }
 0x5f1   : > { %v7416_v0 = vpop.eup %7415 }
 0x5f2   : > { %1573 = vperm.xlu0 %7346, %v1546_v63   ;;  %v1971_v3 = vrot.slane %v7416_v0, %v7956_v5  ;;  %v1975_v27 = vrot.slane %v7416_v0, %v7959_v6  ;;  %v1979_v8 = vrot.slane %v7416_v0, %v7970_v10  ;;  %v1983_v60 = vrot.slane %v7416_v0, %v7967_v9 }
 0x5f3   : > { %v1987_v58 = vrot.slane %v7416_v0, %v7977_v18  ;;  %v1991_v13 = vrot.slane %v7416_v0, %v7985_v20  ;;  %v1995_v36 = vrot.slane %v7416_v0, %v7989_v22  ;;  %v1999_v34 = vrot.slane %v7416_v0, %v7993_v24 }
 0x5f4   : > { %v2008_v14 = vmul.f32 %v8402_v56, %v1971_v3  ;;  %v2009_v50 = vmul.f32 %v8428_v61, %v1975_v27  ;;  %v2010_v44 = vmul.f32 %v8440_v45, %v1979_v8  ;;  %v1548_v56 = vmul.f32 %v8426_v33, %v1532_v49 }
 0x5f5   : > { %v2011_v61 = vmul.f32 %v8450_v40, %v1983_v60  ;;  %v2012_v7 = vmul.f32 %v8438_v11, %v1987_v58  ;;  %v2013_v43 = vmul.f32 %v8459_v59, %v1991_v13  ;;  %v2014_v59 = vmul.f32 %v8457_v28, %v1995_v36 }
 0x5f6   : > { %2025 = vperm.xlu1 %7345, %v2008_v14   ;;  %2028 = vperm.xlu0 %7346, %v2009_v50  }
 0x5f7   : > { %v2432_v55 = vpop.xlane.xlu1 %2431 }
 0x5f8   : > { %7417 = vrcp.f32 %v2432_v55 }
 0x5fa   : > { %1576 = vperm.xlu1 %7345, %v1547_v47   ;;  %2031 = vperm.xlu0 %7346, %v2010_v44  }
 0x5fe   : > { %1579 = vperm.xlu1 %7345, %v1548_v56   ;;  %2034 = vperm.xlu0 %7346, %v2011_v61  }
 0x602   : > { %v7418_v4 = vpop.eup %7417  ;;  %2037 = vperm.xlu1 %7345, %v2012_v7   ;;  %2040 = vperm.xlu0 %7346, %v2013_v43  }
 0x603   : > { %v2442_v45 = vrot.slane %v7418_v4, %v7959_v6  ;;  %v2438_v51 = vrot.slane %v7418_v4, %v7956_v5  ;;  %v2446_v30 = vrot.slane %v7418_v4, %v7970_v10  ;;  %v2450_v57 = vrot.slane %v7418_v4, %v7967_v9 }
 0x604   : > { %v2454_v35 = vrot.slane %v7418_v4, %v7977_v18  ;;  %v2458_v39 = vrot.slane %v7418_v4, %v7985_v20  ;;  %v2462_v21 = vrot.slane %v7418_v4, %v7989_v22  ;;  %v2466_v42 = vrot.slane %v7418_v4, %v7993_v24 }
 0x605   : > { %v2476_v33 = vmul.f32 %v8466_v37, %v2442_v45  ;;  %v2475_v40 = vmul.f32 %v8448_v46, %v2438_v51  ;;  %v2477_v11 = vmul.f32 %v8472_v31, %v2446_v30  ;;  %v2478_v37 = vmul.f32 %v8478_v41, %v2450_v57 }
 0x606   : > { %v2015_v46 = vmul.f32 %v8464_v38, %v1999_v34  ;;  %v2479_v31 = vmul.f32 %v8470_v2, %v2454_v35  ;;  %v2480_v28 = vmul.f32 %v8482_v52, %v2458_v39  ;;  %v2481_v41 = vmul.f32 %v8476_v1, %v2462_v21 }
 0x607   : > { %2495 = vperm.xlu0 %7346, %v2476_v33   ;;  %2492 = vperm.xlu1 %7345, %v2475_v40   ;;  %v2482_v38 = vmul.f32 %v8485_v29, %v2466_v42 }
 0x60b   : > { %2498 = vperm.xlu0 %7346, %v2477_v11   ;;  %2043 = vperm.xlu1 %7345, %v2014_v59  }
 0x60f   : > { %2501 = vperm.xlu0 %7346, %v2478_v37   ;;  %2046 = vperm.xlu1 %7345, %v2015_v46  }
 0x613   : > { %2504 = vperm.xlu0 %7346, %v2479_v31   ;;  %2507 = vperm.xlu1 %7345, %v2480_v28  }
 0x617   : > { %2510 = vperm.xlu0 %7346, %v2481_v41   ;;  %2513 = vperm.xlu1 %7345, %v2482_v38  }
 0x61b   : > { %1620 = vrot.lane.b32.xlu0 %v10314_v19, %s7713_s18  ;;  %2087 = vrot.lane.b32.xlu1 %v10314_v19, %s7714_s16 }
 0x61d   : > { %v1084_v2 = vpop.permute.xlu0 %1083  ;;  %v1087_v52 = vpop.permute.xlu1 %1086 }
 0x61e   : > { %v1109_v29 = vrot.slane %v1084_v2, %v8242_v62  ;;  %v1113_v32 = vrot.slane %v1087_v52, %v8242_v62 }
 0x61f   : > { %2554 = vrot.lane.b32.xlu0 %v10314_v19, %s7715_s13 }
 0x620   : > { %v1138_v16 = vsel %vm866_vm3, %v1113_v32, %v1109_v29 }
 0x621   : > { %v1093_v12 = vpop.permute.xlu0 %1092  ;;  %v1090_v1 = vpop.permute.xlu1 %1089 }
 0x622   : > { %v1117_v48 = vrot.slane %v1090_v1, %v8242_v62  ;;  %v1121_v26 = vrot.slane %v1093_v12, %v8242_v62 }
 0x624   : > { %v1139_v17 = vsel %vm868_vm4, %v1117_v48, %v1138_v16 }
 0x625   : > { %v1096_v23 = vpop.permute.xlu1 %1095  ;;  %v1099_v54 = vpop.permute.xlu0 %1098  ;;  %v1140_v0 = vsel %vm870_vm5, %v1121_v26, %v1139_v17 }
 0x626   : > { %v1125_v15 = vrot.slane %v1096_v23, %v8242_v62  ;;  %v1129_v19 = vrot.slane %v1099_v54, %v8242_v62 }
 0x628   : > { %v1141_v3 = vsel %vm872_vm6, %v1125_v15, %v1140_v0 }
 0x629   : > { %v1102_v63 = vpop.permute.xlu1 %1101  ;;  %v1142_v53 = vsel %vm874_vm7, %v1129_v19, %v1141_v3 }
 0x62a   : > { %v1133_v27 = vrot.slane %v1102_v63, %v8242_v62 }
 0x62c   : > { %v1143_v8 = vsel %vm876_vm8, %v1133_v27, %v1142_v53 }
 0x62d   : > { %v1105_v14 = vpop.permute.xlu1 %1104 }
 0x62e   : > { %v1137_v50 = vrot.slane %v1105_v14, %v8242_v62 }
 0x630   : > { %v1144_v55 = vsel %vm878_vm9, %v1137_v50, %v1143_v8 }
 0x631   : > { %7157 = vmatmul.mubr.msk.f32.vlgmr.msra.gmra.mrb[0].mxu1 %vm702_vm2, %v1144_v55 }
 0x632   : > { %7161 = vmatprep.mubr.msk.f32.mxu1 %vm7705_vm0, %v10315_v25 }
 0x665   : > { %v1562_v49 = vpop.permute.xlu0 %1561  ;;  %v1559_v44 = vpop.permute.xlu1 %1558 }
 0x666   : > { %v1588_v59 = vrot.slane %v1562_v49, %v8242_v62  ;;  %v1584_v57 = vrot.slane %v1559_v44, %v8242_v62 }
 0x668   : > { %v1613_v39 = vsel %vm866_vm3, %v1588_v59, %v1584_v57 }
 0x669   : > { %v1565_v47 = vpop.permute.xlu0 %1564  ;;  %v1571_v56 = vpop.permute.xlu1 %1570 }
 0x66a   : > { %v1592_v46 = vrot.slane %v1565_v47, %v8242_v62  ;;  %v1600_v32 = vrot.slane %v1571_v56, %v8242_v62 }
 0x66c   : > { %v1614_v21 = vsel %vm868_vm4, %v1592_v46, %v1613_v39 }
 0x66d   : > { %v1568_v60 = vpop.permute.xlu0 %1567 }
 0x66e   : > { %v1596_v35 = vrot.slane %v1568_v60, %v8242_v62 }
 0x670   : > { %v1615_v38 = vsel %vm870_vm5, %v1596_v35, %v1614_v21 }
 0x671   : > { %v1574_v61 = vpop.permute.xlu0 %1573  ;;  %v1616_v19 = vsel %vm872_vm6, %v1600_v32, %v1615_v38 }
 0x672   : > { %v1604_v52 = vrot.slane %v1574_v61, %v8242_v62 }
 0x674   : > { %v1617_v27 = vsel %vm874_vm7, %v1604_v52, %v1616_v19 }
 0x675   : > { %v2029_v58 = vpop.permute.xlu0 %2028  ;;  %v2026_v13 = vpop.permute.xlu1 %2025 }
 0x676   : > { %v2055_v42 = vrot.slane %v2029_v58, %v8242_v62  ;;  %v2051_v41 = vrot.slane %v2026_v13, %v8242_v62 }
 0x678   : > { %v2080_v54 = vsel %vm866_vm3, %v2055_v42, %v2051_v41 }
 0x679   : > { %v2032_v7 = vpop.permute.xlu0 %2031  ;;  %v1577_v43 = vpop.permute.xlu1 %1576 }
 0x67a   : > { %v2059_v2 = vrot.slane %v2032_v7, %v8242_v62  ;;  %v1608_v48 = vrot.slane %v1577_v43, %v8242_v62 }
 0x67c   : > { %v2081_v0 = vsel %vm868_vm4, %v2059_v2, %v2080_v54  ;;  %v1618_v8 = vsel %vm876_vm8, %v1608_v48, %v1617_v27  ;;  %v2677_v54 = vld [vmem:[%s10207_s4 + $0x18] sm:$0xff] }
 0x67d   : > { %v2035_v4 = vpop.permute.xlu0 %2034  ;;  %v1580_v45 = vpop.permute.xlu1 %1579 }
 0x67e   : > { %v2063_v12 = vrot.slane %v2035_v4, %v8242_v62  ;;  %v1612_v15 = vrot.slane %v1580_v45, %v8242_v62 }
 0x680   : > { %v2082_v14 = vsel %vm870_vm5, %v2063_v12, %v2081_v0  ;;  %v1619_v58 = vsel %vm878_vm9, %v1612_v15, %v1618_v8 }
 0x681   : > { %v2041_v51 = vpop.permute.xlu0 %2040  ;;  %v2038_v33 = vpop.permute.xlu1 %2037 }
 0x682   : > { %v2067_v23 = vrot.slane %v2038_v33, %v8242_v62  ;;  %v2071_v50 = vrot.slane %v2041_v51, %v8242_v62 }
 0x684   : > { %v2083_v55 = vsel %vm872_vm6, %v2067_v23, %v2082_v14  ;;  %v2674_v23 = vld [vmem:[%s10207_s4] sm:$0xff] }
 0x685   : > { %v2084_v4 = vsel %vm874_vm7, %v2071_v50, %v2083_v55  ;;  %v7087_v14 = vld [vmem:[%s10213_s10] ss:$0 sm:$0xff] }
 0x686   : > { %v2496_v40 = vpop.permute.xlu0 %2495  ;;  %v2493_v30 = vpop.permute.xlu1 %2492 }
 0x687   : > { %v2522_v1 = vrot.slane %v2496_v40, %v8242_v62  ;;  %v2518_v29 = vrot.slane %v2493_v30, %v8242_v62 }
 0x689   : > { %v2547_v53 = vsel %vm866_vm3, %v2522_v1, %v2518_v29 }
 0x68a   : > { %v2499_v36 = vpop.permute.xlu0 %2498  ;;  %v2044_v11 = vpop.permute.xlu1 %2043 }
 0x68b   : > { %v2526_v16 = vrot.slane %v2499_v36, %v8242_v62  ;;  %v2075_v47 = vrot.slane %v2044_v11, %v8242_v62 }
 0x68d   : > { %v2548_v49 = vsel %vm868_vm4, %v2526_v16, %v2547_v53  ;;  %v2085_v45 = vsel %vm876_vm8, %v2075_v47, %v2084_v4  ;;  %v2675_v16 = vld [vmem:[%s10207_s4 + $0x8] sm:$0xff]  ;;  %v7088_v53 = vld [vmem:[%s10214_s11] ss:$0 sm:$0xff] }
 0x68e   : > { %v2502_v34 = vpop.permute.xlu0 %2501  ;;  %v2047_v37 = vpop.permute.xlu1 %2046 }
 0x68f   : > { %v2530_v63 = vrot.slane %v2502_v34, %v8242_v62  ;;  %v2079_v56 = vrot.slane %v2047_v37, %v8242_v62 }
 0x691   : > { %v2549_v60 = vsel %vm870_vm5, %v2530_v63, %v2548_v49  ;;  %v2086_v30 = vsel %vm878_vm9, %v2079_v56, %v2085_v45  ;;  %v10316_v63 = vmov 0.0|0.0  }
 0x692   : > { %v2505_v31 = vpop.permute.xlu0 %2504  ;;  %v2508_v28 = vpop.permute.xlu1 %2507 }
 0x693   : > { %v2534_v3 = vrot.slane %v2505_v31, %v8242_v62  ;;  %v2538_v61 = vrot.slane %v2508_v28, %v8242_v62 }
 0x695   : > { %v2550_v13 = vsel %vm872_vm6, %v2534_v3, %v2549_v60 }
 0x696   : > { %v2511_v26 = vpop.permute.xlu0 %2510  ;;  %v2514_v17 = vpop.permute.xlu1 %2513  ;;  %v2551_v33 = vsel %vm874_vm7, %v2538_v61, %v2550_v13 }
 0x697   : > { %v2542_v7 = vrot.slane %v2511_v26, %v8242_v62  ;;  %v2546_v40 = vrot.slane %v2514_v17, %v8242_v62  ;;  %v2676_v26 = vld [vmem:[%s10207_s4 + $0x10] sm:$0xff]  ;;  %v7251_v17 = vpack.c.bf16 %v2675_v16, %v2674_v23 }
 0x698   : > { %v7254_v15 = vpack.c.bf16 %v2677_v54, %v2676_v26 }
 0x699   : > { %v2552_v36 = vsel %vm876_vm8, %v2542_v7, %v2551_v33  ;;  %7252 = vmatpush3.bf16.msra.mxu0 %v7251_v17 }
 0x69a   : > { %v1621_v44 = vpop.permute.xlu0 %1620  ;;  %v2088_v43 = vpop.permute.xlu1 %2087  ;;  %v2553_v11 = vsel %vm878_vm9, %v2546_v40, %v2552_v36  ;;  %7253 = vmatprep.subr.bf16.mxu0 %v10316_v63 }
 0x69b   : > { %7160 = vmatpush3.msra.mxu1 %v1621_v44  ;;  %v10319_v44 = vld [vmem:[#allocation10_spill] sm:$0xff] }
 0x69c   : > { %7162 = vmatmul.mubr.msk.f32.vlgmr.msra.gmra.mrb[2].mxu1 %vm702_vm2, %v1619_v58  ;;  %7164 = vmatprep.subr.mxu1 %v10315_v25 }
 0x69d   : > { %7165 = vmatpush3.msra.mxu1 %v2088_v43  ;;  %7166 = vmatprep.mubr.msk.f32.mxu1 %vm7705_vm0, %v10315_v25 }
 0x69e   : > { %v2555_v51 = vpop.permute.xlu0 %2554  ;;  %7169 = vmatprep.subr.mxu1 %v10315_v25  ;;  %7255 = vmatpush3.bf16.msra.mxu0 %v7254_v15 }
 0x69f   : > { %7195 = vmatprep.subr.mxu0 %v10315_v25 }
 0x6a0   : > { %7167 = vmatmul.mubr.msk.f32.vlgmr.msra.gmra.mrb[4].mxu1 %vm702_vm2, %v2086_v30 }
 0x6a1   : > { %7170 = vmatpush3.msra.mxu1 %v2555_v51  ;;  %7171 = vmatprep.mubr.msk.f32.mxu1 %vm7705_vm0, %v10315_v25 }
 0x6a2   : > { %7185 = vmatprep.subr.mxu1 %v10315_v25 }
 0x6a4   : > { %7172 = vmatmul.mubr.msk.f32.vlgmr.msra.gmra.mrb[6].mxu1 %vm702_vm2, %v2553_v11 }
 0x6a5   : > { %7187 = vmatprep.mubr.msk.f32.mxu1 %vm7705_vm0, %v10315_v25 }
 0x704   : > { %v1216_v59 = vpop.f32.mrb[0].mxu1 }
 0x705   : > { %v7158_v57 = vpop.f32.mrb[1].mxu1 }
 0x76f   : > { %v1691_v34 = vpop.f32.mrb[2].mxu1 }
 0x770   : > { %2630 = vrot.lane.b32.xlu1 %v1691_v34, %s10253_s21  ;;  %v7163_v37 = vpop.f32.mrb[3].mxu1 }
 0x773   : > { %v2158_v46 = vpop.f32.mrb[4].mxu1 }
 0x774   : > { %2634 = vrot.lane.b32.xlu0 %v2158_v46, %s10251_s22  ;;  %v7168_v35 = vpop.f32.mrb[5].mxu1  ;;  %s10376_s22 = sshll.u32 %s10383_s9, 3 }
 0x777   : > { %v2625_v39 = vpop.f32.mrb[6].mxu1 }
 0x778   : > { %2638 = vrot.lane.b32.xlu1 %v2625_v39, %s10249_s28  ;;  %v7173_v31 = vpop.f32.mrb[7].mxu1 }
 0x7e2   : > { %v2631_v28 = vpop.permute.xlu1 %2630 }
 0x7e3   : > { %v2641_v42 = vsel %vm702_vm2, %v1216_v59, %v2631_v28 }
 0x7e6   : > { %v2635_v21 = vpop.permute.xlu0 %2634 }
 0x7e7   : > { %v2642_v41 = vsel %vm483_vm1, %v2641_v42, %v2635_v21 }
 0x7ea   : > { %v2639_v38 = vpop.permute.xlu1 %2638 }
 0x7eb   : > { %v2644_v2 = vsel %vm2643_vm10, %v2642_v41, %v2639_v38  ;;  %v7090_v41 = vld [vmem:[%s10208_s5] ss:$0 sm:$0xff] }
 0x7ec   : > { %v2646_v52 = vsel %vm2645_vm11, %v2644_v2, 0.0 }
 0x7ed   : > { %2647 = vadd.xlane.f32.xlu0 %v2646_v52 }
 0x87a   : > { %v2648_v12 = vpop.xlane.xlu0 %2647 }
 0x87b   : > { %v2650_v1 = vmul.f32 0.03125, %v2648_v12 }
 0x87d   : > { %v2651_v29 = vsub.f32 %v2644_v2, %v2650_v1 }
 0x87f   : > { %v2652_v32 = vmul.f32 %v2651_v29, %v2651_v29 }
 0x881   : > { %v2653_v48 = vsel %vm2645_vm11, %v2652_v32, 0.0 }
 0x882   : > { %2654 = vadd.xlane.f32.xlu1 %v2653_v48 }
 0x90f   : > { %v2655_v19 = vpop.xlane.xlu1 %2654 }
 0x910   : > { %v2656_v0 = vmul.f32 0.03125, %v2655_v19 }
 0x912   : > { %v2657_v3 = vadd.f32 1e-05, %v2656_v0 }
 0x914   : > { %7419 = vrsqrt.f32 %v2657_v3 }
 0x91e   : > { %v7420_v27 = vpop.eup %7419 }
 0x91f   : > { %v2659_v50 = vmul.f32 %v7420_v27, %v2651_v29 }
 0x921   : > { %v2666_v8 = vmul.f32 %v7087_v14, %v2659_v50 }
 0x923   : > { %v8728_v55 = vadd.f32 %v7088_v53, %v2666_v8 }
 0x925   : > { %10317 = vst [vmem:[#allocation20_spill] sm:$0xff] %v8728_v55  ;;  %7183 = vmatmul.mubr.msk.f32.vlgmr.msra.gmra.mrb[2].mxu0 %vm2645_vm11, %v8728_v55 }
 0x926   : > { %7197 = vmatprep.mubr.msk.f32.mxu0 %vm7705_vm0, %v10315_v25 }
 0x9f8   : > { %v8734_v49 = vpop.f32.mrb[2].mxu0 }
 0x9f9   : > { %10318 = vst [vmem:[#allocation24_spill] sm:$0xff] %v8734_v49  ;;  %v7184_v47 = vpop.f32.mrb[3].mxu0  ;;  %v2759_v60 = vrot.slane %v8734_v49, %v10319_v44  ;;  %v2752_v56 = vcombine.high %v8734_v49, %v8734_v49 }
 0x9fb   : > { %v2775_v61 = vrot.slane %v2759_v60, %v10319_v44  ;;  %v2767_v58 = vcombine.high %v2759_v60, %v2759_v60  ;;  %v2766_v13 = vrot.slane %v2752_v56, %v10319_v44 }
 0x9fd   : > { %v2804_v7 = vrot.slane %v2775_v61, %v7956_v5  ;;  %v2789_v43 = vrot.slane %v2767_v58, %v10319_v44  ;;  %v2797_v4 = vcombine.high %v2775_v61, %v2775_v61  ;;  %v2768_v33 = vcombine.high %v2766_v13, %v2766_v13 }
 0x9fe   : > { %v2782_v30 = vrot.slane %v2766_v13, %v10319_v44 }
 0x9ff   : > { %2833 = vrot.lane.b32.xlu0 %v2804_v7, %s7708_s14  ;;  %v2808_v45 = vrot.slane %v2789_v43, %v7956_v5  ;;  %v2799_v51 = vcombine.high %v2789_v43, %v2789_v43  ;;  %v2812_v40 = vrot.slane %v2797_v4, %v7956_v5  ;;  %v2796_v11 = vrot.slane %v2768_v33, %v10319_v44 }
 0xa00   : > { %v2820_v59 = vrot.slane %v2782_v30, %v7956_v5  ;;  %v2798_v57 = vcombine.high %v2782_v30, %v2782_v30 }
 0xa01   : > { %2835 = vrot.lane.b32.xlu1 %v2808_v45, %s7708_s14  ;;  %v2816_v36 = vrot.slane %v2799_v51, %v7956_v5  ;;  %v2824_v34 = vrot.slane %v2796_v11, %v7956_v5  ;;  %v2800_v37 = vcombine.high %v2796_v11, %v2796_v11 }
 0xa02   : > { %v2828_v46 = vrot.slane %v2798_v57, %v7956_v5 }
 0xa03   : > { %2837 = vrot.lane.b32.xlu0 %v2812_v40, %s7708_s14  ;;  %v2832_v35 = vrot.slane %v2800_v37, %v7956_v5 }
 0xa05   : > { %2839 = vrot.lane.b32.xlu1 %v2816_v36, %s7708_s14 }
 0xa07   : > { %2841 = vrot.lane.b32.xlu0 %v2820_v59, %s7708_s14 }
 0xa09   : > { %2843 = vrot.lane.b32.xlu1 %v2824_v34, %s7708_s14 }
 0xa0b   : > { %2845 = vrot.lane.b32.xlu0 %v2828_v46, %s7708_s14 }
 0xa0d   : > { %2847 = vrot.lane.b32.xlu1 %v2832_v35, %s7708_s14 }
 0xa71   : > { %v2834_v39 = vpop.permute.xlu0 %2833 }
 0xa72   : > { %v2857_v31 = vadd.f32 %v2834_v39, %v8734_v49 }
 0xa73   : > { %v2836_v28 = vpop.permute.xlu1 %2835 }
 0xa74   : > { %v2865_v21 = vmul.f32 0.21, %v2857_v31  ;;  %v2858_v42 = vadd.f32 %v2836_v28, %v8734_v49 }
 0xa75   : > { %v2838_v38 = vpop.permute.xlu0 %2837 }
 0xa76   : > { %v2873_v2 = vmax.f32 %v2857_v31, %v2865_v21  ;;  %v2866_v52 = vmul.f32 0.21, %v2858_v42  ;;  %v2859_v12 = vadd.f32 %v2838_v38, %v8734_v49 }
 0xa77   : > { %v2840_v1 = vpop.permute.xlu1 %2839 }
 0xa78   : > { %v2888_v29 = vmul.f32 %v7090_v41, %v2873_v2  ;;  %v2860_v32 = vadd.f32 %v2840_v1, %v8734_v49  ;;  %v2874_v16 = vmax.f32 %v2858_v42, %v2866_v52  ;;  %v2867_v26 = vmul.f32 0.21, %v2859_v12 }
 0xa79   : > { %v2842_v48 = vpop.permute.xlu0 %2841 }
 0xa7a   : > { %v2868_v23 = vmul.f32 0.21, %v2860_v32  ;;  %3347 = vrot.lane.b32.xlu0 %v2888_v29, %s7709_s19  ;;  %3814 = vrot.lane.b32.xlu1 %v2888_v29, %s7710_s30  ;;  %v2861_v15 = vadd.f32 %v2842_v48, %v8734_v49  ;;  %v2889_v50 = vmul.f32 %v7090_v41, %v2874_v16  ;;  %v2875_v53 = vmax.f32 %v2859_v12, %v2867_v26 }
 0xa7b   : > { %v2844_v17 = vpop.permute.xlu1 %2843  ;;  %v2896_v30 = vsel %vm702_vm2, %v2888_v29, 0.0 }
 0xa7c   : > { %v2876_v54 = vmax.f32 %v2860_v32, %v2868_v23  ;;  %v2862_v19 = vadd.f32 %v2844_v17, %v8734_v49  ;;  %v2869_v47 = vmul.f32 0.21, %v2861_v15  ;;  %v2890_v43 = vmul.f32 %v7090_v41, %v2875_v53 }
 0xa7d   : > { %v2846_v0 = vpop.permute.xlu0 %2845  ;;  %v2899_v36 = vsel %vm702_vm2, %v2889_v50, 0.0 }
 0xa7e   : > { %v2891_v3 = vmul.f32 %v7090_v41, %v2876_v54  ;;  %v2870_v27 = vmul.f32 0.21, %v2862_v19  ;;  %v2863_v14 = vadd.f32 %v2846_v0, %v8734_v49  ;;  %4281 = vrot.lane.b32.xlu1 %v2888_v29, %s7711_s15  ;;  %v2877_v4 = vmax.f32 %v2861_v15, %v2869_v47 }
 0xa7f   : > { %v2848_v8 = vpop.permute.xlu1 %2847  ;;  %v2902_v59 = vsel %vm702_vm2, %v2890_v43, 0.0 }
 0xa80   : > { %v2878_v60 = vmax.f32 %v2862_v19, %v2870_v27  ;;  %v2871_v56 = vmul.f32 0.21, %v2863_v14  ;;  %v2864_v61 = vadd.f32 %v2848_v8, %v8734_v49  ;;  %v2892_v40 = vmul.f32 %v7090_v41, %v2877_v4 }
 0xa81   : > { %v2905_v37 = vsel %vm702_vm2, %v2891_v3, 0.0 }
 0xa82   : > { %v2893_v58 = vmul.f32 %v7090_v41, %v2878_v60  ;;  %v2879_v13 = vmax.f32 %v2863_v14, %v2871_v56  ;;  %v2872_v7 = vmul.f32 0.21, %v2864_v61  ;;  %3349 = vrot.lane.b32.xlu1 %v2889_v50, %s7709_s19  ;;  %v2908_v11 = vsel %vm702_vm2, %v2892_v40, 0.0 }
 0xa84   : > { %v2894_v45 = vmul.f32 %v7090_v41, %v2879_v13  ;;  %v2880_v51 = vmax.f32 %v2864_v61, %v2872_v7  ;;  %v2911_v35 = vsel %vm702_vm2, %v2893_v58, 0.0 }
 0xa86   : > { %v2895_v33 = vmul.f32 %v7090_v41, %v2880_v51  ;;  %4285 = vrot.lane.b32.xlu1 %v2890_v43, %s7711_s15  ;;  %v2914_v57 = vsel %vm702_vm2, %v2894_v45, 0.0 }
 0xa88   : > { %v2917_v28 = vsel %vm702_vm2, %v2895_v33, 0.0 }
 0xa8a   : > { %3822 = vrot.lane.b32.xlu1 %v2892_v40, %s7710_s30 }
 0xa99   : > { %2897 = vadd.xlane.f32.xlu0 %v2896_v30 }
 0xaae   : > { %2900 = vadd.xlane.f32.xlu1 %v2899_v36 }
 0xaaf   : > { %3351 = vrot.lane.b32.xlu0 %v2890_v43, %s7709_s19 }
 0xab2   : > { %2909 = vadd.xlane.f32.xlu1 %v2908_v11 }
 0xab3   : > { %3355 = vrot.lane.b32.xlu0 %v2892_v40, %s7709_s19 }
 0xab7   : > { %3816 = vrot.lane.b32.xlu0 %v2889_v50, %s7710_s30 }
 0xabb   : > { %3818 = vrot.lane.b32.xlu0 %v2890_v43, %s7710_s30 }
 0xabf   : > { %4283 = vrot.lane.b32.xlu0 %v2889_v50, %s7711_s15 }
 0xac3   : > { %4289 = vrot.lane.b32.xlu0 %v2892_v40, %s7711_s15  ;;  %3353 = vrot.lane.b32.xlu1 %v2891_v3, %s7709_s19 }
 0xac7   : > { %3357 = vrot.lane.b32.xlu1 %v2893_v58, %s7709_s19 }
 0xacb   : > { %3359 = vrot.lane.b32.xlu1 %v2894_v45, %s7709_s19 }
 0xacf   : > { %3824 = vrot.lane.b32.xlu1 %v2893_v58, %s7710_s30 }
 0xad3   : > { %3826 = vrot.lane.b32.xlu1 %v2894_v45, %s7710_s30 }
 0xae2   : > { %2903 = vadd.xlane.f32.xlu0 %v2902_v59 }
 0xaec   : > { %v3348_v34 = vpop.permute.xlu0 %3347  ;;  %v3815_v1 = vpop.permute.xlu1 %3814 }
 0xaed   : > { %v3371_v42 = vsel %vm702_vm2, %v3348_v34, 0.0  ;;  %v3838_v54 = vsel %vm702_vm2, %v3815_v1, 0.0 }
 0xaf0   : > { %v4282_v48 = vpop.permute.xlu1 %4281 }
 0xaf1   : > { %v4305_v19 = vsel %vm702_vm2, %v4282_v48, 0.0 }
 0xaf4   : > { %v3350_v16 = vpop.permute.xlu1 %3349 }
 0xaf7   : > { %2915 = vadd.xlane.f32.xlu1 %v2914_v57 }
 0xaf8   : > { %3820 = vrot.lane.b32.xlu0 %v2891_v3, %s7710_s30  ;;  %v4286_v26 = vpop.permute.xlu1 %4285 }
 0xaf9   : > { %v4311_v50 = vsel %vm702_vm2, %v4286_v26, 0.0 }
 0xafc   : > { %4287 = vrot.lane.b32.xlu0 %v2891_v3, %s7711_s15  ;;  %v3823_v17 = vpop.permute.xlu1 %3822  ;;  %v3374_v3 = vsel %vm702_vm2, %v3350_v16, 0.0  ;;  %v10324_v16 = vld [vmem:[#allocation13_spill] sm:$0xff] }
 0xafd   : > { %v3850_v47 = vsel %vm702_vm2, %v3823_v17, 0.0 }
 0xb00   : > { %4291 = vrot.lane.b32.xlu0 %v2893_v58, %s7711_s15 }
 0xb04   : > { %4293 = vrot.lane.b32.xlu0 %v2894_v45, %s7711_s15 }
 0xb08   : > { %3828 = vrot.lane.b32.xlu1 %v2895_v33, %s7710_s30 }
 0xb0c   : > { %4295 = vrot.lane.b32.xlu1 %v2895_v33, %s7711_s15 }
 0xb23   : > { %2906 = vadd.xlane.f32.xlu0 %v2905_v37 }
 0xb26   : > { %v8801_v46 = vpop.xlane.xlu0 %2897 }
 0xb27   : > { %2912 = vadd.xlane.f32.xlu0 %v2911_v35 }
 0xb2a   : > { %v3352_v39 = vpop.permute.xlu0 %3351 }
 0xb2b   : > { %v3377_v27 = vsel %vm702_vm2, %v3352_v39, 0.0 }
 0xb2e   : > { %v3356_v31 = vpop.permute.xlu0 %3355 }
 0xb2f   : > { %v3383_v41 = vsel %vm702_vm2, %v3356_v31, 0.0  ;;  %v10320_v31 = vld [vmem:[#allocation12_spill] sm:$0xff] }
 0xb30   : > { %2918 = vadd.xlane.f32.xlu1 %v2917_v28 }
 0xb32   : > { %v3817_v21 = vpop.permute.xlu0 %3816 }
 0xb33   : > { %v3841_v2 = vsel %vm702_vm2, %v3817_v21, 0.0  ;;  %v10321_v21 = vld [vmem:[#allocation16_spill] sm:$0xff] }
 0xb34   : > { %3372 = vadd.xlane.f32.xlu1 %v3371_v42 }
 0xb36   : > { %v3819_v38 = vpop.permute.xlu0 %3818 }
 0xb37   : > { %v3844_v12 = vsel %vm702_vm2, %v3819_v38, 0.0 }
 0xb38   : > { %3384 = vadd.xlane.f32.xlu1 %v3383_v41  ;;  %v10322_v41 = vld [vmem:[#allocation18_spill] sm:$0xff] }
 0xb3a   : > { %v4284_v52 = vpop.permute.xlu0 %4283 }
 0xb3b   : > { %v4308_v29 = vsel %vm702_vm2, %v4284_v52, 0.0  ;;  %v2901_v15 = vpop.xlane.xlu1 %2900 }
 0xb3c   : > { %3842 = vadd.xlane.f32.xlu1 %v3841_v2  ;;  %v8830_v28 = vadd.f32 %v2901_v15, %v10320_v31  ;;  %v8856_v15 = vadd.f32 %v8801_v46, %v10324_v16  ;;  %v10326_v46 = vld [vmem:[#allocation14_spill] sm:$0xff] }
 0xb3d   : > { %3361 = vrot.lane.b32.xlu0 %v2895_v33, %s7709_s19 }
 0xb3e   : > { %v4290_v32 = vpop.permute.xlu0 %4289 }
 0xb3f   : > { %v4317_v23 = vsel %vm702_vm2, %v4290_v32, 0.0  ;;  %v2910_v0 = vpop.xlane.xlu1 %2909  ;;  %v10323_v32 = vld [vmem:[#allocation19_spill] sm:$0xff] }
 0xb40   : > { %3845 = vadd.xlane.f32.xlu1 %v3844_v12  ;;  %v8834_v42 = vadd.f32 %v2910_v0, %v10321_v21 }
 0xb43   : > { %v3354_v14 = vpop.permute.xlu1 %3353 }
 0xb44   : > { %4309 = vadd.xlane.f32.xlu1 %v4308_v29  ;;  %v3380_v56 = vsel %vm702_vm2, %v3354_v14, 0.0 }
 0xb47   : > { %v3358_v53 = vpop.permute.xlu1 %3357 }
 0xb48   : > { %4318 = vadd.xlane.f32.xlu1 %v4317_v23  ;;  %v3386_v7 = vsel %vm702_vm2, %v3358_v53, 0.0 }
 0xb4b   : > { %v3360_v61 = vpop.permute.xlu1 %3359 }
 0xb4c   : > { %v3389_v51 = vsel %vm702_vm2, %v3360_v61, 0.0 }
 0xb4f   : > { %v3825_v4 = vpop.permute.xlu1 %3824 }
 0xb50   : > { %v3853_v30 = vsel %vm702_vm2, %v3825_v4, 0.0 }
 0xb53   : > { %v3827_v36 = vpop.permute.xlu1 %3826 }
 0xb54   : > { %v3856_v59 = vsel %vm702_vm2, %v3827_v36, 0.0 }
 0xb5c   : > { %3839 = vadd.xlane.f32.xlu0 %v3838_v54 }
 0xb60   : > { %4306 = vadd.xlane.f32.xlu0 %v4305_v19 }
 0xb64   : > { %3375 = vadd.xlane.f32.xlu0 %v3374_v3  ;;  %v10325_v3 = vld [vmem:[#allocation15_spill] sm:$0xff] }
 0xb68   : > { %3378 = vadd.xlane.f32.xlu0 %v3377_v27 }
 0xb6c   : > { %4312 = vadd.xlane.f32.xlu0 %v4311_v50 }
 0xb6f   : > { %v2904_v8 = vpop.xlane.xlu0 %2903 }
 0xb70   : > { %3851 = vadd.xlane.f32.xlu0 %v3850_v47  ;;  %v8864_v27 = vadd.f32 %v2904_v8, %v10325_v3  ;;  %v10327_v8 = vld [vmem:[#allocation17_spill] sm:$0xff] }
 0xb73   : > { %v3821_v60 = vpop.permute.xlu0 %3820 }
 0xb74   : > { %3381 = vadd.xlane.f32.xlu0 %v3380_v56  ;;  %v3847_v58 = vsel %vm702_vm2, %v3821_v60, 0.0 }
 0xb75   : > { %3848 = vadd.xlane.f32.xlu1 %v3847_v58 }
 0xb77   : > { %v4288_v13 = vpop.permute.xlu0 %4287 }
 0xb78   : > { %3387 = vadd.xlane.f32.xlu0 %v3386_v7  ;;  %v4314_v43 = vsel %vm702_vm2, %v4288_v13, 0.0 }
 0xb79   : > { %4315 = vadd.xlane.f32.xlu1 %v4314_v43 }
 0xb7b   : > { %v4292_v45 = vpop.permute.xlu0 %4291 }
 0xb7c   : > { %3390 = vadd.xlane.f32.xlu0 %v3389_v51  ;;  %v4320_v33 = vsel %vm702_vm2, %v4292_v45, 0.0 }
 0xb7d   : > { %4321 = vadd.xlane.f32.xlu1 %v4320_v33 }
 0xb7f   : > { %v4294_v40 = vpop.permute.xlu0 %4293 }
 0xb80   : > { %3854 = vadd.xlane.f32.xlu0 %v3853_v30  ;;  %v4323_v11 = vsel %vm702_vm2, %v4294_v40, 0.0 }
 0xb81   : > { %4324 = vadd.xlane.f32.xlu1 %v4323_v11 }
 0xb84   : > { %3857 = vadd.xlane.f32.xlu0 %v3856_v59  ;;  %v2916_v57 = vpop.xlane.xlu1 %2915 }
 0xb85   : > { %v8838_v38 = vadd.f32 %v2916_v57, %v10322_v41 }
 0xb88   : > { %v3829_v34 = vpop.permute.xlu1 %3828 }
 0xb89   : > { %v3859_v37 = vsel %vm702_vm2, %v3829_v34, 0.0 }
 0xb8a   : > { %3860 = vadd.xlane.f32.xlu0 %v3859_v37 }
 0xb8c   : > { %v4296_v35 = vpop.permute.xlu1 %4295 }
 0xb8d   : > { %v4326_v39 = vsel %vm702_vm2, %v4296_v35, 0.0 }
 0xb8e   : > { %4327 = vadd.xlane.f32.xlu0 %v4326_v39 }
 0xba4   : > { %2940 = vperm.xlu0 %7346, %v8830_v28  }
 0xba8   : > { %2949 = vperm.xlu0 %7346, %v8834_v42  }
 0xbac   : > { %2955 = vperm.xlu0 %7346, %v8838_v38  }
 0xbb0   : > { %v2907_v2 = vpop.xlane.xlu0 %2906 }
 0xbb1   : > { %v8872_v53 = vadd.f32 %v2907_v2, %v10326_v46 }
 0xbb4   : > { %v2913_v52 = vpop.xlane.xlu0 %2912 }
 0xbb5   : > { %v8880_v56 = vadd.f32 %v2913_v52, %v10327_v8 }
 0xbb8   : > { %v3362_v12 = vpop.permute.xlu0 %3361 }
 0xbb9   : > { %v3392_v1 = vsel %vm702_vm2, %v3362_v12, 0.0 }
 0xbba   : > { %3393 = vadd.xlane.f32.xlu1 %v3392_v1 }
 0xbbd   : > { %v2919_v29 = vpop.xlane.xlu1 %2918 }
 0xbbe   : > { %v8843_v48 = vadd.f32 %v2919_v29, %v10323_v32 }
 0xbc0   : > { %2958 = vperm.xlu0 %7346, %v8843_v48  }
 0xbc1   : > { %v3373_v23 = vpop.xlane.xlu1 %3372 }
 0xbc2   : > { %v8847_v26 = vadd.f32 %v3373_v23, %v10324_v16 }
 0xbc4   : > { %3412 = vperm.xlu0 %7346, %v8847_v26  }
 0xbc5   : > { %v3385_v17 = vpop.xlane.xlu1 %3384 }
 0xbc6   : > { %v8851_v54 = vadd.f32 %v3385_v17, %v10321_v21 }
 0xbc8   : > { %3424 = vperm.xlu0 %7346, %v8851_v54  }
 0xbc9   : > { %v3843_v19 = vpop.xlane.xlu1 %3842 }
 0xbca   : > { %v8859_v0 = vadd.f32 %v3843_v19, %v10320_v31 }
 0xbcb   : > { %2937 = vperm.xlu1 %7345, %v8856_v15  }
 0xbcc   : > { %3882 = vperm.xlu0 %7346, %v8859_v0  }
 0xbcd   : > { %v3846_v14 = vpop.xlane.xlu1 %3845 }
 0xbce   : > { %v8867_v50 = vadd.f32 %v3846_v14, %v10325_v3 }
 0xbcf   : > { %2943 = vperm.xlu1 %7345, %v8864_v27  }
 0xbd0   : > { %3885 = vperm.xlu0 %7346, %v8867_v50  }
 0xbd1   : > { %v4310_v47 = vpop.xlane.xlu1 %4309 }
 0xbd2   : > { %v8875_v60 = vadd.f32 %v4310_v47, %v10320_v31 }
 0xbd3   : > { %2946 = vperm.xlu1 %7345, %v8872_v53  }
 0xbd4   : > { %4349 = vperm.xlu0 %7346, %v8875_v60  }
 0xbd5   : > { %v4319_v61 = vpop.xlane.xlu1 %4318 }
 0xbd6   : > { %v8883_v58 = vadd.f32 %v4319_v61, %v10321_v21 }
 0xbd7   : > { %2952 = vperm.xlu1 %7345, %v8880_v56  }
 0xbd8   : > { %4358 = vperm.xlu0 %7346, %v8883_v58  }
 0xbe9   : > { %v3840_v13 = vpop.xlane.xlu0 %3839 }
 0xbea   : > { %v8888_v7 = vadd.f32 %v3840_v13, %v10324_v16 }
 0xbec   : > { %3879 = vperm.xlu1 %7345, %v8888_v7  }
 0xbed   : > { %v4307_v43 = vpop.xlane.xlu0 %4306 }
 0xbee   : > { %v8892_v4 = vadd.f32 %v4307_v43, %v10324_v16 }
 0xbf0   : > { %4346 = vperm.xlu1 %7345, %v8892_v4  }
 0xbf1   : > { %v3376_v45 = vpop.xlane.xlu0 %3375 }
 0xbf2   : > { %v8896_v51 = vadd.f32 %v3376_v45, %v10320_v31 }
 0xbf4   : > { %3415 = vperm.xlu1 %7345, %v8896_v51  }
 0xbf5   : > { %v3379_v33 = vpop.xlane.xlu0 %3378 }
 0xbf6   : > { %v8900_v40 = vadd.f32 %v3379_v33, %v10325_v3 }
 0xbf8   : > { %3418 = vperm.xlu1 %7345, %v8900_v40  }
 0xbf9   : > { %v4313_v30 = vpop.xlane.xlu0 %4312 }
 0xbfa   : > { %v8904_v36 = vadd.f32 %v4313_v30, %v10325_v3 }
 0xbfc   : > { %4352 = vperm.xlu1 %7345, %v8904_v36  }
 0xbfd   : > { %v3852_v11 = vpop.xlane.xlu0 %3851 }
 0xbfe   : > { %v8908_v59 = vadd.f32 %v3852_v11, %v10321_v21 }
 0xc00   : > { %3891 = vperm.xlu1 %7345, %v8908_v59  }
 0xc01   : > { %v3382_v57 = vpop.xlane.xlu0 %3381 }
 0xc02   : > { %v8912_v34 = vadd.f32 %v3382_v57, %v10326_v46  ;;  %v3849_v37 = vpop.xlane.xlu1 %3848 }
 0xc03   : > { %v8915_v35 = vadd.f32 %v3849_v37, %v10326_v46 }
 0xc04   : > { %3421 = vperm.xlu1 %7345, %v8912_v34  }
 0xc05   : > { %v3388_v39 = vpop.xlane.xlu0 %3387  ;;  %3888 = vperm.xlu0 %7346, %v8915_v35  }
 0xc06   : > { %v8920_v2 = vadd.f32 %v3388_v39, %v10327_v8  ;;  %v4316_v52 = vpop.xlane.xlu1 %4315 }
 0xc07   : > { %v8923_v12 = vadd.f32 %v4316_v52, %v10326_v46 }
 0xc08   : > { %3427 = vperm.xlu1 %7345, %v8920_v2  }
 0xc09   : > { %v3391_v1 = vpop.xlane.xlu0 %3390  ;;  %4355 = vperm.xlu0 %7346, %v8923_v12  }
 0xc0a   : > { %v8928_v29 = vadd.f32 %v3391_v1, %v10322_v41  ;;  %v4322_v23 = vpop.xlane.xlu1 %4321 }
 0xc0b   : > { %v8931_v17 = vadd.f32 %v4322_v23, %v10327_v8 }
 0xc0c   : > { %3430 = vperm.xlu1 %7345, %v8928_v29  }
 0xc0d   : > { %v3855_v19 = vpop.xlane.xlu0 %3854  ;;  %4361 = vperm.xlu0 %7346, %v8931_v17  }
 0xc0e   : > { %v8936_v14 = vadd.f32 %v3855_v19, %v10327_v8  ;;  %v4325_v30 = vpop.xlane.xlu1 %4324 }
 0xc0f   : > { %v8956_v39 = vadd.f32 %v4325_v30, %v10322_v41 }
 0xc10   : > { %10328 = vst [vmem:[#allocation21_spill] sm:$0xff] %v8936_v14  ;;  %3894 = vperm.xlu1 %7345, %v8936_v14  }
 0xc11   : > { %v3858_v47 = vpop.xlane.xlu0 %3857  ;;  %10332 = vst [vmem:[#allocation25_spill] sm:$0xff] %v8956_v39 }
 0xc12   : > { %v8940_v61 = vadd.f32 %v3858_v47, %v10322_v41 }
 0xc14   : > { %10329 = vst [vmem:[#allocation22_spill] sm:$0xff] %v8940_v61  ;;  %3897 = vperm.xlu1 %7345, %v8940_v61  }
 0xc17   : > { %v3861_v13 = vpop.xlane.xlu0 %3860 }
 0xc18   : > { %v8944_v43 = vadd.f32 %v3861_v13, %v10323_v32 }
 0xc1a   : > { %10330 = vst [vmem:[#allocation23_spill] sm:$0xff] %v8944_v43  ;;  %3900 = vperm.xlu1 %7345, %v8944_v43  }
 0xc1b   : > { %v4328_v45 = vpop.xlane.xlu0 %4327 }
 0xc1c   : > { %v8948_v33 = vadd.f32 %v4328_v45, %v10323_v32 }
 0xc1e   : > { %10331 = vst [vmem:[#allocation11_spill] sm:$0xff] %v8948_v33  ;;  %4367 = vperm.xlu1 %7345, %v8948_v33  }
 0xc23   : > { %v2941_v1 = vpop.permute.xlu0 %2940 }
 0xc24   : > { %v2967_v45 = vrot.slane %v2941_v1, %v8242_v62 }
 0xc27   : > { %v2950_v47 = vpop.permute.xlu0 %2949 }
 0xc28   : > { %v2979_v31 = vrot.slane %v2950_v47, %v8242_v62 }
 0xc2b   : > { %v2956_v8 = vpop.permute.xlu0 %2955 }
 0xc2c   : > { %v2987_v1 = vrot.slane %v2956_v8, %v8242_v62 }
 0xc3f   : > { %v2959_v46 = vpop.permute.xlu0 %2958 }
 0xc47   : > { %v3394_v11 = vpop.xlane.xlu1 %3393 }
 0xc48   : > { %v8952_v57 = vadd.f32 %v3394_v11, %v10323_v32 }
 0xc4a   : > { %3433 = vperm.xlu0 %7346, %v8952_v57  }
 0xc4b   : > { %v2938_v37 = vpop.permute.xlu1 %2937 }
 0xc4c   : > { %v2963_v19 = vrot.slane %v2938_v37, %v8242_v62 }
 0xc4e   : > { %4364 = vperm.xlu0 %7346, %v8956_v39   ;;  %v2992_v21 = vsel %vm866_vm3, %v2967_v45, %v2963_v19  ;;  %v2991_v19 = vrot.slane %v2959_v46, %v8242_v62 }
 0xc4f   : > { %v2944_v52 = vpop.permute.xlu1 %2943 }
 0xc50   : > { %v2971_v13 = vrot.slane %v2944_v52, %v8242_v62 }
 0xc52   : > { %v2993_v30 = vsel %vm868_vm4, %v2971_v13, %v2992_v21 }
 0xc53   : > { %v2947_v23 = vpop.permute.xlu1 %2946 }
 0xc54   : > { %v2975_v11 = vrot.slane %v2947_v23, %v8242_v62 }
 0xc56   : > { %v2994_v41 = vsel %vm870_vm5, %v2975_v11, %v2993_v30 }
 0xc57   : > { %v2953_v32 = vpop.permute.xlu1 %2952  ;;  %v2995_v37 = vsel %vm872_vm6, %v2979_v31, %v2994_v41 }
 0xc58   : > { %v2983_v3 = vrot.slane %v2953_v32, %v8242_v62  ;;  %v3413_v32 = vpop.permute.xlu0 %3412 }
 0xc5a   : > { %v2996_v52 = vsel %vm874_vm7, %v2983_v3, %v2995_v37 }
 0xc5b   : > { %v2997_v23 = vsel %vm876_vm8, %v2987_v1, %v2996_v52 }
 0xc5c   : > { %v2998_v21 = vsel %vm878_vm9, %v2991_v19, %v2997_v23  ;;  %v3425_v11 = vpop.permute.xlu0 %3424 }
 0xc5d   : > { %v3000_v45 = vsel %vm702_vm2, %v2998_v21, -inf }
 0xc60   : > { %v3883_v41 = vpop.permute.xlu0 %3882 }
 0xc61   : > { %v3909_v21 = vrot.slane %v3883_v41, %v8242_v62 }
 0xc64   : > { %v3886_v37 = vpop.permute.xlu0 %3885 }
 0xc65   : > { %v3913_v25 = vrot.slane %v3886_v37, %v8242_v62 }
 0xc68   : > { %v4350_v44 = vpop.permute.xlu0 %4349 }
 0xc6b   : > { %v3880_v13 = vpop.permute.xlu1 %3879 }
 0xc6c   : > { %v4359_v1 = vpop.permute.xlu0 %4358  ;;  %v3905_v23 = vrot.slane %v3880_v13, %v8242_v62 }
 0xc6d   : > { %3001 = vmax.xlane.f32.xlu0 %v3000_v45 }
 0xc6e   : > { %v3934_v45 = vsel %vm866_vm3, %v3909_v21, %v3905_v23 }
 0xc6f   : > { %v4347_v47 = vpop.permute.xlu1 %4346  ;;  %v3935_v33 = vsel %vm868_vm4, %v3913_v25, %v3934_v45 }
 0xc73   : > { %v3416_v30 = vpop.permute.xlu1 %3415 }
 0xc77   : > { %v3419_v31 = vpop.permute.xlu1 %3418 }
 0xc7b   : > { %v4353_v3 = vpop.permute.xlu1 %4352 }
 0xc7c   : > { %v4380_v45 = vrot.slane %v4353_v3, %v8242_v62 }
 0xc7f   : > { %v3892_v8 = vpop.permute.xlu1 %3891 }
 0xc80   : > { %v3921_v39 = vrot.slane %v3892_v8, %v8242_v62 }
 0xc83   : > { %v3422_v16 = vpop.permute.xlu1 %3421 }
 0xc84   : > { %v3889_v19 = vpop.permute.xlu0 %3888 }
 0xc85   : > { %v3917_v63 = vrot.slane %v3889_v19, %v8242_v62 }
 0xc87   : > { %v3428_v52 = vpop.permute.xlu1 %3427  ;;  %v3936_v43 = vsel %vm870_vm5, %v3917_v63, %v3935_v33  ;;  %v3446_v33 = vrot.slane %v3419_v31, %v8242_v62  ;;  %v4376_v31 = vrot.slane %v4350_v44, %v8242_v62 }
 0xc88   : > { %v3937_v14 = vsel %vm872_vm6, %v3921_v39, %v3936_v43  ;;  %v4356_v63 = vpop.permute.xlu0 %4355  ;;  %v3450_v43 = vrot.slane %v3422_v16, %v8242_v62 }
 0xc8b   : > { %v3431_v46 = vpop.permute.xlu1 %3430 }
 0xc8c   : > { %v4362_v8 = vpop.permute.xlu0 %4361  ;;  %v3462_v16 = vrot.slane %v3431_v46, %v8242_v62 }
 0xc8f   : > { %v3895_v55 = vpop.permute.xlu1 %3894 }
 0xc90   : > { %v3925_v61 = vrot.slane %v3895_v55, %v8242_v62  ;;  %v3442_v55 = vrot.slane %v3416_v30, %v8242_v62  ;;  %v3454_v30 = vrot.slane %v3425_v11, %v8242_v62  ;;  %v4392_v11 = vrot.slane %v4362_v8, %v8242_v62 }
 0xc92   : > { %v3938_v23 = vsel %vm874_vm7, %v3925_v61, %v3937_v14  ;;  %v4372_v61 = vrot.slane %v4347_v47, %v8242_v62 }
 0xc93   : > { %v3898_v49 = vpop.permute.xlu1 %3897 }
 0xc94   : > { %v3929_v13 = vrot.slane %v3898_v49, %v8242_v62  ;;  %v3438_v49 = vrot.slane %v3413_v32, %v8242_v62  ;;  %v4384_v32 = vrot.slane %v4356_v63, %v8242_v62 }
 0xc96   : > { %v3939_v37 = vsel %vm876_vm8, %v3929_v13, %v3938_v23  ;;  %v3467_v14 = vsel %vm866_vm3, %v3442_v55, %v3438_v49  ;;  %v4401_v23 = vsel %vm866_vm3, %v4376_v31, %v4372_v61 }
 0xc97   : > { %v3468_v39 = vsel %vm868_vm4, %v3446_v33, %v3467_v14 }
 0xc98   : > { %v3469_v13 = vsel %vm870_vm5, %v3450_v43, %v3468_v39 }
 0xc99   : > { %v3901_v41 = vpop.permute.xlu1 %3900  ;;  %v3470_v47 = vsel %vm872_vm6, %v3454_v30, %v3469_v13 }
 0xc9a   : > { %v3933_v19 = vrot.slane %v3901_v41, %v8242_v62  ;;  %v3458_v41 = vrot.slane %v3428_v52, %v8242_v62 }
 0xc9c   : > { %v3940_v21 = vsel %vm878_vm9, %v3933_v19, %v3939_v37  ;;  %v4402_v37 = vsel %vm868_vm4, %v4380_v45, %v4401_v23  ;;  %v3471_v3 = vsel %vm874_vm7, %v3458_v41, %v3470_v47 }
 0xc9d   : > { %v3942_v25 = vsel %vm702_vm2, %v3940_v21, -inf  ;;  %v4403_v52 = vsel %vm870_vm5, %v4384_v32, %v4402_v37  ;;  %v3472_v44 = vsel %vm876_vm8, %v3462_v16, %v3471_v3  ;;  %v4368_v46 = vpop.permute.xlu1 %4367 }
 0xc9e   : > { %3943 = vmax.xlane.f32.xlu0 %v3942_v25  ;;  %v4388_v25 = vrot.slane %v4359_v1, %v8242_v62  ;;  %v4400_v61 = vrot.slane %v4368_v46, %v8242_v62 }
 0xca0   : > { %v4404_v49 = vsel %vm872_vm6, %v4388_v25, %v4403_v52 }
 0xca1   : > { %v4405_v14 = vsel %vm874_vm7, %v4392_v11, %v4404_v49 }
 0xcc9   : > { %v3434_v19 = vpop.permute.xlu0 %3433 }
 0xcca   : > { %v3466_v21 = vrot.slane %v3434_v19, %v8242_v62 }
 0xccc   : > { %v3473_v63 = vsel %vm878_vm9, %v3466_v21, %v3472_v44 }
 0xccd   : > { %v4365_v55 = vpop.permute.xlu0 %4364  ;;  %v3475_v33 = vsel %vm702_vm2, %v3473_v63, -inf }
 0xcce   : > { %v4396_v43 = vrot.slane %v4365_v55, %v8242_v62  ;;  %3476 = vmax.xlane.f32.xlu1 %v3475_v33 }
 0xcd0   : > { %v4406_v39 = vsel %vm876_vm8, %v4396_v43, %v4405_v14 }
 0xcd1   : > { %v4407_v8 = vsel %vm878_vm9, %v4400_v61, %v4406_v39 }
 0xcd2   : > { %v4409_v1 = vsel %vm702_vm2, %v4407_v8, -inf }
 0xcd3   : > { %4410 = vmax.xlane.f32.xlu0 %v4409_v1 }
 0xcfa   : > { %v3002_v45 = vpop.xlane.xlu0 %3001 }
 0xcfb   : > { %v3007_v13 = vrot.slane %v3002_v45, %v7956_v5  ;;  %v3011_v41 = vrot.slane %v3002_v45, %v7959_v6  ;;  %v3015_v30 = vrot.slane %v3002_v45, %v7970_v10  ;;  %v3023_v31 = vrot.slane %v3002_v45, %v7977_v18 }
 0xcfc   : > { %v3019_v32 = vrot.slane %v3002_v45, %v7967_v9  ;;  %v3031_v19 = vrot.slane %v3002_v45, %v7989_v22  ;;  %v3027_v52 = vrot.slane %v3002_v45, %v7985_v20  ;;  %v3035_v25 = vrot.slane %v3002_v45, %v7993_v24 }
 0xcfd   : > { %v3044_v16 = vsub.f32 %v8856_v15, %v3007_v13  ;;  %v3045_v23 = vsub.f32 %v8830_v28, %v3011_v41  ;;  %v3046_v47 = vsub.f32 %v8864_v27, %v3015_v30  ;;  %v3048_v37 = vsub.f32 %v8834_v42, %v3023_v31 }
 0xcfe   : > { %v3047_v11 = vsub.f32 %v8872_v53, %v3019_v32  ;;  %v3050_v15 = vsub.f32 %v8838_v38, %v3031_v19  ;;  %v3049_v27 = vsub.f32 %v8880_v56, %v3027_v52  ;;  %v3051_v42 = vsub.f32 %v8843_v48, %v3035_v25 }
 0xcff   : > { %v3052_v3 = vmul.f32 1.442695, %v3044_v16  ;;  %v3054_v21 = vmul.f32 1.442695, %v3045_v23  ;;  %v3056_v44 = vmul.f32 1.442695, %v3046_v47 }
 0xd00   : > { %v3060_v28 = vmul.f32 1.442695, %v3048_v37  ;;  %v3058_v46 = vmul.f32 1.442695, %v3047_v11  ;;  %v3064_v63 = vmul.f32 1.442695, %v3050_v15 }
 0xd01   : > { %7421 = vpow2.f32 %v3052_v3  ;;  %v3062_v55 = vmul.f32 1.442695, %v3049_v27  ;;  %v3066_v53 = vmul.f32 1.442695, %v3051_v42 }
 0xd02   : > { %7423 = vpow2.f32 %v3054_v21 }
 0xd03   : > { %7425 = vpow2.f32 %v3056_v44 }
 0xd04   : > { %7427 = vpow2.f32 %v3060_v28 }
 0xd05   : > { %7429 = vpow2.f32 %v3058_v46 }
 0xd06   : > { %7431 = vpow2.f32 %v3064_v63 }
 0xd07   : > { %7433 = vpow2.f32 %v3062_v55 }
 0xd08   : > { %7435 = vpow2.f32 %v3066_v53 }
 0xd0b   : > { %v9039_v33 = vpop.eup %7421 }
 0xd0c   : > { %v9041_v49 = vpop.eup %7423  ;;  %3077 = vperm.xlu1 %7345, %v9039_v33  }
 0xd0d   : > { %3080 = vperm.xlu0 %7346, %v9041_v49   ;;  %v9045_v38 = vpop.eup %7425 }
 0xd0e   : > { %v9047_v56 = vpop.eup %7427 }
 0xd0f   : > { %v9051_v48 = vpop.eup %7429 }
 0xd10   : > { %3083 = vperm.xlu1 %7345, %v9045_v38   ;;  %v9053_v43 = vpop.eup %7431 }
 0xd11   : > { %3089 = vperm.xlu0 %7346, %v9047_v56   ;;  %v9057_v14 = vpop.eup %7433 }
 0xd12   : > { %v9059_v61 = vpop.eup %7435 }
 0xd14   : > { %3086 = vperm.xlu1 %7345, %v9051_v48  }
 0xd15   : > { %3095 = vperm.xlu0 %7346, %v9053_v43  }
 0xd18   : > { %3092 = vperm.xlu1 %7345, %v9057_v14  }
 0xd19   : > { %3098 = vperm.xlu0 %7346, %v9059_v61  }
 0xd2b   : > { %v9063_v39 = vpop.xlane.xlu0 %3943 }
 0xd2c   : > { %v3953_v30 = vrot.slane %v9063_v39, %v7959_v6  ;;  %v3957_v3 = vrot.slane %v9063_v39, %v7970_v10 }
 0xd2e   : > { %v3987_v21 = vsub.f32 %v8859_v0, %v3953_v30 }
 0xd5b   : > { %v3477_v8 = vpop.xlane.xlu1 %3476 }
 0xd5c   : > { %v3482_v1 = vrot.slane %v3477_v8, %v7956_v5  ;;  %v3486_v45 = vrot.slane %v3477_v8, %v7959_v6  ;;  %v3490_v13 = vrot.slane %v3477_v8, %v7970_v10  ;;  %v3498_v41 = vrot.slane %v3477_v8, %v7977_v18 }
 0xd5d   : > { %v3494_v16 = vrot.slane %v3477_v8, %v7967_v9  ;;  %v3502_v15 = vrot.slane %v3477_v8, %v7985_v20 }
 0xd5e   : > { %v3519_v31 = vsub.f32 %v8847_v26, %v3482_v1  ;;  %v3520_v32 = vsub.f32 %v8896_v51, %v3486_v45  ;;  %v3521_v23 = vsub.f32 %v8900_v40, %v3490_v13  ;;  %v3523_v47 = vsub.f32 %v8851_v54, %v3498_v41 }
 0xd5f   : > { %v3949_v26 = vrot.slane %v9063_v39, %v7956_v5  ;;  %v3522_v51 = vsub.f32 %v8912_v34, %v3494_v16  ;;  %v3988_v54 = vsub.f32 %v8867_v50, %v3957_v3  ;;  %v3996_v40 = vmul.f32 1.442695, %v3987_v21 }
 0xd60   : > { %v3527_v19 = vmul.f32 1.442695, %v3519_v31  ;;  %v3529_v37 = vmul.f32 1.442695, %v3520_v32  ;;  %v3535_v52 = vmul.f32 1.442695, %v3523_v47  ;;  %v9082_v44 = vpop.xlane.xlu0 %4410  ;;  %v3961_v34 = vrot.slane %v9063_v39, %v7967_v9 }
 0xd61   : > { %v3531_v11 = vmul.f32 1.442695, %v3521_v23  ;;  %v4420_v25 = vrot.slane %v9082_v44, %v7959_v6  ;;  %v3986_v0 = vsub.f32 %v8888_v7, %v3949_v26  ;;  %v3533_v28 = vmul.f32 1.442695, %v3522_v51 }
 0xd62   : > { %7437 = vpow2.f32 %v3527_v19  ;;  %v3998_v27 = vmul.f32 1.442695, %v3988_v54  ;;  %v3524_v50 = vsub.f32 %v8920_v2, %v3502_v15  ;;  %v4416_v63 = vrot.slane %v9082_v44, %v7956_v5 }
 0xd63   : > { %7439 = vpow2.f32 %v3529_v37  ;;  %v4454_v46 = vsub.f32 %v8875_v60, %v4420_v25  ;;  %v3994_v42 = vmul.f32 1.442695, %v3986_v0  ;;  %v3989_v53 = vsub.f32 %v8915_v35, %v3961_v34  ;;  %v10333_v34 = vld [vmem:[#allocation21_spill] sm:$0xff] }
 0xd64   : > { %7441 = vpow2.f32 %v3535_v52  ;;  %v3510_v1 = vrot.slane %v3477_v8, %v7993_v24  ;;  %v3506_v60 = vrot.slane %v3477_v8, %v7989_v22  ;;  %v3537_v2 = vmul.f32 1.442695, %v3524_v50 }
 0xd65   : > { %7443 = vpow2.f32 %v3531_v11  ;;  %v4463_v45 = vmul.f32 1.442695, %v4454_v46  ;;  %v4453_v13 = vsub.f32 %v8892_v4, %v4416_v63  ;;  %v4000_v31 = vmul.f32 1.442695, %v3989_v53  ;;  %v10334_v63 = vld [vmem:[#allocation25_spill] sm:$0xff] }
 0xd66   : > { %7445 = vpow2.f32 %v3996_v40  ;;  %v3526_v35 = vsub.f32 %v8952_v57, %v3510_v1  ;;  %v4428_v32 = vrot.slane %v9082_v44, %v7967_v9  ;;  %v3525_v8 = vsub.f32 %v8928_v29, %v3506_v60 }
 0xd67   : > { %7447 = vpow2.f32 %v3533_v28  ;;  %v4424_v4 = vrot.slane %v9082_v44, %v7970_v10  ;;  %v4461_v16 = vmul.f32 1.442695, %v4453_v13  ;;  %v4432_v19 = vrot.slane %v9082_v44, %v7977_v18 }
 0xd68   : > { %7449 = vpow2.f32 %v3998_v27  ;;  %v3541_v57 = vmul.f32 1.442695, %v3526_v35  ;;  %v4456_v37 = vsub.f32 %v8923_v12, %v4428_v32  ;;  %v3965_v29 = vrot.slane %v9063_v39, %v7977_v18  ;;  %v10336_v32 = vld [vmem:[#allocation23_spill] sm:$0xff] }
 0xd69   : > { %7451 = vpow2.f32 %v3994_v42  ;;  %v3539_v3 = vmul.f32 1.442695, %v3525_v8  ;;  %v4455_v21 = vsub.f32 %v8904_v36, %v4424_v4  ;;  %v4436_v51 = vrot.slane %v9082_v44, %v7985_v20 }
 0xd6a   : > { %7453 = vpow2.f32 %v4463_v45  ;;  %v4457_v12 = vsub.f32 %v8883_v58, %v4432_v19  ;;  %v4467_v11 = vmul.f32 1.442695, %v4456_v37  ;;  %v3969_v54 = vrot.slane %v9063_v39, %v7985_v20  ;;  %v10335_v45 = vld [vmem:[#allocation22_spill] sm:$0xff]  ;;  %v10337_v37 = vld [vmem:[#allocation11_spill] sm:$0xff] }
 0xd6b   : > { %7455 = vpow2.f32 %v3537_v2  ;;  %v3990_v36 = vsub.f32 %v8908_v59, %v3965_v29  ;;  %v4465_v40 = vmul.f32 1.442695, %v4455_v21  ;;  %v4440_v15 = vrot.slane %v9082_v44, %v7989_v22 }
 0xd6c   : > { %v9095_v55 = vpop.eup %7437  ;;  %7457 = vpow2.f32 %v4000_v31  ;;  %v4458_v58 = vsub.f32 %v8931_v17, %v4436_v51  ;;  %v4469_v28 = vmul.f32 1.442695, %v4457_v12  ;;  %v3973_v59 = vrot.slane %v9063_v39, %v7989_v22 }
 0xd6d   : > { %v9097_v7 = vpop.eup %7439  ;;  %3552 = vperm.xlu0 %7346, %v9095_v55   ;;  %7459 = vpow2.f32 %v4461_v16  ;;  %v3991_v27 = vsub.f32 %v10333_v34, %v3969_v54  ;;  %v4002_v46 = vmul.f32 1.442695, %v3990_v36  ;;  %v4459_v53 = vsub.f32 %v10334_v63, %v4440_v15 }
 0xd6e   : > { %3555 = vperm.xlu1 %7345, %v9097_v7   ;;  %v9105_v41 = vpop.eup %7441  ;;  %7461 = vpow2.f32 %v3541_v57  ;;  %v4471_v17 = vmul.f32 1.442695, %v4458_v58  ;;  %v3977_v1 = vrot.slane %v9063_v39, %v7993_v24  ;;  %v3992_v60 = vsub.f32 %v10335_v45, %v3973_v59 }
 0xd6f   : > { %v9107_v30 = vpop.eup %7443  ;;  %7463 = vpow2.f32 %v3539_v3  ;;  %v4004_v2 = vmul.f32 1.442695, %v3991_v27  ;;  %v4473_v35 = vmul.f32 1.442695, %v4459_v53  ;;  %v4444_v39 = vrot.slane %v9082_v44, %v7993_v24 }
 0xd70   : > { %v9117_v23 = vpop.eup %7445  ;;  %7465 = vpow2.f32 %v4467_v11  ;;  %v3993_v8 = vsub.f32 %v10336_v32, %v3977_v1  ;;  %v4006_v4 = vmul.f32 1.442695, %v3992_v60 }
 0xd71   : > { %3564 = vperm.xlu0 %7346, %v9105_v41   ;;  %v9119_v47 = vpop.eup %7447  ;;  %7467 = vpow2.f32 %v4465_v40  ;;  %v4460_v29 = vsub.f32 %v10337_v37, %v4444_v39 }
 0xd72   : > { %3558 = vperm.xlu1 %7345, %v9107_v30   ;;  %v9129_v52 = vpop.eup %7449  ;;  %7469 = vpow2.f32 %v4469_v28  ;;  %v4008_v19 = vmul.f32 1.442695, %v3993_v8 }
 0xd73   : > { %v9131_v26 = vpop.eup %7451  ;;  %7471 = vpow2.f32 %v4002_v46  ;;  %v4475_v44 = vmul.f32 1.442695, %v4460_v29 }
 0xd74   : > { %v9141_v25 = vpop.eup %7453  ;;  %7473 = vpow2.f32 %v4471_v17 }
 0xd75   : > { %4022 = vperm.xlu0 %7346, %v9117_v23   ;;  %v9143_v0 = vpop.eup %7455  ;;  %7475 = vpow2.f32 %v4004_v2 }
 0xd76   : > { %3561 = vperm.xlu1 %7345, %v9119_v47   ;;  %v9153_v42 = vpop.eup %7457  ;;  %7477 = vpow2.f32 %v4473_v35 }
 0xd77   : > { %v9155_v50 = vpop.eup %7459  ;;  %7479 = vpow2.f32 %v4006_v4 }
 0xd78   : > { %v9163_v13 = vpop.eup %7461  ;;  %7481 = vpow2.f32 %v4008_v19 }
 0xd79   : > { %4025 = vperm.xlu0 %7346, %v9129_v52   ;;  %v9165_v31 = vpop.eup %7463  ;;  %7483 = vpow2.f32 %v4475_v44 }
 0xd7a   : > { %4019 = vperm.xlu1 %7345, %v9131_v26   ;;  %v9172_v16 = vpop.eup %7465 }
 0xd7b   : > { %v9174_v57 = vpop.eup %7467 }
 0xd7c   : > { %v9179_v3 = vpop.eup %7469 }
 0xd7d   : > { %4489 = vperm.xlu0 %7346, %v9141_v25   ;;  %v9181_v21 = vpop.eup %7471 }
 0xd7e   : > { %3567 = vperm.xlu1 %7345, %v9143_v0   ;;  %v9185_v51 = vpop.eup %7473 }
 0xd7f   : > { %v9187_v12 = vpop.eup %7475 }
 0xd80   : > { %v9191_v54 = vpop.eup %7477 }
 0xd81   : > { %4028 = vperm.xlu0 %7346, %v9153_v42   ;;  %v9193_v36 = vpop.eup %7479 }
 0xd82   : > { %4486 = vperm.xlu1 %7345, %v9155_v50   ;;  %v9197_v15 = vpop.eup %7481 }
 0xd83   : > { %v9200_v28 = vpop.eup %7483 }
 0xd85   : > { %3573 = vperm.xlu0 %7346, %v9163_v13  }
 0xd86   : > { %3570 = vperm.xlu1 %7345, %v9165_v31  }
 0xd89   : > { %4495 = vperm.xlu0 %7346, %v9172_v16  }
 0xd8a   : > { %4492 = vperm.xlu1 %7345, %v9174_v57  }
 0xd8b   : > { %v3078_v11 = vpop.permute.xlu1 %3077 }
 0xd8c   : > { %v3081_v58 = vpop.permute.xlu0 %3080  ;;  %v3103_v46 = vrot.slane %v3078_v11, %v8242_v62 }
 0xd8d   : > { %4498 = vperm.xlu0 %7346, %v9179_v3   ;;  %v3107_v27 = vrot.slane %v3081_v58, %v8242_v62 }
 0xd8e   : > { %4031 = vperm.xlu1 %7345, %v9181_v21  }
 0xd8f   : > { %v3084_v40 = vpop.permute.xlu1 %3083  ;;  %v3132_v1 = vsel %vm866_vm3, %v3107_v27, %v3103_v46 }
 0xd90   : > { %v3090_v34 = vpop.permute.xlu0 %3089  ;;  %v3111_v63 = vrot.slane %v3084_v40, %v8242_v62 }
 0xd91   : > { %4501 = vperm.xlu0 %7346, %v9185_v51   ;;  %v3119_v32 = vrot.slane %v3090_v34, %v8242_v62 }
 0xd92   : > { %4034 = vperm.xlu1 %7345, %v9187_v12   ;;  %v3133_v45 = vsel %vm868_vm4, %v3111_v63, %v3132_v1 }
 0xd93   : > { %v3087_v59 = vpop.permute.xlu1 %3086 }
 0xd94   : > { %v3115_v53 = vrot.slane %v3087_v59, %v8242_v62  ;;  %v3096_v60 = vpop.permute.xlu0 %3095 }
 0xd95   : > { %4504 = vperm.xlu0 %7346, %v9191_v54   ;;  %v3127_v39 = vrot.slane %v3096_v60, %v8242_v62 }
 0xd96   : > { %4037 = vperm.xlu1 %7345, %v9193_v36   ;;  %v3134_v2 = vsel %vm870_vm5, %v3115_v53, %v3133_v45 }
 0xd97   : > { %v3093_v17 = vpop.permute.xlu1 %3092  ;;  %v3135_v8 = vsel %vm872_vm6, %v3119_v32, %v3134_v2 }
 0xd98   : > { %v3123_v35 = vrot.slane %v3093_v17, %v8242_v62  ;;  %v3099_v19 = vpop.permute.xlu0 %3098 }
 0xd99   : > { %v3131_v29 = vrot.slane %v3099_v19, %v8242_v62 }
 0xd9a   : > { %4040 = vperm.xlu1 %7345, %v9197_v15   ;;  %v3136_v4 = vsel %vm874_vm7, %v3123_v35, %v3135_v8 }
 0xd9b   : > { %v3137_v37 = vsel %vm876_vm8, %v3127_v39, %v3136_v4 }
 0xd9c   : > { %v3138_v44 = vsel %vm878_vm9, %v3131_v29, %v3137_v37 }
 0xd9d   : > { %v3140_v11 = vsel %vm702_vm2, %v3138_v44, 0.0 }
 0xd9e   : > { %4507 = vperm.xlu1 %7345, %v9200_v28  }
 0xdb4   : > { %3141 = vadd.xlane.f32.xlu0 %v3140_v11 }
 0xdec   : > { %v3553_v40 = vpop.permute.xlu0 %3552 }
 0xded   : > { %v3556_v58 = vpop.permute.xlu1 %3555  ;;  %v3578_v1 = vrot.slane %v3553_v40, %v8242_v62 }
 0xdee   : > { %v3582_v45 = vrot.slane %v3556_v58, %v8242_v62 }
 0xdf0   : > { %v3565_v59 = vpop.permute.xlu0 %3564  ;;  %v3607_v8 = vsel %vm866_vm3, %v3582_v45, %v3578_v1 }
 0xdf1   : > { %v3559_v34 = vpop.permute.xlu1 %3558  ;;  %v3594_v29 = vrot.slane %v3565_v59, %v8242_v62 }
 0xdf2   : > { %v3586_v2 = vrot.slane %v3559_v34, %v8242_v62 }
 0xdf4   : > { %v4023_v27 = vpop.permute.xlu0 %4022  ;;  %v3608_v39 = vsel %vm868_vm4, %v3586_v2, %v3607_v8 }
 0xdf5   : > { %v3562_v46 = vpop.permute.xlu1 %3561 }
 0xdf6   : > { %v3590_v35 = vrot.slane %v3562_v46, %v8242_v62 }
 0xdf8   : > { %v4026_v63 = vpop.permute.xlu0 %4025  ;;  %v3609_v19 = vsel %vm870_vm5, %v3590_v35, %v3608_v39 }
 0xdf9   : > { %v4020_v53 = vpop.permute.xlu1 %4019  ;;  %v3610_v58 = vsel %vm872_vm6, %v3594_v29, %v3609_v19  ;;  %v4049_v19 = vrot.slane %v4023_v27, %v8242_v62 }
 0xdfa   : > { %v4045_v39 = vrot.slane %v4020_v53, %v8242_v62 }
 0xdfc   : > { %v4490_v17 = vpop.permute.xlu0 %4489 }
 0xdfd   : > { %v3568_v60 = vpop.permute.xlu1 %3567 }
 0xdfe   : > { %v3598_v37 = vrot.slane %v3568_v60, %v8242_v62 }
 0xe00   : > { %v4029_v32 = vpop.permute.xlu0 %4028  ;;  %v3611_v46 = vsel %vm874_vm7, %v3598_v37, %v3610_v58  ;;  %v4074_v37 = vsel %vm866_vm3, %v4049_v19, %v4045_v39 }
 0xe01   : > { %v4487_v4 = vpop.permute.xlu1 %4486  ;;  %v4057_v58 = vrot.slane %v4029_v32, %v8242_v62 }
 0xe04   : > { %v3574_v44 = vpop.permute.xlu0 %3573 }
 0xe05   : > { %v3606_v11 = vrot.slane %v3574_v44, %v8242_v62  ;;  %v3571_v40 = vpop.permute.xlu1 %3570 }
 0xe06   : > { %v3602_v34 = vrot.slane %v3571_v40, %v8242_v62  ;;  %v4053_v40 = vrot.slane %v4026_v63, %v8242_v62 }
 0xe08   : > { %v4496_v1 = vpop.permute.xlu0 %4495  ;;  %v3612_v45 = vsel %vm876_vm8, %v3602_v34, %v3611_v46  ;;  %v4512_v34 = vrot.slane %v4487_v4, %v8242_v62  ;;  %v4075_v27 = vsel %vm868_vm4, %v4053_v40, %v4074_v37 }
 0xe09   : > { %v4493_v2 = vpop.permute.xlu1 %4492  ;;  %v3613_v35 = vsel %vm878_vm9, %v3606_v11, %v3612_v45  ;;  %v4076_v63 = vsel %vm870_vm5, %v4057_v58, %v4075_v27  ;;  %v4524_v32 = vrot.slane %v4496_v1, %v8242_v62 }
 0xe0a   : > { %v3615_v60 = vsel %vm702_vm2, %v3613_v35, 0.0  ;;  %v4520_v11 = vrot.slane %v4493_v2, %v8242_v62  ;;  %v4516_v35 = vrot.slane %v4490_v17, %v8242_v62 }
 0xe0b   : > { %3616 = vadd.xlane.f32.xlu1 %v3615_v60 }
 0xe0c   : > { %v4499_v59 = vpop.permute.xlu0 %4498  ;;  %v4541_v39 = vsel %vm866_vm3, %v4516_v35, %v4512_v34 }
 0xe0d   : > { %v4032_v8 = vpop.permute.xlu1 %4031  ;;  %v4542_v2 = vsel %vm868_vm4, %v4520_v11, %v4541_v39 }
 0xe0e   : > { %v4061_v46 = vrot.slane %v4032_v8, %v8242_v62  ;;  %v4528_v8 = vrot.slane %v4499_v59, %v8242_v62  ;;  %v4543_v1 = vsel %vm870_vm5, %v4524_v32, %v4542_v2 }
 0xe10   : > { %v4502_v29 = vpop.permute.xlu0 %4501  ;;  %v4077_v19 = vsel %vm872_vm6, %v4061_v46, %v4076_v63  ;;  %v4544_v11 = vsel %vm872_vm6, %v4528_v8, %v4543_v1 }
 0xe11   : > { %v4035_v44 = vpop.permute.xlu1 %4034 }
 0xe12   : > { %v4065_v53 = vrot.slane %v4035_v44, %v8242_v62  ;;  %v4532_v44 = vrot.slane %v4502_v29, %v8242_v62 }
 0xe14   : > { %v4505_v4 = vpop.permute.xlu0 %4504  ;;  %v4078_v40 = vsel %vm874_vm7, %v4065_v53, %v4077_v19  ;;  %v4545_v35 = vsel %vm874_vm7, %v4532_v44, %v4544_v11 }
 0xe15   : > { %v4038_v45 = vpop.permute.xlu1 %4037  ;;  %v4536_v58 = vrot.slane %v4505_v4, %v8242_v62 }
 0xe16   : > { %v4069_v60 = vrot.slane %v4038_v45, %v8242_v62 }
 0xe17   : > { %v4546_v53 = vsel %vm876_vm8, %v4536_v58, %v4545_v35 }
 0xe18   : > { %v4079_v34 = vsel %vm876_vm8, %v4069_v60, %v4078_v40 }
 0xe19   : > { %v4041_v17 = vpop.permute.xlu1 %4040 }
 0xe1a   : > { %v4073_v37 = vrot.slane %v4041_v17, %v8242_v62 }
 0xe1c   : > { %v4080_v45 = vsel %vm878_vm9, %v4073_v37, %v4079_v34 }
 0xe1d   : > { %v4508_v59 = vpop.permute.xlu1 %4507  ;;  %v4082_v46 = vsel %vm702_vm2, %v4080_v45, 0.0 }
 0xe1e   : > { %v4540_v29 = vrot.slane %v4508_v59, %v8242_v62  ;;  %4083 = vadd.xlane.f32.xlu0 %v4082_v46 }
 0xe20   : > { %v4547_v27 = vsel %vm878_vm9, %v4540_v29, %v4546_v53 }
 0xe21   : > { %v4549_v60 = vsel %vm702_vm2, %v4547_v27, 0.0 }
 0xe22   : > { %4550 = vadd.xlane.f32.xlu0 %v4549_v60 }
 0xe41   : > { %v3142_v63 = vpop.xlane.xlu0 %3141 }
 0xe42   : > { %7485 = vrcp.f32 %v3142_v63 }
 0xe4c   : > { %v7486_v39 = vpop.eup %7485 }
 0xe4d   : > { %v3148_v32 = vrot.slane %v7486_v39, %v7956_v5  ;;  %v3152_v4 = vrot.slane %v7486_v39, %v7959_v6  ;;  %v3156_v19 = vrot.slane %v7486_v39, %v7970_v10  ;;  %v3164_v17 = vrot.slane %v7486_v39, %v7977_v18 }
 0xe4e   : > { %v3160_v37 = vrot.slane %v7486_v39, %v7967_v9  ;;  %v3172_v58 = vrot.slane %v7486_v39, %v7989_v22  ;;  %v3168_v34 = vrot.slane %v7486_v39, %v7985_v20  ;;  %v3176_v1 = vrot.slane %v7486_v39, %v7993_v24 }
 0xe4f   : > { %v3185_v2 = vmul.f32 %v9039_v33, %v3148_v32  ;;  %v3186_v8 = vmul.f32 %v9041_v49, %v3152_v4  ;;  %v3187_v44 = vmul.f32 %v9045_v38, %v3156_v19  ;;  %v3189_v40 = vmul.f32 %v9047_v56, %v3164_v17 }
 0xe50   : > { %v3188_v33 = vmul.f32 %v9051_v48, %v3160_v37  ;;  %v3191_v49 = vmul.f32 %v9053_v43, %v3172_v58  ;;  %v3190_v38 = vmul.f32 %v9057_v14, %v3168_v34  ;;  %v3192_v56 = vmul.f32 %v9059_v61, %v3176_v1 }
 0xe51   : > { %3202 = vperm.xlu1 %7345, %v3185_v2   ;;  %3205 = vperm.xlu0 %7346, %v3186_v8  }
 0xe55   : > { %3208 = vperm.xlu1 %7345, %v3187_v44   ;;  %3214 = vperm.xlu0 %7346, %v3189_v40  }
 0xe59   : > { %3211 = vperm.xlu1 %7345, %v3188_v33   ;;  %3220 = vperm.xlu0 %7346, %v3191_v49  }
 0xe5d   : > { %3217 = vperm.xlu1 %7345, %v3190_v38   ;;  %3223 = vperm.xlu0 %7346, %v3192_v56  }
 0xe98   : > { %v3617_v45 = vpop.xlane.xlu1 %3616 }
 0xe99   : > { %7487 = vrcp.f32 %v3617_v45 }
 0xea3   : > { %v7488_v11 = vpop.eup %7487 }
 0xea4   : > { %v3627_v59 = vrot.slane %v7488_v11, %v7959_v6  ;;  %v3623_v48 = vrot.slane %v7488_v11, %v7956_v5  ;;  %v3631_v35 = vrot.slane %v7488_v11, %v7970_v10  ;;  %v3639_v29 = vrot.slane %v7488_v11, %v7977_v18 }
 0xea5   : > { %v3635_v53 = vrot.slane %v7488_v11, %v7967_v9  ;;  %v3643_v32 = vrot.slane %v7488_v11, %v7985_v20  ;;  %v3647_v44 = vrot.slane %v7488_v11, %v7989_v22  ;;  %v3651_v58 = vrot.slane %v7488_v11, %v7993_v24 }
 0xea6   : > { %v3661_v43 = vmul.f32 %v9097_v7, %v3627_v59  ;;  %v3660_v46 = vmul.f32 %v9095_v55, %v3623_v48  ;;  %v3662_v14 = vmul.f32 %v9107_v30, %v3631_v35  ;;  %v3664_v61 = vmul.f32 %v9105_v41, %v3639_v29 }
 0xea7   : > { %v3663_v7 = vmul.f32 %v9119_v47, %v3635_v53  ;;  %v3665_v47 = vmul.f32 %v9143_v0, %v3643_v32  ;;  %v3666_v0 = vmul.f32 %v9165_v31, %v3647_v44 }
 0xea8   : > { %3680 = vperm.xlu1 %7345, %v3661_v43   ;;  %3677 = vperm.xlu0 %7346, %v3660_v46  }
 0xeab   : > { %v4084_v27 = vpop.xlane.xlu0 %4083 }
 0xeac   : > { %7489 = vrcp.f32 %v4084_v27  ;;  %3683 = vperm.xlu1 %7345, %v3662_v14   ;;  %3689 = vperm.xlu0 %7346, %v3664_v61  }
 0xeaf   : > { %v4551_v60 = vpop.xlane.xlu0 %4550 }
 0xeb0   : > { %7491 = vrcp.f32 %v4551_v60  ;;  %3686 = vperm.xlu1 %7345, %v3663_v7  }
 0xeb6   : > { %v7490_v55 = vpop.eup %7489 }
 0xeb7   : > { %v4090_v63 = vrot.slane %v7490_v55, %v7956_v5  ;;  %v4094_v39 = vrot.slane %v7490_v55, %v7959_v6  ;;  %v4098_v4 = vrot.slane %v7490_v55, %v7970_v10  ;;  %v4102_v40 = vrot.slane %v7490_v55, %v7967_v9 }
 0xeb8   : > { %v4106_v33 = vrot.slane %v7490_v55, %v7977_v18  ;;  %v4110_v34 = vrot.slane %v7490_v55, %v7985_v20  ;;  %v4114_v38 = vrot.slane %v7490_v55, %v7989_v22  ;;  %v4118_v45 = vrot.slane %v7490_v55, %v7993_v24 }
 0xeb9   : > { %v4127_v30 = vmul.f32 %v9131_v26, %v4090_v63  ;;  %v4128_v41 = vmul.f32 %v9117_v23, %v4094_v39  ;;  %v4129_v8 = vmul.f32 %v9129_v52, %v4098_v4  ;;  %v4130_v52 = vmul.f32 %v9153_v42, %v4102_v40 }
 0xeba   : > { %v7492_v2 = vpop.eup %7491  ;;  %v4131_v31 = vmul.f32 %v9181_v21, %v4106_v33  ;;  %v4133_v21 = vmul.f32 %v9193_v36, %v4114_v38  ;;  %v10338_v36 = vld [vmem:[#allocation24_spill] sm:$0xff] }
 0xebb   : > { %4144 = vperm.xlu1 %7345, %v4127_v30   ;;  %4147 = vperm.xlu0 %7346, %v4128_v41   ;;  %v4557_v19 = vrot.slane %v7492_v2, %v7956_v5  ;;  %v4561_v17 = vrot.slane %v7492_v2, %v7959_v6  ;;  %v4565_v37 = vrot.slane %v7492_v2, %v7970_v10 }
 0xebc   : > { %v4569_v49 = vrot.slane %v7492_v2, %v7967_v9  ;;  %v4573_v1 = vrot.slane %v7492_v2, %v7977_v18  ;;  %v4577_v56 = vrot.slane %v7492_v2, %v7985_v20  ;;  %v4581_v11 = vrot.slane %v7492_v2, %v7989_v22 }
 0xebd   : > { %v4594_v26 = vmul.f32 %v9155_v50, %v4557_v19  ;;  %v4595_v23 = vmul.f32 %v9141_v25, %v4561_v17  ;;  %v4596_v50 = vmul.f32 %v9174_v57, %v4565_v37  ;;  %v3667_v25 = vmul.f32 %v9163_v13, %v3651_v58 }
 0xebe   : > { %v4597_v42 = vmul.f32 %v9172_v16, %v4569_v49  ;;  %v4132_v57 = vmul.f32 %v9187_v12, %v4110_v34  ;;  %v4598_v13 = vmul.f32 %v9179_v3, %v4573_v1  ;;  %v4599_v16 = vmul.f32 %v9185_v51, %v4577_v56 }
 0xebf   : > { %3692 = vperm.xlu1 %7345, %v3665_v47   ;;  %4150 = vperm.xlu0 %7346, %v4129_v8   ;;  %v4134_v12 = vmul.f32 %v9197_v15, %v4118_v45  ;;  %v4600_v3 = vmul.f32 %v9191_v54, %v4581_v11  ;;  %v4585_v59 = vrot.slane %v7492_v2, %v7993_v24 }
 0xec1   : > { %v4601_v48 = vmul.f32 %v9200_v28, %v4585_v59 }
 0xec3   : > { %4611 = vperm.xlu1 %7345, %v4594_v26   ;;  %4614 = vperm.xlu0 %7346, %v4595_v23  }
 0xec7   : > { %3695 = vperm.xlu1 %7345, %v3666_v0   ;;  %4153 = vperm.xlu0 %7346, %v4130_v52  }
 0xecb   : > { %4617 = vperm.xlu1 %7345, %v4596_v50   ;;  %3698 = vperm.xlu0 %7346, %v3667_v25  }
 0xecf   : > { %4156 = vperm.xlu1 %7345, %v4131_v31   ;;  %4620 = vperm.xlu0 %7346, %v4597_v42  }
 0xed0   : > { %v3203_v51 = vpop.permute.xlu1 %3202  ;;  %v3206_v54 = vpop.permute.xlu0 %3205 }
 0xed1   : > { %v3232_v8 = vrot.slane %v3206_v54, %v8242_v62  ;;  %v3228_v19 = vrot.slane %v3203_v51, %v8242_v62 }
 0xed3   : > { %4159 = vperm.xlu1 %7345, %v4132_v57   ;;  %4623 = vperm.xlu0 %7346, %v4598_v13   ;;  %v3257_v40 = vsel %vm866_vm3, %v3232_v8, %v3228_v19  ;;  %v10339_v8 = vmov 0.0  }
 0xed4   : > { %v3209_v15 = vpop.permute.xlu1 %3208  ;;  %v3215_v43 = vpop.permute.xlu0 %3214 }
 0xed5   : > { %v3236_v17 = vrot.slane %v3209_v15, %v8242_v62  ;;  %v3244_v58 = vrot.slane %v3215_v43, %v8242_v62 }
 0xed7   : > { %4162 = vperm.xlu1 %7345, %v4133_v21   ;;  %4626 = vperm.xlu0 %7346, %v4599_v16   ;;  %v3258_v0 = vsel %vm868_vm4, %v3236_v17, %v3257_v40 }
 0xed8   : > { %v3212_v46 = vpop.permute.xlu1 %3211  ;;  %v3221_v35 = vpop.permute.xlu0 %3220 }
 0xed9   : > { %v3240_v26 = vrot.slane %v3212_v46, %v8242_v62  ;;  %v3252_v31 = vrot.slane %v3221_v35, %v8242_v62 }
 0xedb   : > { %4165 = vperm.xlu1 %7345, %v4134_v12   ;;  %4629 = vperm.xlu0 %7346, %v4600_v3   ;;  %v3259_v52 = vsel %vm870_vm5, %v3240_v26, %v3258_v0 }
 0xedc   : > { %v3218_v28 = vpop.permute.xlu1 %3217  ;;  %v3224_v14 = vpop.permute.xlu0 %3223  ;;  %v3260_v33 = vsel %vm872_vm6, %v3244_v58, %v3259_v52 }
 0xedd   : > { %v3248_v37 = vrot.slane %v3218_v28, %v8242_v62  ;;  %v3256_v45 = vrot.slane %v3224_v14, %v8242_v62 }
 0xedf   : > { %4632 = vperm.xlu1 %7345, %v4601_v48   ;;  %3264 = vrot.lane.b32.xlu0 %v10338_v36, %s7708_s14  ;;  %v3261_v49 = vsel %vm874_vm7, %v3248_v37, %v3260_v33 }
 0xee0   : > { %v3262_v16 = vsel %vm876_vm8, %v3252_v31, %v3261_v49 }
 0xee1   : > { %v3263_v54 = vsel %vm878_vm9, %v3256_v45, %v3262_v16 }
 0xee3   : > { %3739 = vrot.lane.b32.xlu1 %v10338_v36, %s7713_s18  ;;  %4206 = vrot.lane.b32.xlu0 %v10338_v36, %s7714_s16 }
 0xee7   : > { %4673 = vrot.lane.b32.xlu1 %v10338_v36, %s7715_s13 }
 0xf27   : > { %v3681_v29 = vpop.permute.xlu1 %3680  ;;  %v3678_v61 = vpop.permute.xlu0 %3677 }
 0xf28   : > { %v3703_v42 = vrot.slane %v3678_v61, %v8242_v62  ;;  %v3707_v34 = vrot.slane %v3681_v29, %v8242_v62 }
 0xf2a   : > { %v3732_v11 = vsel %vm866_vm3, %v3707_v34, %v3703_v42 }
 0xf2b   : > { %v3684_v53 = vpop.permute.xlu1 %3683  ;;  %v3690_v27 = vpop.permute.xlu0 %3689 }
 0xf2c   : > { %v3711_v13 = vrot.slane %v3684_v53, %v8242_v62  ;;  %v3719_v48 = vrot.slane %v3690_v27, %v8242_v62 }
 0xf2e   : > { %v3733_v36 = vsel %vm868_vm4, %v3711_v13, %v3732_v11 }
 0xf2f   : > { %v3687_v7 = vpop.permute.xlu1 %3686 }
 0xf30   : > { %v3715_v38 = vrot.slane %v3687_v7, %v8242_v62 }
 0xf32   : > { %v3734_v15 = vsel %vm870_vm5, %v3715_v38, %v3733_v36 }
 0xf3a   : > { %v4148_v60 = vpop.permute.xlu0 %4147  ;;  %v4145_v55 = vpop.permute.xlu1 %4144 }
 0xf3b   : > { %v4174_v56 = vrot.slane %v4148_v60, %v8242_v62  ;;  %v4170_v21 = vrot.slane %v4145_v55, %v8242_v62 }
 0xf3d   : > { %v4199_v43 = vsel %vm866_vm3, %v4174_v56, %v4170_v21 }
 0xf3e   : > { %v4151_v63 = vpop.permute.xlu0 %4150  ;;  %v3693_v39 = vpop.permute.xlu1 %3692 }
 0xf3f   : > { %v4178_v12 = vrot.slane %v4151_v63, %v8242_v62  ;;  %v3723_v46 = vrot.slane %v3693_v39, %v8242_v62  ;;  %v3735_v39 = vsel %vm872_vm6, %v3719_v48, %v3734_v15  ;;  %v10344_v15 = vld [vmem:[#allocation20_spill] sm:$0xff] }
 0xf41   : > { %v4200_v53 = vsel %vm868_vm4, %v4178_v12, %v4199_v43 }
 0xf42   : > { %v9339_v30 = vpop.permute.xlu0 %4614  ;;  %v9341_v41 = vpop.permute.xlu1 %4611 }
 0xf43   : > { %v4641_v28 = vrot.slane %v9339_v30, %v8242_v62  ;;  %v4637_v29 = vrot.slane %v9341_v41, %v8242_v62 }
 0xf45   : > { %v4666_v19 = vsel %vm866_vm3, %v4641_v28, %v4637_v29 }
 0xf46   : > { %v4154_v32 = vpop.permute.xlu0 %4153  ;;  %v9343_v4 = vpop.permute.xlu1 %3695 }
 0xf47   : > { %v4182_v51 = vrot.slane %v4154_v32, %v8242_v62  ;;  %v3727_v14 = vrot.slane %v9343_v4, %v8242_v62  ;;  %v3736_v4 = vsel %vm874_vm7, %v3723_v46, %v3735_v39 }
 0xf49   : > { %v4201_v30 = vsel %vm870_vm5, %v4182_v51, %v4200_v53  ;;  %v3737_v17 = vsel %vm876_vm8, %v3727_v14, %v3736_v4  ;;  %v4779_v53 = vld [vmem:[#allocation7] sm:$0xff] }
 0xf4a   : > { %v9345_v2 = vpop.permute.xlu0 %3698  ;;  %v9347_v47 = vpop.permute.xlu1 %4617 }
 0xf4b   : > { %v3731_v27 = vrot.slane %v9345_v2, %v8242_v62  ;;  %v4645_v7 = vrot.slane %v9347_v47, %v8242_v62 }
 0xf4d   : > { %v3738_v58 = vsel %vm878_vm9, %v3731_v27, %v3737_v17  ;;  %v4780_v27 = vld [vmem:[#allocation7 + $0x8] sm:$0xff] }
 0xf4e   : > { %v9353_v23 = vpop.permute.xlu0 %4620  ;;  %v4157_v44 = vpop.permute.xlu1 %4156 }
 0xf4f   : > { %v4186_v35 = vrot.slane %v4157_v44, %v8242_v62  ;;  %v4649_v41 = vrot.slane %v9353_v23, %v8242_v62  ;;  %v4667_v44 = vsel %vm868_vm4, %v4645_v7, %v4666_v19  ;;  %v4781_v7 = vld [vmem:[#allocation7 + $0x10] sm:$0xff]  ;;  %v7570_v19 = vld [vmem:[%s10214_s11] ss:$0 sm:$0xff] }
 0xf51   : > { %v4202_v2 = vsel %vm872_vm6, %v4186_v35, %v4201_v30 }
 0xf52   : > { %v9360_v50 = vpop.permute.xlu0 %4623  ;;  %v4160_v25 = vpop.permute.xlu1 %4159 }
 0xf53   : > { %v4190_v61 = vrot.slane %v4160_v25, %v8242_v62  ;;  %v4653_v47 = vrot.slane %v9360_v50, %v8242_v62  ;;  %v4668_v50 = vsel %vm870_vm5, %v4649_v41, %v4667_v44  ;;  %v10346_v44 = vld [vmem:[#allocation10_spill] sm:$0xff] }
 0xf55   : > { %v4203_v26 = vsel %vm874_vm7, %v4190_v61, %v4202_v2  ;;  %v4669_v49 = vsel %vm872_vm6, %v4653_v47, %v4668_v50  ;;  %v7569_v2 = vld [vmem:[%s10213_s10] ss:$0 sm:$0xff] }
 0xf56   : > { %v4627_v1 = vpop.permute.xlu0 %4626  ;;  %v4163_v57 = vpop.permute.xlu1 %4162 }
 0xf57   : > { %v4194_v60 = vrot.slane %v4163_v57, %v8242_v62  ;;  %v4657_v23 = vrot.slane %v4627_v1, %v8242_v62  ;;  %v10340_v1 = vmov 0.0|0.0  }
 0xf59   : > { %v4204_v40 = vsel %vm876_vm8, %v4194_v60, %v4203_v26  ;;  %v4670_v31 = vsel %vm874_vm7, %v4657_v23, %v4669_v49  ;;  %v7257_v60 = vpack.c.bf16 %v4780_v27, %v4779_v53 }
 0xf5a   : > { %v4630_v3 = vpop.permute.xlu0 %4629  ;;  %v4166_v59 = vpop.permute.xlu1 %4165 }
 0xf5b   : > { %v4198_v32 = vrot.slane %v4166_v59, %v8242_v62  ;;  %v4661_v0 = vrot.slane %v4630_v3, %v8242_v62 }
 0xf5d   : > { %v4205_v33 = vsel %vm878_vm9, %v4198_v32, %v4204_v40  ;;  %v4671_v42 = vsel %vm876_vm8, %v4661_v0, %v4670_v31 }
 0xf5e   : > { %v3265_v55 = vpop.permute.xlu0 %3264  ;;  %v4633_v63 = vpop.permute.xlu1 %4632 }
 0xf5f   : > { %7186 = vmatpush3.msra.mxu1 %v3265_v55  ;;  %v4665_v25 = vrot.slane %v4633_v63, %v8242_v62  ;;  %v4782_v55 = vld [vmem:[#allocation7 + $0x18] sm:$0xff] }
 0xf60   : > { %7188 = vmatmul.mubr.msk.f32.vlgmr.msra.gmra.mrb[8].mxu1 %vm702_vm2, %v3263_v54  ;;  %7190 = vmatprep.subr.mxu1 %v10339_v8  ;;  %v7260_v63 = vpack.c.bf16 %v4782_v55, %v4781_v7 }
 0xf61   : > { %7192 = vmatprep.mubr.msk.f32.mxu1 %vm7705_vm0, %v10339_v8  ;;  %v4672_v57 = vsel %vm878_vm9, %v4665_v25, %v4671_v42 }
 0xf62   : > { %v4207_v52 = vpop.permute.xlu0 %4206  ;;  %v3740_v37 = vpop.permute.xlu1 %3739 }
 0xf63   : > { %7191 = vmatpush3.msra.mxu1 %v3740_v37  ;;  %7196 = vmatpush3.msra.mxu0 %v4207_v52 }
 0xf64   : > { %7193 = vmatmul.mubr.msk.f32.vlgmr.msra.gmra.mrb[10].mxu1 %vm702_vm2, %v3738_v58  ;;  %7198 = vmatmul.mubr.msk.f32.vlgmr.msra.gmra.mrb[4].mxu0 %vm702_vm2, %v4205_v33 }
 0xf65   : > { %7200 = vmatprep.subr.mxu1 %v10339_v8  ;;  %7202 = vmatprep.mubr.msk.f32.mxu1 %vm7705_vm0, %v10339_v8 }
 0xf66   : > { %v4674_v34 = vpop.permute.xlu1 %4673  ;;  %7256 = vmatprep.subr.bf16.mxu0 %v10340_v1  ;;  %7213 = vmatprep.mubr.msk.f32.mxu0 %vm7705_vm0, %v10339_v8 }
 0xf67   : > { %7201 = vmatpush3.msra.mxu1 %v4674_v34  ;;  %7258 = vmatpush3.bf16.msra.mxu0 %v7257_v60 }
 0xf68   : > { %7203 = vmatmul.mubr.msk.f32.vlgmr.msra.gmra.mrb[12].mxu1 %vm702_vm2, %v4672_v57  ;;  %7216 = vmatprep.subr.mxu1 %v10339_v8 }
 0xf69   : > { %7218 = vmatprep.mubr.msk.f32.mxu1 %vm7705_vm0, %v10339_v8  ;;  %7259 = vmatprep.subr.bf16.mxu0 %v10340_v1 }
 0xf6b   : > { %7261 = vmatpush3.bf16.msra.mxu0 %v7260_v63 }
 0xf6c   : > { %7226 = vmatprep.subr.mxu0 %v10339_v8 }
0x1033   : > { %v3335_v13 = vpop.f32.mrb[8].mxu1 }
0x1034   : > { %v7189_v38 = vpop.f32.mrb[9].mxu1 }
0x1037   : > { %v3810_v56 = vpop.f32.mrb[10].mxu1  ;;  %v4277_v21 = vpop.f32.mrb[4].mxu0 }
0x1038   : > { %4749 = vrot.lane.b32.xlu0 %v3810_v56, %s10341_s26  ;;  %v7194_v16 = vpop.f32.mrb[11].mxu1  ;;  %4753 = vrot.lane.b32.xlu1 %v4277_v21, %s10342_s23  ;;  %v7199_v45 = vpop.f32.mrb[5].mxu0 }
0x103b   : > { %v4744_v11 = vpop.f32.mrb[12].mxu1 }
0x103c   : > { %4757 = vrot.lane.b32.xlu0 %v4744_v11, %s10343_s12  ;;  %v7204_v12 = vpop.f32.mrb[13].mxu1 }
0x10aa   : > { %v4750_v3 = vpop.permute.xlu0 %4749  ;;  %v4754_v48 = vpop.permute.xlu1 %4753 }
0x10ab   : > { %v4760_v59 = vsel %vm702_vm2, %v3335_v13, %v4750_v3 }
0x10ac   : > { %v4761_v36 = vsel %vm483_vm1, %v4760_v59, %v4754_v48 }
0x10ae   : > { %v4758_v51 = vpop.permute.xlu0 %4757 }
0x10af   : > { %v4762_v54 = vsel %vm2643_vm10, %v4761_v36, %v4758_v51  ;;  %v7096_v51 = vld [vmem:[%s10210_s7] ss:$0 sm:$0xff] }
0x10b0   : > { %v4763_v43 = vadd.f32 %v4762_v54, %v10344_v15 }
0x10b2   : > { %v4764_v46 = vsel %vm2645_vm11, %v4763_v43, 0.0 }
0x10b3   : > { %4765 = vadd.xlane.f32.xlu1 %v4764_v46 }
0x1140   : > { %v4766_v35 = vpop.xlane.xlu1 %4765 }
0x1141   : > { %v4767_v28 = vmul.f32 0.03125, %v4766_v35 }
0x1143   : > { %v4768_v29 = vsub.f32 %v4763_v43, %v4767_v28 }
0x1145   : > { %v4769_v14 = vmul.f32 %v4768_v29, %v4768_v29 }
0x1147   : > { %v4770_v61 = vsel %vm2645_vm11, %v4769_v14, 0.0 }
0x1148   : > { %4771 = vadd.xlane.f32.xlu0 %v4770_v61 }
0x11d5   : > { %v4772_v39 = vpop.xlane.xlu0 %4771 }
0x11d6   : > { %v4773_v30 = vmul.f32 0.03125, %v4772_v39 }
0x11d8   : > { %v4774_v41 = vadd.f32 1e-05, %v4773_v30 }
0x11da   : > { %7493 = vrsqrt.f32 %v4774_v41 }
0x11e4   : > { %v7494_v32 = vpop.eup %7493 }
0x11e5   : > { %v4776_v4 = vmul.f32 %v7494_v32, %v4768_v29 }
0x11e7   : > { %v4777_v47 = vmul.f32 %v7569_v2, %v4776_v4 }
0x11e9   : > { %v9453_v17 = vadd.f32 %v7570_v19, %v4777_v47 }
0x11eb   : > { %10345 = vst [vmem:[#allocation21_spill] sm:$0xff] %v9453_v17  ;;  %7214 = vmatmul.mubr.msk.f32.vlgmr.msra.gmra.mrb[6].mxu0 %vm2645_vm11, %v9453_v17 }
0x11ec   : > { %7228 = vmatprep.mubr.msk.f32.mxu0 %vm7705_vm0, %v10339_v8 }
0x12be   : > { %v9459_v26 = vpop.f32.mrb[6].mxu0 }
0x12bf   : > { %v7215_v23 = vpop.f32.mrb[7].mxu0  ;;  %v4864_v40 = vrot.slane %v9459_v26, %v10346_v44  ;;  %v4857_v0 = vcombine.high %v9459_v26, %v9459_v26 }
0x12c1   : > { %v4880_v52 = vrot.slane %v4864_v40, %v10346_v44  ;;  %v4872_v37 = vcombine.high %v4864_v40, %v4864_v40  ;;  %v4871_v58 = vrot.slane %v4857_v0, %v10346_v44 }
0x12c3   : > { %v4909_v50 = vrot.slane %v4880_v52, %v7956_v5  ;;  %v4894_v25 = vrot.slane %v4872_v37, %v10346_v44  ;;  %v4873_v33 = vcombine.high %v4871_v58, %v4871_v58  ;;  %v4902_v42 = vcombine.high %v4880_v52, %v4880_v52 }
0x12c4   : > { %v4887_v38 = vrot.slane %v4871_v58, %v10346_v44 }
0x12c5   : > { %4938 = vrot.lane.b32.xlu0 %v4909_v50, %s7708_s14  ;;  %v4913_v49 = vrot.slane %v4894_v25, %v7956_v5  ;;  %v4904_v31 = vcombine.high %v4894_v25, %v4894_v25  ;;  %v4901_v57 = vrot.slane %v4873_v33, %v10346_v44  ;;  %v4917_v13 = vrot.slane %v4902_v42, %v7956_v5 }
0x12c6   : > { %v4925_v16 = vrot.slane %v4887_v38, %v7956_v5  ;;  %v4903_v45 = vcombine.high %v4887_v38, %v4887_v38 }
0x12c7   : > { %4940 = vrot.lane.b32.xlu1 %v4913_v49, %s7708_s14  ;;  %v4921_v34 = vrot.slane %v4904_v31, %v7956_v5  ;;  %v4929_v56 = vrot.slane %v4901_v57, %v7956_v5  ;;  %v4905_v21 = vcombine.high %v4901_v57, %v4901_v57 }
0x12c8   : > { %v4933_v12 = vrot.slane %v4903_v45, %v7956_v5 }
0x12c9   : > { %4944 = vrot.lane.b32.xlu0 %v4921_v34, %s7708_s14  ;;  %v4937_v11 = vrot.slane %v4905_v21, %v7956_v5 }
0x12cb   : > { %4942 = vrot.lane.b32.xlu1 %v4917_v13, %s7708_s14 }
0x12cd   : > { %4948 = vrot.lane.b32.xlu0 %v4929_v56, %s7708_s14 }
0x12cf   : > { %4946 = vrot.lane.b32.xlu1 %v4925_v16, %s7708_s14 }
0x12d1   : > { %4952 = vrot.lane.b32.xlu0 %v4937_v11, %s7708_s14 }
0x12d3   : > { %4950 = vrot.lane.b32.xlu1 %v4933_v12, %s7708_s14 }
0x1337   : > { %v4939_v3 = vpop.permute.xlu0 %4938 }
0x1338   : > { %v4962_v59 = vadd.f32 %v4939_v3, %v9459_v26 }
0x1339   : > { %v4941_v48 = vpop.permute.xlu1 %4940 }
0x133a   : > { %v4970_v36 = vmul.f32 0.21, %v4962_v59  ;;  %v4963_v33 = vadd.f32 %v4941_v48, %v9459_v26 }
0x133b   : > { %v4945_v54 = vpop.permute.xlu0 %4944 }
0x133c   : > { %v4978_v15 = vmax.f32 %v4962_v59, %v4970_v36  ;;  %v4965_v43 = vadd.f32 %v4945_v54, %v9459_v26  ;;  %v4971_v49 = vmul.f32 0.21, %v4963_v33 }
0x133d   : > { %v4943_v46 = vpop.permute.xlu1 %4942 }
0x133e   : > { %v4993_v35 = vmul.f32 %v7096_v51, %v4978_v15  ;;  %v4973_v28 = vmul.f32 0.21, %v4965_v43  ;;  %v4964_v29 = vadd.f32 %v4943_v46, %v9459_v26  ;;  %v4979_v31 = vmax.f32 %v4963_v33, %v4971_v49 }
0x133f   : > { %v4949_v14 = vpop.permute.xlu0 %4948 }
0x1340   : > { %v4981_v61 = vmax.f32 %v4965_v43, %v4973_v28  ;;  %v4972_v53 = vmul.f32 0.21, %v4964_v29  ;;  %v4967_v27 = vadd.f32 %v4949_v14, %v9459_v26  ;;  %5452 = vrot.lane.b32.xlu1 %v4993_v35, %s7709_s19  ;;  %6386 = vrot.lane.b32.xlu0 %v4993_v35, %s7711_s15  ;;  %v4994_v42 = vmul.f32 %v7096_v51, %v4979_v31 }
0x1341   : > { %v4947_v7 = vpop.permute.xlu1 %4946  ;;  %v5001_v34 = vsel %vm702_vm2, %v4993_v35, 0.0 }
0x1342   : > { %v4996_v60 = vmul.f32 %v7096_v51, %v4981_v61  ;;  %v4980_v55 = vmax.f32 %v4964_v29, %v4972_v53  ;;  %v4975_v63 = vmul.f32 0.21, %v4967_v27  ;;  %v4966_v39 = vadd.f32 %v4947_v7, %v9459_v26 }
0x1343   : > { %v4953_v30 = vpop.permute.xlu0 %4952  ;;  %v5004_v57 = vsel %vm702_vm2, %v4994_v42, 0.0 }
0x1344   : > { %v4995_v41 = vmul.f32 %v7096_v51, %v4980_v55  ;;  %v4983_v32 = vmax.f32 %v4967_v27, %v4975_v63  ;;  %v4974_v4 = vmul.f32 0.21, %v4966_v39  ;;  %v4969_v2 = vadd.f32 %v4953_v30, %v9459_v26  ;;  %5919 = vrot.lane.b32.xlu1 %v4993_v35, %s7710_s30 }
0x1345   : > { %v4951_v47 = vpop.permute.xlu1 %4950  ;;  %v5010_v21 = vsel %vm702_vm2, %v4996_v60, 0.0 }
0x1346   : > { %v4998_v19 = vmul.f32 %v7096_v51, %v4983_v32  ;;  %v4982_v23 = vmax.f32 %v4966_v39, %v4974_v4  ;;  %v4977_v44 = vmul.f32 0.21, %v4969_v2  ;;  %v4968_v40 = vadd.f32 %v4951_v47, %v9459_v26  ;;  %6390 = vrot.lane.b32.xlu0 %v4995_v41, %s7711_s15 }
0x1347   : > { %v5007_v13 = vsel %vm702_vm2, %v4995_v41, 0.0 }
0x1348   : > { %v4997_v0 = vmul.f32 %v7096_v51, %v4982_v23  ;;  %v4985_v52 = vmax.f32 %v4969_v2, %v4977_v44  ;;  %v4976_v37 = vmul.f32 0.21, %v4968_v40  ;;  %v5016_v16 = vsel %vm702_vm2, %v4998_v19, 0.0 }
0x134a   : > { %v5000_v58 = vmul.f32 %v7096_v51, %v4985_v52  ;;  %v4984_v50 = vmax.f32 %v4968_v40, %v4976_v37  ;;  %5927 = vrot.lane.b32.xlu0 %v4997_v0, %s7710_s30  ;;  %v5013_v38 = vsel %vm702_vm2, %v4997_v0, 0.0 }
0x134c   : > { %v4999_v25 = vmul.f32 %v7096_v51, %v4984_v50  ;;  %v5022_v61 = vsel %vm702_vm2, %v5000_v58, 0.0 }
0x134e   : > { %v5019_v56 = vsel %vm702_vm2, %v4999_v25, 0.0 }
0x1368   : > { %5002 = vadd.xlane.f32.xlu1 %v5001_v34 }
0x1369   : > { %5005 = vadd.xlane.f32.xlu0 %v5004_v57 }
0x136d   : > { %5008 = vadd.xlane.f32.xlu0 %v5007_v13 }
0x1371   : > { %5014 = vadd.xlane.f32.xlu0 %v5013_v38 }
0x1379   : > { %5454 = vrot.lane.b32.xlu1 %v4994_v42, %s7709_s19 }
0x137d   : > { %5456 = vrot.lane.b32.xlu1 %v4995_v41, %s7709_s19 }
0x1381   : > { %5460 = vrot.lane.b32.xlu1 %v4997_v0, %s7709_s19 }
0x1385   : > { %5921 = vrot.lane.b32.xlu1 %v4994_v42, %s7710_s30 }
0x1387   : > { %5458 = vrot.lane.b32.xlu0 %v4996_v60, %s7709_s19 }
0x1389   : > { %5923 = vrot.lane.b32.xlu1 %v4995_v41, %s7710_s30 }
0x138b   : > { %5464 = vrot.lane.b32.xlu0 %v4999_v25, %s7709_s19 }
0x138d   : > { %6388 = vrot.lane.b32.xlu1 %v4994_v42, %s7711_s15 }
0x138f   : > { %5929 = vrot.lane.b32.xlu0 %v4998_v19, %s7710_s30 }
0x1391   : > { %6394 = vrot.lane.b32.xlu1 %v4997_v0, %s7711_s15 }
0x1393   : > { %5931 = vrot.lane.b32.xlu0 %v4999_v25, %s7710_s30 }
0x1395   : > { %5462 = vrot.lane.b32.xlu1 %v4998_v19, %s7709_s19 }
0x1399   : > { %5925 = vrot.lane.b32.xlu1 %v4996_v60, %s7710_s30 }
0x139d   : > { %6392 = vrot.lane.b32.xlu1 %v4996_v60, %s7711_s15 }
0x13a1   : > { %6396 = vrot.lane.b32.xlu1 %v4998_v19, %s7711_s15 }
0x13a5   : > { %6398 = vrot.lane.b32.xlu1 %v4999_v25, %s7711_s15 }
0x13b2   : > { %5020 = vadd.xlane.f32.xlu0 %v5019_v56  ;;  %v5453_v45 = vpop.permute.xlu1 %5452  ;;  %v6387_v11 = vpop.permute.xlu0 %6386 }
0x13b3   : > { %v5476_v12 = vsel %vm702_vm2, %v5453_v45, 0.0  ;;  %v6410_v51 = vsel %vm702_vm2, %v6387_v11, 0.0 }
0x13b6   : > { %v5920_v3 = vpop.permute.xlu1 %5919 }
0x13b7   : > { %v5943_v48 = vsel %vm702_vm2, %v5920_v3, 0.0  ;;  %v10347_v3 = vld [vmem:[#allocation13_spill] sm:$0xff] }
0x13b8   : > { %v6391_v59 = vpop.permute.xlu0 %6390 }
0x13b9   : > { %v6416_v53 = vsel %vm702_vm2, %v6391_v59, 0.0 }
0x13bc   : > { %v5928_v36 = vpop.permute.xlu0 %5927 }
0x13bd   : > { %v5955_v60 = vsel %vm702_vm2, %v5928_v36, 0.0 }
0x13c8   : > { %5933 = vrot.lane.b32.xlu0 %v5000_v58, %s7710_s30 }
0x13c9   : > { %5011 = vadd.xlane.f32.xlu1 %v5010_v21 }
0x13cc   : > { %6400 = vrot.lane.b32.xlu0 %v5000_v58, %s7711_s15 }
0x13cd   : > { %5017 = vadd.xlane.f32.xlu1 %v5016_v16 }
0x13de   : > { %5466 = vrot.lane.b32.xlu1 %v5000_v58, %s7709_s19 }
0x13eb   : > { %5477 = vadd.xlane.f32.xlu0 %v5476_v12 }
0x13ef   : > { %5944 = vadd.xlane.f32.xlu0 %v5943_v48 }
0x13f3   : > { %6411 = vadd.xlane.f32.xlu0 %v6410_v51  ;;  %v10348_v51 = vld [vmem:[#allocation14_spill] sm:$0xff] }
0x13f5   : > { %v9531_v54 = vpop.xlane.xlu1 %5002 }
0x13f6   : > { %v9533_v15 = vpop.xlane.xlu0 %5005  ;;  %v9562_v59 = vadd.f32 %v9531_v54, %v10347_v3 }
0x13f9   : > { %v5455_v43 = vpop.permute.xlu1 %5454 }
0x13fa   : > { %v9535_v46 = vpop.xlane.xlu0 %5008  ;;  %v5479_v7 = vsel %vm702_vm2, %v5455_v43, 0.0 }
0x13fd   : > { %v5457_v35 = vpop.permute.xlu1 %5456 }
0x13fe   : > { %v5482_v28 = vsel %vm702_vm2, %v5457_v35, 0.0  ;;  %v9538_v29 = vpop.xlane.xlu0 %5014  ;;  %v10349_v35 = vld [vmem:[#allocation17_spill] sm:$0xff] }
0x13ff   : > { %5483 = vadd.xlane.f32.xlu0 %v5482_v28 }
0x1401   : > { %v5461_v14 = vpop.permute.xlu1 %5460 }
0x1402   : > { %5023 = vadd.xlane.f32.xlu1 %v5022_v61  ;;  %v5459_v55 = vpop.permute.xlu0 %5458  ;;  %v5488_v39 = vsel %vm702_vm2, %v5461_v14, 0.0  ;;  %v10350_v14 = vld [vmem:[#allocation12_spill] sm:$0xff]  ;;  %v10351_v61 = vld [vmem:[#allocation15_spill] sm:$0xff] }
0x1403   : > { %6417 = vadd.xlane.f32.xlu0 %v6416_v53  ;;  %v5485_v30 = vsel %vm702_vm2, %v5459_v55, 0.0  ;;  %v9576_v54 = vadd.f32 %v9533_v15, %v10350_v14  ;;  %v9581_v53 = vadd.f32 %v9535_v46, %v10351_v61  ;;  %v10354_v46 = vld [vmem:[#allocation19_spill] sm:$0xff] }
0x1405   : > { %v5922_v27 = vpop.permute.xlu1 %5921 }
0x1406   : > { %5480 = vadd.xlane.f32.xlu1 %v5479_v7  ;;  %v5946_v32 = vsel %vm702_vm2, %v5922_v27, 0.0  ;;  %v5465_v47 = vpop.permute.xlu0 %5464  ;;  %v10352_v27 = vld [vmem:[#allocation16_spill] sm:$0xff] }
0x1407   : > { %5956 = vadd.xlane.f32.xlu0 %v5955_v60  ;;  %v5494_v37 = vsel %vm702_vm2, %v5465_v47, 0.0  ;;  %v9586_v7 = vadd.f32 %v9538_v29, %v10352_v27  ;;  %v10353_v60 = vld [vmem:[#allocation18_spill] sm:$0xff] }
0x1409   : > { %v5924_v63 = vpop.permute.xlu1 %5923 }
0x140a   : > { %5489 = vadd.xlane.f32.xlu1 %v5488_v39  ;;  %v5949_v2 = vsel %vm702_vm2, %v5924_v63, 0.0  ;;  %v5930_v40 = vpop.permute.xlu0 %5929 }
0x140b   : > { %5486 = vadd.xlane.f32.xlu0 %v5485_v30  ;;  %v5958_v25 = vsel %vm702_vm2, %v5930_v40, 0.0 }
0x140d   : > { %v6389_v41 = vpop.permute.xlu1 %6388 }
0x140e   : > { %5947 = vadd.xlane.f32.xlu1 %v5946_v32  ;;  %v6413_v23 = vsel %vm702_vm2, %v6389_v41, 0.0  ;;  %v5932_v33 = vpop.permute.xlu0 %5931 }
0x140f   : > { %v5961_v42 = vsel %vm702_vm2, %v5932_v33, 0.0 }
0x1411   : > { %v6395_v4 = vpop.permute.xlu1 %6394 }
0x1412   : > { %5950 = vadd.xlane.f32.xlu1 %v5949_v2  ;;  %v6422_v52 = vsel %vm702_vm2, %v6395_v4, 0.0 }
0x1415   : > { %v5463_v19 = vpop.permute.xlu1 %5462 }
0x1416   : > { %6414 = vadd.xlane.f32.xlu1 %v6413_v23  ;;  %v5491_v44 = vsel %vm702_vm2, %v5463_v19, 0.0 }
0x1417   : > { %5492 = vadd.xlane.f32.xlu0 %v5491_v44 }
0x1419   : > { %v5926_v0 = vpop.permute.xlu1 %5925 }
0x141a   : > { %6423 = vadd.xlane.f32.xlu1 %v6422_v52  ;;  %v5952_v50 = vsel %vm702_vm2, %v5926_v0, 0.0 }
0x141b   : > { %5495 = vadd.xlane.f32.xlu0 %v5494_v37 }
0x141d   : > { %v6393_v58 = vpop.permute.xlu1 %6392 }
0x141e   : > { %5953 = vadd.xlane.f32.xlu1 %v5952_v50  ;;  %v6419_v31 = vsel %vm702_vm2, %v6393_v58, 0.0 }
0x141f   : > { %5959 = vadd.xlane.f32.xlu0 %v5958_v25 }
0x1421   : > { %v6397_v49 = vpop.permute.xlu1 %6396 }
0x1422   : > { %6420 = vadd.xlane.f32.xlu1 %v6419_v31  ;;  %v6425_v34 = vsel %vm702_vm2, %v6397_v49, 0.0 }
0x1423   : > { %5962 = vadd.xlane.f32.xlu0 %v5961_v42 }
0x1425   : > { %v6399_v57 = vpop.permute.xlu1 %6398 }
0x1426   : > { %6426 = vadd.xlane.f32.xlu1 %v6425_v34  ;;  %v6428_v13 = vsel %vm702_vm2, %v6399_v57, 0.0 }
0x142a   : > { %6429 = vadd.xlane.f32.xlu1 %v6428_v13 }
0x143f   : > { %v5021_v38 = vpop.xlane.xlu0 %5020 }
0x1440   : > { %v9590_v55 = vadd.f32 %v5021_v38, %v10353_v60 }
0x1443   : > { %v5934_v56 = vpop.permute.xlu0 %5933 }
0x1444   : > { %v5964_v21 = vsel %vm702_vm2, %v5934_v56, 0.0 }
0x1445   : > { %5965 = vadd.xlane.f32.xlu0 %v5964_v21 }
0x1447   : > { %v6401_v16 = vpop.permute.xlu0 %6400 }
0x1448   : > { %v6431_v45 = vsel %vm702_vm2, %v6401_v16, 0.0 }
0x1449   : > { %6432 = vadd.xlane.f32.xlu0 %v6431_v45 }
0x1456   : > { %v5012_v11 = vpop.xlane.xlu1 %5011 }
0x1457   : > { %v9567_v43 = vadd.f32 %v5012_v11, %v10348_v51 }
0x145a   : > { %v5018_v12 = vpop.xlane.xlu1 %5017 }
0x145b   : > { %v9571_v28 = vadd.f32 %v5018_v12, %v10349_v35 }
0x145e   : > { %v5467_v48 = vpop.permute.xlu1 %5466 }
0x145f   : > { %5042 = vperm.xlu0 %7346, %v9562_v59   ;;  %v5497_v36 = vsel %vm702_vm2, %v5467_v48, 0.0 }
0x1460   : > { %5498 = vadd.xlane.f32.xlu1 %v5497_v36 }
0x1463   : > { %5051 = vperm.xlu0 %7346, %v9567_v43  }
0x1467   : > { %5057 = vperm.xlu0 %7346, %v9571_v28  }
0x1471   : > { %5045 = vperm.xlu1 %7345, %v9576_v54  }
0x1475   : > { %5048 = vperm.xlu1 %7345, %v9581_v53  }
0x1478   : > { %v5478_v15 = vpop.xlane.xlu0 %5477 }
0x1479   : > { %5054 = vperm.xlu1 %7345, %v9586_v7   ;;  %v9598_v29 = vadd.f32 %v5478_v15, %v10347_v3 }
0x147c   : > { %v5945_v63 = vpop.xlane.xlu0 %5944 }
0x147d   : > { %5060 = vperm.xlu1 %7345, %v9590_v55   ;;  %v9606_v23 = vadd.f32 %v5945_v63, %v10347_v3 }
0x1480   : > { %v6412_v39 = vpop.xlane.xlu0 %6411 }
0x1481   : > { %v9614_v52 = vadd.f32 %v6412_v39, %v10347_v3 }
0x148c   : > { %v5484_v30 = vpop.xlane.xlu0 %5483 }
0x148d   : > { %v9609_v44 = vadd.f32 %v5484_v30, %v10351_v61 }
0x148f   : > { %v5024_v41 = vpop.xlane.xlu1 %5023 }
0x1490   : > { %v9594_v32 = vadd.f32 %v5024_v41, %v10354_v46  ;;  %v6418_v2 = vpop.xlane.xlu0 %6417 }
0x1491   : > { %v9622_v50 = vadd.f32 %v6418_v2, %v10351_v61 }
0x1492   : > { %5063 = vperm.xlu0 %7346, %v9594_v32  }
0x1493   : > { %v5481_v4 = vpop.xlane.xlu1 %5480 }
0x1494   : > { %v9601_v47 = vadd.f32 %v5481_v4, %v10350_v14  ;;  %v5957_v40 = vpop.xlane.xlu0 %5956 }
0x1495   : > { %v9630_v31 = vadd.f32 %v5957_v40, %v10352_v27 }
0x1496   : > { %5520 = vperm.xlu1 %7345, %v9601_v47   ;;  %5517 = vperm.xlu0 %7346, %v9598_v29  }
0x1497   : > { %v5490_v19 = vpop.xlane.xlu1 %5489 }
0x1498   : > { %v9617_v37 = vadd.f32 %v5490_v19, %v10352_v27  ;;  %v5487_v25 = vpop.xlane.xlu0 %5486 }
0x1499   : > { %v9638_v13 = vadd.f32 %v5487_v25, %v10348_v51 }
0x149a   : > { %5984 = vperm.xlu0 %7346, %v9606_v23   ;;  %5523 = vperm.xlu1 %7345, %v9609_v44  }
0x149b   : > { %v5948_v0 = vpop.xlane.xlu1 %5947 }
0x149c   : > { %v9625_v33 = vadd.f32 %v5948_v0, %v10350_v14 }
0x149e   : > { %6451 = vperm.xlu0 %7346, %v9614_v52   ;;  %5529 = vperm.xlu1 %7345, %v9617_v37  }
0x149f   : > { %v5951_v58 = vpop.xlane.xlu1 %5950 }
0x14a0   : > { %v9633_v42 = vadd.f32 %v5951_v58, %v10351_v61 }
0x14a2   : > { %5987 = vperm.xlu1 %7345, %v9625_v33   ;;  %6457 = vperm.xlu0 %7346, %v9622_v50  }
0x14a3   : > { %v6415_v49 = vpop.xlane.xlu1 %6414 }
0x14a4   : > { %v5493_v34 = vpop.xlane.xlu0 %5492  ;;  %v9641_v38 = vadd.f32 %v6415_v49, %v10350_v14 }
0x14a5   : > { %v9646_v16 = vadd.f32 %v5493_v34, %v10349_v35 }
0x14a6   : > { %5990 = vperm.xlu1 %7345, %v9633_v42   ;;  %5996 = vperm.xlu0 %7346, %v9630_v31  }
0x14a7   : > { %v6424_v57 = vpop.xlane.xlu1 %6423 }
0x14a8   : > { %v5496_v56 = vpop.xlane.xlu0 %5495  ;;  %v9649_v45 = vadd.f32 %v6424_v57, %v10352_v27 }
0x14a9   : > { %v9654_v3 = vadd.f32 %v5496_v56, %v10353_v60 }
0x14aa   : > { %6454 = vperm.xlu1 %7345, %v9641_v38   ;;  %5526 = vperm.xlu0 %7346, %v9638_v13   ;;  %10355 = vst [vmem:[#allocation25_spill] sm:$0xff] %v9649_v45 }
0x14ab   : > { %v5954_v21 = vpop.xlane.xlu1 %5953 }
0x14ac   : > { %v5960_v11 = vpop.xlane.xlu0 %5959  ;;  %v9657_v48 = vadd.f32 %v5954_v21, %v10348_v51 }
0x14ad   : > { %v9662_v36 = vadd.f32 %v5960_v11, %v10349_v35 }
0x14ae   : > { %6463 = vperm.xlu1 %7345, %v9649_v45   ;;  %5532 = vperm.xlu0 %7346, %v9646_v16  }
0x14af   : > { %v6421_v12 = vpop.xlane.xlu1 %6420  ;;  %10356 = vst [vmem:[#allocation22_spill] sm:$0xff] %v9662_v36 }
0x14b0   : > { %v9665_v14 = vadd.f32 %v6421_v12, %v10348_v51  ;;  %v5963_v61 = vpop.xlane.xlu0 %5962 }
0x14b1   : > { %v9670_v15 = vadd.f32 %v5963_v61, %v10353_v60 }
0x14b2   : > { %5993 = vperm.xlu1 %7345, %v9657_v48   ;;  %5535 = vperm.xlu0 %7346, %v9654_v3  }
0x14b3   : > { %v6427_v27 = vpop.xlane.xlu1 %6426  ;;  %10357 = vst [vmem:[#allocation23_spill] sm:$0xff] %v9670_v15 }
0x14b4   : > { %v9673_v63 = vadd.f32 %v6427_v27, %v10349_v35 }
0x14b6   : > { %6460 = vperm.xlu1 %7345, %v9665_v14   ;;  %5999 = vperm.xlu0 %7346, %v9662_v36   ;;  %10358 = vst [vmem:[#allocation11_spill] sm:$0xff] %v9673_v63 }
0x14b7   : > { %v6430_v4 = vpop.xlane.xlu1 %6429 }
0x14b8   : > { %v9690_v19 = vadd.f32 %v6430_v4, %v10353_v60 }
0x14ba   : > { %6466 = vperm.xlu1 %7345, %v9673_v63   ;;  %6002 = vperm.xlu0 %7346, %v9670_v15   ;;  %10361 = vst [vmem:[#allocation10_spill] sm:$0xff] %v9690_v19 }
0x14d2   : > { %v5966_v39 = vpop.xlane.xlu0 %5965 }
0x14d3   : > { %v9678_v51 = vadd.f32 %v5966_v39, %v10354_v46 }
0x14d5   : > { %10359 = vst [vmem:[#allocation24_spill] sm:$0xff] %v9678_v51  ;;  %6005 = vperm.xlu0 %7346, %v9678_v51  }
0x14d6   : > { %v6433_v30 = vpop.xlane.xlu0 %6432 }
0x14d7   : > { %v9682_v41 = vadd.f32 %v6433_v30, %v10354_v46 }
0x14d9   : > { %10360 = vst [vmem:[#allocation20_spill] sm:$0xff] %v9682_v41  ;;  %6472 = vperm.xlu0 %7346, %v9682_v41  }
0x14de   : > { %v5043_v58 = vpop.permute.xlu0 %5042 }
0x14df   : > { %v5068_v56 = vrot.slane %v5043_v58, %v8242_v62 }
0x14e2   : > { %v5052_v34 = vpop.permute.xlu0 %5051 }
0x14e3   : > { %v5080_v11 = vrot.slane %v5052_v34, %v8242_v62 }
0x14e6   : > { %v5058_v61 = vpop.permute.xlu0 %5057 }
0x14e7   : > { %v5088_v4 = vrot.slane %v5058_v61, %v8242_v62 }
0x14ed   : > { %v5499_v2 = vpop.xlane.xlu1 %5498 }
0x14ee   : > { %v9686_v35 = vadd.f32 %v5499_v2, %v10354_v46 }
0x14f0   : > { %5538 = vperm.xlu1 %7345, %v9686_v35  }
0x14f1   : > { %v5046_v40 = vpop.permute.xlu1 %5045 }
0x14f2   : > { %v5072_v25 = vrot.slane %v5046_v40, %v8242_v62 }
0x14f4   : > { %6469 = vperm.xlu1 %7345, %v9690_v19   ;;  %v5097_v46 = vsel %vm866_vm3, %v5072_v25, %v5068_v56 }
0x14f5   : > { %v5049_v0 = vpop.permute.xlu1 %5048 }
0x14f6   : > { %v5076_v57 = vrot.slane %v5049_v0, %v8242_v62 }
0x14f8   : > { %v5098_v21 = vsel %vm868_vm4, %v5076_v57, %v5097_v46 }
0x14f9   : > { %v5055_v49 = vpop.permute.xlu1 %5054  ;;  %v5099_v27 = vsel %vm870_vm5, %v5080_v11, %v5098_v21 }
0x14fa   : > { %v5084_v60 = vrot.slane %v5055_v49, %v8242_v62 }
0x14fc   : > { %v5100_v39 = vsel %vm872_vm6, %v5084_v60, %v5099_v27 }
0x14fd   : > { %v5061_v12 = vpop.permute.xlu1 %5060  ;;  %v5101_v0 = vsel %vm874_vm7, %v5088_v4, %v5100_v39 }
0x14fe   : > { %v5092_v30 = vrot.slane %v5061_v12, %v8242_v62 }
0x1500   : > { %v5102_v58 = vsel %vm876_vm8, %v5092_v30, %v5101_v0 }
0x1511   : > { %v5064_v2 = vpop.permute.xlu0 %5063 }
0x1512   : > { %v5096_v40 = vrot.slane %v5064_v2, %v8242_v62 }
0x1514   : > { %v5103_v25 = vsel %vm878_vm9, %v5096_v40, %v5102_v58 }
0x1515   : > { %v5105_v49 = vsel %vm702_vm2, %v5103_v25, -inf  ;;  %v5518_v34 = vpop.permute.xlu0 %5517  ;;  %v5521_v56 = vpop.permute.xlu1 %5520 }
0x1518   : > { %5106 = vmax.xlane.f32.xlu1 %v5105_v49 }
0x1519   : > { %v5985_v57 = vpop.permute.xlu0 %5984  ;;  %v5524_v21 = vpop.permute.xlu1 %5523 }
0x151a   : > { %v6010_v49 = vrot.slane %v5985_v57, %v8242_v62 }
0x151d   : > { %v6452_v46 = vpop.permute.xlu0 %6451  ;;  %v5530_v11 = vpop.permute.xlu1 %5529 }
0x1521   : > { %v6458_v60 = vpop.permute.xlu0 %6457  ;;  %v5988_v61 = vpop.permute.xlu1 %5987 }
0x1522   : > { %v6014_v58 = vrot.slane %v5988_v61, %v8242_v62 }
0x1524   : > { %v6039_v41 = vsel %vm866_vm3, %v6014_v58, %v6010_v49 }
0x1525   : > { %v5997_v12 = vpop.permute.xlu0 %5996  ;;  %v5991_v2 = vpop.permute.xlu1 %5990 }
0x1526   : > { %v6018_v25 = vrot.slane %v5991_v2, %v8242_v62  ;;  %v6026_v45 = vrot.slane %v5997_v12, %v8242_v62  ;;  %v5543_v12 = vrot.slane %v5518_v34, %v8242_v62 }
0x1528   : > { %v6040_v51 = vsel %vm868_vm4, %v6018_v25, %v6039_v41 }
0x1529   : > { %v5527_v27 = vpop.permute.xlu0 %5526  ;;  %v6455_v39 = vpop.permute.xlu1 %6454 }
0x152d   : > { %v5533_v17 = vpop.permute.xlu0 %5532  ;;  %v6464_v30 = vpop.permute.xlu1 %6463 }
0x1531   : > { %v5536_v4 = vpop.permute.xlu0 %5535  ;;  %v5994_v40 = vpop.permute.xlu1 %5993 }
0x1532   : > { %v6022_v1 = vrot.slane %v5994_v40, %v8242_v62 }
0x1534   : > { %v6041_v63 = vsel %vm870_vm5, %v6022_v1, %v6040_v51  ;;  %v5547_v51 = vrot.slane %v5521_v56, %v8242_v62  ;;  %v5559_v56 = vrot.slane %v5530_v11, %v8242_v62 }
0x1535   : > { %v6000_v0 = vpop.permute.xlu0 %5999  ;;  %v6042_v61 = vsel %vm872_vm6, %v6026_v45, %v6041_v63  ;;  %v6461_v1 = vpop.permute.xlu1 %6460  ;;  %v5555_v45 = vrot.slane %v5527_v27, %v8242_v62 }
0x1536   : > { %v6030_v15 = vrot.slane %v6000_v0, %v8242_v62  ;;  %v5572_v63 = vsel %vm866_vm3, %v5547_v51, %v5543_v12  ;;  %v6477_v0 = vrot.slane %v6452_v46, %v8242_v62  ;;  %v6489_v27 = vrot.slane %v6461_v1, %v8242_v62 }
0x1538   : > { %v6043_v57 = vsel %vm874_vm7, %v6030_v15, %v6042_v61  ;;  %v6481_v15 = vrot.slane %v6455_v39, %v8242_v62  ;;  %v6485_v39 = vrot.slane %v6458_v60, %v8242_v62 }
0x1539   : > { %v6003_v19 = vpop.permute.xlu0 %6002  ;;  %v6467_v25 = vpop.permute.xlu1 %6466 }
0x153a   : > { %v6034_v36 = vrot.slane %v6003_v19, %v8242_v62  ;;  %v5551_v19 = vrot.slane %v5524_v21, %v8242_v62  ;;  %v6506_v34 = vsel %vm866_vm3, %v6481_v15, %v6477_v0  ;;  %v5567_v21 = vrot.slane %v5536_v4, %v8242_v62 }
0x153b   : > { %v6497_v11 = vrot.slane %v6467_v25, %v8242_v62  ;;  %v6493_v4 = vrot.slane %v6464_v30, %v8242_v62 }
0x153c   : > { %v6044_v58 = vsel %vm876_vm8, %v6034_v36, %v6043_v57  ;;  %v5573_v36 = vsel %vm868_vm4, %v5551_v19, %v5572_v63 }
0x153d   : > { %v5574_v61 = vsel %vm870_vm5, %v5555_v45, %v5573_v36 }
0x153e   : > { %v5575_v57 = vsel %vm872_vm6, %v5559_v56, %v5574_v61 }
0x1554   : > { %v6006_v2 = vpop.permute.xlu0 %6005 }
0x1555   : > { %v6038_v40 = vrot.slane %v6006_v2, %v8242_v62  ;;  %v5563_v2 = vrot.slane %v5533_v17, %v8242_v62 }
0x1557   : > { %v6045_v49 = vsel %vm878_vm9, %v6038_v40, %v6044_v58  ;;  %v5576_v46 = vsel %vm874_vm7, %v5563_v2, %v5575_v57  ;;  %v6507_v58 = vsel %vm868_vm4, %v6485_v39, %v6506_v34 }
0x1558   : > { %v6047_v41 = vsel %vm702_vm2, %v6045_v49, -inf  ;;  %v6508_v17 = vsel %vm870_vm5, %v6489_v27, %v6507_v58  ;;  %v6473_v1 = vpop.permute.xlu0 %6472 }
0x1559   : > { %6048 = vmax.xlane.f32.xlu0 %v6047_v41  ;;  %v5577_v41 = vsel %vm876_vm8, %v5567_v21, %v5576_v46  ;;  %v6509_v19 = vsel %vm872_vm6, %v6493_v4, %v6508_v17  ;;  %v6505_v63 = vrot.slane %v6473_v1, %v8242_v62 }
0x155a   : > { %v6510_v15 = vsel %vm874_vm7, %v6497_v11, %v6509_v19 }
0x156f   : > { %v5539_v40 = vpop.permute.xlu1 %5538 }
0x1570   : > { %v5571_v49 = vrot.slane %v5539_v40, %v8242_v62 }
0x1572   : > { %v5578_v60 = vsel %vm878_vm9, %v5571_v49, %v5577_v41 }
0x1573   : > { %v6470_v51 = vpop.permute.xlu1 %6469  ;;  %v5580_v12 = vsel %vm702_vm2, %v5578_v60, -inf }
0x1574   : > { %v6501_v45 = vrot.slane %v6470_v51, %v8242_v62  ;;  %5581 = vmax.xlane.f32.xlu1 %v5580_v12 }
0x1576   : > { %v6511_v36 = vsel %vm876_vm8, %v6501_v45, %v6510_v15 }
0x1577   : > { %v6512_v0 = vsel %vm878_vm9, %v6505_v63, %v6511_v36 }
0x1578   : > { %v6514_v30 = vsel %vm702_vm2, %v6512_v0, -inf }
0x1579   : > { %6515 = vmax.xlane.f32.xlu0 %v6514_v30 }
0x1585   : > { %5369 = vrot.lane.b32.xlu1 %v9459_v26, %s7708_s14  ;;  %s10377_s14 = sld [smem:[#allocation26_spill]] }
0x158b   : > { %s476_s19 = scalar_lea.vmem %s10377_s14, %s10376_s22 }
0x15a5   : > { %v5107_v25 = vpop.xlane.xlu1 %5106 }
0x15a6   : > { %v5112_v61 = vrot.slane %v5107_v25, %v7956_v5  ;;  %v5116_v2 = vrot.slane %v5107_v25, %v7959_v6  ;;  %v5120_v56 = vrot.slane %v5107_v25, %v7970_v10  ;;  %v5124_v39 = vrot.slane %v5107_v25, %v7967_v9 }
0x15a7   : > { %v5128_v46 = vrot.slane %v5107_v25, %v7977_v18  ;;  %v5132_v17 = vrot.slane %v5107_v25, %v7985_v20 }
0x15a8   : > { %v5149_v34 = vsub.f32 %v9562_v59, %v5112_v61  ;;  %v5150_v21 = vsub.f32 %v9576_v54, %v5116_v2  ;;  %v5151_v57 = vsub.f32 %v9581_v53, %v5120_v56  ;;  %v5152_v58 = vsub.f32 %v9567_v43, %v5124_v39 }
0x15a9   : > { %v5153_v11 = vsub.f32 %v9586_v7, %v5128_v46  ;;  %v5136_v53 = vrot.slane %v5107_v25, %v7989_v22  ;;  %v5154_v41 = vsub.f32 %v9571_v28, %v5132_v17  ;;  %v5140_v43 = vrot.slane %v5107_v25, %v7993_v24 }
0x15aa   : > { %v5157_v27 = vmul.f32 1.442695, %v5149_v34  ;;  %v5159_v40 = vmul.f32 1.442695, %v5150_v21  ;;  %v5161_v49 = vmul.f32 1.442695, %v5151_v57 }
0x15ab   : > { %v5163_v59 = vmul.f32 1.442695, %v5152_v58  ;;  %v5165_v4 = vmul.f32 1.442695, %v5153_v11  ;;  %v5155_v7 = vsub.f32 %v9590_v55, %v5136_v53  ;;  %v5167_v60 = vmul.f32 1.442695, %v5154_v41 }
0x15ac   : > { %7495 = vpow2.f32 %v5157_v27  ;;  %v5156_v12 = vsub.f32 %v9594_v32, %v5140_v43 }
0x15ad   : > { %7497 = vpow2.f32 %v5159_v40  ;;  %v5169_v28 = vmul.f32 1.442695, %v5155_v7 }
0x15ae   : > { %7499 = vpow2.f32 %v5161_v49  ;;  %v5171_v45 = vmul.f32 1.442695, %v5156_v12 }
0x15af   : > { %7501 = vpow2.f32 %v5163_v59 }
0x15b0   : > { %7503 = vpow2.f32 %v5165_v4 }
0x15b1   : > { %7505 = vpow2.f32 %v5167_v60 }
0x15b2   : > { %7507 = vpow2.f32 %v5169_v28 }
0x15b3   : > { %7509 = vpow2.f32 %v5171_v45 }
0x15b6   : > { %v9770_v54 = vpop.eup %7495 }
0x15b7   : > { %5182 = vperm.xlu0 %7346, %v9770_v54   ;;  %v9775_v1 = vpop.eup %7497 }
0x15b8   : > { %v9780_v51 = vpop.eup %7499 }
0x15b9   : > { %v9784_v19 = vpop.eup %7501 }
0x15ba   : > { %v9787_v15 = vpop.eup %7503 }
0x15bb   : > { %5185 = vperm.xlu0 %7346, %v9775_v1   ;;  %v9790_v55 = vpop.eup %7505 }
0x15bc   : > { %v9793_v63 = vpop.eup %7507 }
0x15bd   : > { %v9796_v32 = vpop.eup %7509 }
0x15bf   : > { %5188 = vperm.xlu0 %7346, %v9780_v51  }
0x15c3   : > { %5191 = vperm.xlu0 %7346, %v9784_v19  }
0x15c7   : > { %5194 = vperm.xlu0 %7346, %v9787_v15  }
0x15cb   : > { %5197 = vperm.xlu0 %7346, %v9790_v55  }
0x15cf   : > { %5200 = vperm.xlu0 %7346, %v9793_v63  }
0x15d3   : > { %5203 = vperm.xlu0 %7346, %v9796_v32  }
0x15e6   : > { %v9801_v0 = vpop.xlane.xlu0 %6048 }
0x15e7   : > { %v6054_v39 = vrot.slane %v9801_v0, %v7956_v5  ;;  %v6058_v49 = vrot.slane %v9801_v0, %v7959_v6  ;;  %v6062_v59 = vrot.slane %v9801_v0, %v7970_v10 }
0x15e9   : > { %v6092_v53 = vsub.f32 %v9625_v33, %v6058_v49  ;;  %v6093_v43 = vsub.f32 %v9633_v42, %v6062_v59  ;;  %v6066_v42 = vrot.slane %v9801_v0, %v7967_v9  ;;  %v6074_v49 = vrot.slane %v9801_v0, %v7985_v20  ;;  %v10362_v59 = vld [vmem:[#allocation22_spill] sm:$0xff] }
0x15eb   : > { %v6101_v7 = vmul.f32 1.442695, %v6092_v53  ;;  %v6096_v53 = vsub.f32 %v10362_v59, %v6074_v49  ;;  %v10368_v49 = vld [vmem:[#allocation20_spill] sm:$0xff] }
0x1601   : > { %v9799_v36 = vpop.xlane.xlu1 %5581 }
0x1602   : > { %v5587_v30 = vrot.slane %v9799_v36, %v7956_v5  ;;  %v5591_v25 = vrot.slane %v9799_v36, %v7959_v6  ;;  %v5595_v61 = vrot.slane %v9799_v36, %v7970_v10  ;;  %v5599_v2 = vrot.slane %v9799_v36, %v7967_v9 }
0x1603   : > { %v5603_v56 = vrot.slane %v9799_v36, %v7977_v18  ;;  %v5607_v17 = vrot.slane %v9799_v36, %v7985_v20  ;;  %v5611_v33 = vrot.slane %v9799_v36, %v7989_v22 }
0x1604   : > { %v5624_v34 = vsub.f32 %v9598_v29, %v5587_v30  ;;  %v5625_v21 = vsub.f32 %v9601_v47, %v5591_v25  ;;  %v5626_v27 = vsub.f32 %v9609_v44, %v5595_v61  ;;  %v5627_v57 = vsub.f32 %v9638_v13, %v5599_v2 }
0x1605   : > { %v5370_v40 = vpop.permute.xlu1 %5369  ;;  %v5628_v29 = vsub.f32 %v9617_v37, %v5603_v56  ;;  %v6091_v44 = vsub.f32 %v9606_v23, %v6054_v39  ;;  %v5629_v37 = vsub.f32 %v9646_v16, %v5607_v17  ;;  %v6103_v30 = vmul.f32 1.442695, %v6093_v43 }
0x1606   : > { %v5632_v46 = vmul.f32 1.442695, %v5624_v34  ;;  %v5634_v58 = vmul.f32 1.442695, %v5625_v21  ;;  %7217 = vmatpush3.msra.mxu1 %v5370_v40  ;;  %v5636_v47 = vmul.f32 1.442695, %v5626_v27  ;;  %v9826_v11 = vpop.xlane.xlu0 %6515  ;;  %v5630_v61 = vsub.f32 %v9654_v3, %v5611_v33 }
0x1607   : > { %7221 = vmatprep.subr.mxu1 %v10339_v8  ;;  %v5638_v13 = vmul.f32 1.442695, %v5627_v57  ;;  %v5640_v41 = vmul.f32 1.442695, %v5628_v29  ;;  %v6099_v4 = vmul.f32 1.442695, %v6091_v44  ;;  %v6521_v23 = vrot.slane %v9826_v11, %v7956_v5 }
0x1608   : > { %7511 = vpow2.f32 %v5632_v46  ;;  %v6525_v60 = vrot.slane %v9826_v11, %v7959_v6  ;;  %v5642_v12 = vmul.f32 1.442695, %v5629_v37  ;;  %v6094_v21 = vsub.f32 %v9657_v48, %v6066_v42  ;;  %v10364_v33 = vld [vmem:[#allocation23_spill] sm:$0xff] }
0x1609   : > { %7513 = vpow2.f32 %v5634_v58  ;;  %v6558_v28 = vsub.f32 %v9614_v52, %v6521_v23  ;;  %v6529_v52 = vrot.slane %v9826_v11, %v7970_v10  ;;  %v6070_v3 = vrot.slane %v9801_v0, %v7977_v18 }
0x160a   : > { %7515 = vpow2.f32 %v5636_v47  ;;  %v6559_v25 = vsub.f32 %v9641_v38, %v6525_v60  ;;  %v5615_v38 = vrot.slane %v9799_v36, %v7993_v24  ;;  %v5644_v39 = vmul.f32 1.442695, %v5630_v61  ;;  %v10365_v61 = vld [vmem:[#allocation11_spill] sm:$0xff] }
0x160b   : > { %7517 = vpow2.f32 %v5638_v13  ;;  %v6566_v2 = vmul.f32 1.442695, %v6558_v28  ;;  %v6560_v57 = vsub.f32 %v9622_v50, %v6529_v52  ;;  %v6105_v48 = vmul.f32 1.442695, %v6094_v21 }
0x160c   : > { %7519 = vpow2.f32 %v5640_v41  ;;  %v6568_v27 = vmul.f32 1.442695, %v6559_v25  ;;  %v5631_v58 = vsub.f32 %v9686_v35, %v5615_v38  ;;  %v6533_v36 = vrot.slane %v9826_v11, %v7967_v9 }
0x160d   : > { %7521 = vpow2.f32 %v6099_v4  ;;  %v6095_v50 = vsub.f32 %v9630_v31, %v6070_v3  ;;  %v6570_v29 = vmul.f32 1.442695, %v6560_v57  ;;  %v6537_v17 = vrot.slane %v9826_v11, %v7977_v18  ;;  %v10367_v57 = vld [vmem:[#allocation10_spill] sm:$0xff] }
0x160e   : > { %7523 = vpow2.f32 %v6101_v7  ;;  %v5646_v35 = vmul.f32 1.442695, %v5631_v58  ;;  %v6561_v13 = vsub.f32 %v9665_v14, %v6533_v36  ;;  %v6078_v31 = vrot.slane %v9801_v0, %v7989_v22  ;;  %v10363_v14 = vld [vmem:[#allocation25_spill] sm:$0xff] }
0x160f   : > { %7525 = vpow2.f32 %v5642_v12  ;;  %v6107_v41 = vmul.f32 1.442695, %v6095_v50  ;;  %v6541_v23 = vrot.slane %v9826_v11, %v7985_v20  ;;  %v6562_v43 = vsub.f32 %v10363_v14, %v6537_v17 }
0x1610   : > { %7527 = vpow2.f32 %v6103_v30  ;;  %v6572_v7 = vmul.f32 1.442695, %v6561_v13  ;;  %v6082_v60 = vrot.slane %v9801_v0, %v7993_v24  ;;  %v6097_v12 = vsub.f32 %v10364_v33, %v6078_v31  ;;  %v10366_v0 = vld [vmem:[#allocation24_spill] sm:$0xff] }
0x1611   : > { %7529 = vpow2.f32 %v6566_v2  ;;  %v6109_v28 = vmul.f32 1.442695, %v6096_v53  ;;  %v6545_v25 = vrot.slane %v9826_v11, %v7989_v22  ;;  %v6563_v52 = vsub.f32 %v10365_v61, %v6541_v23 }
0x1612   : > { %v9840_v45 = vpop.eup %7511  ;;  %7531 = vpow2.f32 %v6568_v27  ;;  %v6574_v2 = vmul.f32 1.442695, %v6562_v43  ;;  %v6098_v21 = vsub.f32 %v10366_v0, %v6082_v60  ;;  %v6111_v38 = vmul.f32 1.442695, %v6097_v12 }
0x1613   : > { %v9842_v16 = vpop.eup %7513  ;;  %5657 = vperm.xlu1 %7345, %v9840_v45   ;;  %7533 = vpow2.f32 %v5644_v39  ;;  %v6549_v27 = vrot.slane %v9826_v11, %v7993_v24  ;;  %v6576_v58 = vmul.f32 1.442695, %v6563_v52 }
0x1614   : > { %5660 = vperm.xlu0 %7346, %v9842_v16   ;;  %v9852_v56 = vpop.eup %7515  ;;  %7535 = vpow2.f32 %v6105_v48  ;;  %v6564_v48 = vsub.f32 %v10367_v57, %v6545_v25  ;;  %v6113_v36 = vmul.f32 1.442695, %v6098_v21 }
0x1615   : > { %v9854_v34 = vpop.eup %7517  ;;  %7537 = vpow2.f32 %v6570_v29  ;;  %v6565_v50 = vsub.f32 %v10368_v49, %v6549_v27 }
0x1616   : > { %v9864_v40 = vpop.eup %7519  ;;  %7539 = vpow2.f32 %v5646_v35  ;;  %v6578_v11 = vmul.f32 1.442695, %v6564_v48 }
0x1617   : > { %5663 = vperm.xlu1 %7345, %v9852_v56   ;;  %v9866_v46 = vpop.eup %7521  ;;  %7541 = vpow2.f32 %v6107_v41  ;;  %v6580_v17 = vmul.f32 1.442695, %v6565_v50 }
0x1618   : > { %5666 = vperm.xlu0 %7346, %v9854_v34   ;;  %v9876_v47 = vpop.eup %7523  ;;  %7543 = vpow2.f32 %v6572_v7 }
0x1619   : > { %v9878_v44 = vpop.eup %7525  ;;  %7545 = vpow2.f32 %v6109_v28 }
0x161a   : > { %v9888_v4 = vpop.eup %7527  ;;  %7547 = vpow2.f32 %v6574_v2 }
0x161b   : > { %5669 = vperm.xlu1 %7345, %v9864_v40   ;;  %v9890_v37 = vpop.eup %7529  ;;  %7549 = vpow2.f32 %v6111_v38 }
0x161c   : > { %6124 = vperm.xlu0 %7346, %v9866_v46   ;;  %v9900_v42 = vpop.eup %7531  ;;  %7551 = vpow2.f32 %v6576_v58 }
0x161d   : > { %v9902_v30 = vpop.eup %7533  ;;  %7553 = vpow2.f32 %v6113_v36 }
0x161e   : > { %v9912_v3 = vpop.eup %7535  ;;  %7555 = vpow2.f32 %v6578_v11 }
0x161f   : > { %6127 = vperm.xlu1 %7345, %v9876_v47   ;;  %v9914_v39 = vpop.eup %7537  ;;  %7557 = vpow2.f32 %v6580_v17 }
0x1620   : > { %5672 = vperm.xlu0 %7346, %v9878_v44   ;;  %v9920_v29 = vpop.eup %7539 }
0x1621   : > { %v9922_v35 = vpop.eup %7541 }
0x1622   : > { %v9926_v13 = vpop.eup %7543 }
0x1623   : > { %6130 = vperm.xlu1 %7345, %v9888_v4   ;;  %v9928_v31 = vpop.eup %7545 }
0x1624   : > { %6591 = vperm.xlu0 %7346, %v9890_v37   ;;  %v9932_v59 = vpop.eup %7547 }
0x1625   : > { %v9934_v41 = vpop.eup %7549 }
0x1626   : > { %v9938_v23 = vpop.eup %7551 }
0x1627   : > { %6594 = vperm.xlu1 %7345, %v9900_v42   ;;  %10369 = vst [vmem:[#allocation13_spill] sm:$0xff] %v9938_v23  ;;  %v9940_v43 = vpop.eup %7553 }
0x1628   : > { %5675 = vperm.xlu0 %7346, %v9902_v30   ;;  %v9944_v7 = vpop.eup %7555 }
0x1629   : > { %10370 = vst [vmem:[#allocation14_spill] sm:$0xff] %v9944_v7  ;;  %v9946_v33 = vpop.eup %7557 }
0x162b   : > { %6133 = vperm.xlu1 %7345, %v9912_v3  }
0x162c   : > { %6597 = vperm.xlu0 %7346, %v9914_v39  }
0x162f   : > { %5678 = vperm.xlu1 %7345, %v9920_v29  }
0x1630   : > { %6136 = vperm.xlu0 %7346, %v9922_v35  }
0x1633   : > { %6600 = vperm.xlu1 %7345, %v9926_v13  }
0x1634   : > { %6139 = vperm.xlu0 %7346, %v9928_v31  }
0x1636   : > { %v5183_v53 = vpop.permute.xlu0 %5182 }
0x1637   : > { %6603 = vperm.xlu1 %7345, %v9932_v59   ;;  %v5208_v0 = vrot.slane %v5183_v53, %v8242_v62 }
0x1638   : > { %6142 = vperm.xlu0 %7346, %v9934_v41  }
0x163a   : > { %v5186_v14 = vpop.permute.xlu0 %5185 }
0x163b   : > { %6606 = vperm.xlu1 %7345, %v9938_v23   ;;  %v5212_v52 = vrot.slane %v5186_v14, %v8242_v62 }
0x163c   : > { %6145 = vperm.xlu0 %7346, %v9940_v43  }
0x163d   : > { %v5237_v57 = vsel %vm866_vm3, %v5212_v52, %v5208_v0 }
0x163e   : > { %v5189_v60 = vpop.permute.xlu0 %5188 }
0x163f   : > { %6609 = vperm.xlu1 %7345, %v9944_v7   ;;  %v5216_v2 = vrot.slane %v5189_v60, %v8242_v62 }
0x1640   : > { %6612 = vperm.xlu0 %7346, %v9946_v33  }
0x1641   : > { %v5238_v58 = vsel %vm868_vm4, %v5216_v2, %v5237_v57 }
0x1642   : > { %v5192_v12 = vpop.permute.xlu0 %5191 }
0x1643   : > { %v5220_v21 = vrot.slane %v5192_v12, %v8242_v62 }
0x1645   : > { %v5239_v49 = vsel %vm870_vm5, %v5220_v21, %v5238_v58 }
0x1646   : > { %v5195_v28 = vpop.permute.xlu0 %5194 }
0x1647   : > { %v5224_v38 = vrot.slane %v5195_v28, %v8242_v62 }
0x1649   : > { %v5240_v11 = vsel %vm872_vm6, %v5224_v38, %v5239_v49 }
0x164a   : > { %v5198_v25 = vpop.permute.xlu0 %5197 }
0x164b   : > { %v5228_v48 = vrot.slane %v5198_v25, %v8242_v62 }
0x164d   : > { %v5241_v17 = vsel %vm874_vm7, %v5228_v48, %v5240_v11 }
0x164e   : > { %v5201_v61 = vpop.permute.xlu0 %5200 }
0x164f   : > { %v5232_v36 = vrot.slane %v5201_v61, %v8242_v62 }
0x1651   : > { %v5242_v53 = vsel %vm876_vm8, %v5232_v36, %v5241_v17 }
0x1652   : > { %v5204_v27 = vpop.permute.xlu0 %5203 }
0x1653   : > { %v5236_v50 = vrot.slane %v5204_v27, %v8242_v62 }
0x1655   : > { %v5243_v14 = vsel %vm878_vm9, %v5236_v50, %v5242_v53 }
0x1656   : > { %v5245_v60 = vsel %vm702_vm2, %v5243_v14, 0.0 }
0x165f   : > { %5246 = vadd.xlane.f32.xlu0 %v5245_v60 }
0x1692   : > { %v5658_v12 = vpop.permute.xlu1 %5657 }
0x1693   : > { %v5661_v28 = vpop.permute.xlu0 %5660  ;;  %v5683_v38 = vrot.slane %v5658_v12, %v8242_v62 }
0x1694   : > { %v5687_v48 = vrot.slane %v5661_v28, %v8242_v62 }
0x1696   : > { %v5664_v25 = vpop.permute.xlu1 %5663  ;;  %v5712_v50 = vsel %vm866_vm3, %v5687_v48, %v5683_v38 }
0x1697   : > { %v5667_v52 = vpop.permute.xlu0 %5666  ;;  %v5691_v58 = vrot.slane %v5664_v25, %v8242_v62 }
0x1698   : > { %v5695_v11 = vrot.slane %v5667_v52, %v8242_v62 }
0x1699   : > { %v5713_v17 = vsel %vm868_vm4, %v5691_v58, %v5712_v50 }
0x169a   : > { %v5670_v61 = vpop.permute.xlu1 %5669  ;;  %v5714_v28 = vsel %vm870_vm5, %v5695_v11, %v5713_v17 }
0x169b   : > { %v6125_v2 = vpop.permute.xlu0 %6124  ;;  %v5699_v53 = vrot.slane %v5670_v61, %v8242_v62 }
0x169c   : > { %v6150_v17 = vrot.slane %v6125_v2, %v8242_v62 }
0x169d   : > { %v5715_v25 = vsel %vm872_vm6, %v5699_v53, %v5714_v28 }
0x169e   : > { %v6128_v0 = vpop.permute.xlu1 %6127 }
0x169f   : > { %v5673_v21 = vpop.permute.xlu0 %5672 }
0x16a0   : > { %v5703_v60 = vrot.slane %v5673_v21, %v8242_v62 }
0x16a2   : > { %v6131_v27 = vpop.permute.xlu1 %6130  ;;  %v5716_v23 = vsel %vm874_vm7, %v5703_v60, %v5715_v25 }
0x16a3   : > { %v6592_v57 = vpop.permute.xlu0 %6591  ;;  %v6158_v11 = vrot.slane %v6131_v27, %v8242_v62 }
0x16a4   : > { %v6617_v2 = vrot.slane %v6592_v57, %v8242_v62 }
0x16a6   : > { %v6595_v36 = vpop.permute.xlu1 %6594 }
0x16a7   : > { %v5676_v49 = vpop.permute.xlu0 %5675 }
0x16a8   : > { %v5707_v12 = vrot.slane %v5676_v49, %v8242_v62  ;;  %v6154_v49 = vrot.slane %v6128_v0, %v8242_v62 }
0x16aa   : > { %v6134_v14 = vpop.permute.xlu1 %6133  ;;  %v5717_v48 = vsel %vm876_vm8, %v5707_v12, %v5716_v23  ;;  %v6179_v23 = vsel %vm866_vm3, %v6154_v49, %v6150_v17  ;;  %v6621_v12 = vrot.slane %v6595_v36, %v8242_v62 }
0x16ab   : > { %v6598_v8 = vpop.permute.xlu0 %6597  ;;  %v6162_v53 = vrot.slane %v6134_v14, %v8242_v62 }
0x16ac   : > { %v6625_v0 = vrot.slane %v6598_v8, %v8242_v62 }
0x16ae   : > { %v5679_v7 = vpop.permute.xlu1 %5678 }
0x16af   : > { %v5711_v38 = vrot.slane %v5679_v7, %v8242_v62  ;;  %v6137_v52 = vpop.permute.xlu0 %6136 }
0x16b0   : > { %v6166_v7 = vrot.slane %v6137_v52, %v8242_v62 }
0x16b1   : > { %v5718_v61 = vsel %vm878_vm9, %v5711_v38, %v5717_v48  ;;  %v6180_v38 = vsel %vm868_vm4, %v6158_v11, %v6179_v23 }
0x16b2   : > { %v6601_v58 = vpop.permute.xlu1 %6600  ;;  %v5720_v21 = vsel %vm702_vm2, %v5718_v61, 0.0  ;;  %v6181_v14 = vsel %vm870_vm5, %v6162_v53, %v6180_v38 }
0x16b3   : > { %v6140_v50 = vpop.permute.xlu0 %6139  ;;  %5721 = vadd.xlane.f32.xlu1 %v5720_v21  ;;  %v6629_v48 = vrot.slane %v6601_v58, %v8242_v62  ;;  %v6182_v61 = vsel %vm872_vm6, %v6166_v7, %v6181_v14 }
0x16b4   : > { %v6170_v25 = vrot.slane %v6140_v50, %v8242_v62  ;;  %v6646_v50 = vsel %vm866_vm3, %v6621_v12, %v6617_v2 }
0x16b5   : > { %v6647_v57 = vsel %vm868_vm4, %v6625_v0, %v6646_v50 }
0x16b6   : > { %v6604_v60 = vpop.permute.xlu1 %6603  ;;  %v6183_v49 = vsel %vm874_vm7, %v6170_v25, %v6182_v61  ;;  %v6648_v58 = vsel %vm870_vm5, %v6629_v48, %v6647_v57 }
0x16b7   : > { %v6143_v28 = vpop.permute.xlu0 %6142  ;;  %v6633_v21 = vrot.slane %v6604_v60, %v8242_v62 }
0x16b8   : > { %v6174_v27 = vrot.slane %v6143_v28, %v8242_v62 }
0x16b9   : > { %v6649_v60 = vsel %vm872_vm6, %v6633_v21, %v6648_v58 }
0x16ba   : > { %v6607_v52 = vpop.permute.xlu1 %6606  ;;  %v6184_v17 = vsel %vm876_vm8, %v6174_v27, %v6183_v49 }
0x16bb   : > { %v6146_v36 = vpop.permute.xlu0 %6145  ;;  %v6637_v8 = vrot.slane %v6607_v52, %v8242_v62 }
0x16bc   : > { %v6178_v11 = vrot.slane %v6146_v36, %v8242_v62 }
0x16bd   : > { %v6650_v25 = vsel %vm874_vm7, %v6637_v8, %v6649_v60 }
0x16be   : > { %v6610_v53 = vpop.permute.xlu1 %6609  ;;  %v6185_v7 = vsel %vm878_vm9, %v6178_v11, %v6184_v17 }
0x16bf   : > { %v6641_v28 = vrot.slane %v6610_v53, %v8242_v62  ;;  %v6613_v23 = vpop.permute.xlu0 %6612  ;;  %v6187_v12 = vsel %vm702_vm2, %v6185_v7, 0.0 }
0x16c0   : > { %v6645_v38 = vrot.slane %v6613_v23, %v8242_v62  ;;  %6188 = vadd.xlane.f32.xlu0 %v6187_v12 }
0x16c1   : > { %v6651_v0 = vsel %vm876_vm8, %v6641_v28, %v6650_v25 }
0x16c2   : > { %v6652_v27 = vsel %vm878_vm9, %v6645_v38, %v6651_v0 }
0x16c3   : > { %v6654_v2 = vsel %vm702_vm2, %v6652_v27, 0.0 }
0x16c4   : > { %6655 = vadd.xlane.f32.xlu0 %v6654_v2 }
0x16da   : > { %5844 = vrot.lane.b32.xlu0 %v9459_v26, %s7713_s18 }
0x16ec   : > { %v5247_v14 = vpop.xlane.xlu0 %5246 }
0x16ed   : > { %7559 = vrcp.f32 %v5247_v14 }
0x16f7   : > { %v7560_v48 = vpop.eup %7559 }
0x16f8   : > { %v5265_v52 = vrot.slane %v7560_v48, %v7967_v9  ;;  %v5253_v61 = vrot.slane %v7560_v48, %v7956_v5  ;;  %v5281_v50 = vrot.slane %v7560_v48, %v7993_v24  ;;  %v5257_v49 = vrot.slane %v7560_v48, %v7959_v6 }
0x16f9   : > { %v5261_v57 = vrot.slane %v7560_v48, %v7970_v10  ;;  %v5273_v58 = vrot.slane %v7560_v48, %v7985_v20 }
0x16fa   : > { %v5293_v21 = vmul.f32 %v9784_v19, %v5265_v52  ;;  %v5290_v36 = vmul.f32 %v9770_v54, %v5253_v61  ;;  %v5297_v8 = vmul.f32 %v9796_v32, %v5281_v50  ;;  %v5291_v11 = vmul.f32 %v9775_v1, %v5257_v49 }
0x16fb   : > { %v5292_v17 = vmul.f32 %v9780_v51, %v5261_v57  ;;  %v5269_v19 = vrot.slane %v7560_v48, %v7977_v18  ;;  %v5295_v53 = vmul.f32 %v9790_v55, %v5273_v58  ;;  %v5277_v32 = vrot.slane %v7560_v48, %v7989_v22 }
0x16fc   : > { %5316 = vperm.xlu0 %7346, %v5293_v21   ;;  %5307 = vperm.xlu1 %7345, %v5290_v36  }
0x16fd   : > { %v5294_v54 = vmul.f32 %v9787_v15, %v5269_v19  ;;  %v5296_v1 = vmul.f32 %v9793_v63, %v5277_v32 }
0x1700   : > { %5328 = vperm.xlu0 %7346, %v5297_v8   ;;  %5310 = vperm.xlu1 %7345, %v5291_v11  }
0x1704   : > { %5313 = vperm.xlu1 %7345, %v5292_v17  }
0x1708   : > { %5319 = vperm.xlu1 %7345, %v5294_v54  }
0x170c   : > { %5322 = vperm.xlu1 %7345, %v5295_v53   ;;  %v10371_v53 = vld [vmem:[#allocation13_spill] sm:$0xff] }
0x1710   : > { %5325 = vperm.xlu1 %7345, %v5296_v1  }
0x1740   : > { %v5722_v7 = vpop.xlane.xlu1 %5721 }
0x1741   : > { %7561 = vrcp.f32 %v5722_v7 }
0x174b   : > { %v7562_v60 = vpop.eup %7561 }
0x174c   : > { %v5732_v51 = vrot.slane %v7562_v60, %v7959_v6  ;;  %v5728_v28 = vrot.slane %v7562_v60, %v7956_v5  ;;  %v5744_v15 = vrot.slane %v7562_v60, %v7977_v18  ;;  %v5736_v25 = vrot.slane %v7562_v60, %v7970_v10 }
0x174d   : > { %v6189_v23 = vpop.xlane.xlu0 %6188  ;;  %v5752_v38 = vrot.slane %v7562_v60, %v7989_v22  ;;  %v5740_v2 = vrot.slane %v7562_v60, %v7967_v9  ;;  %v5748_v14 = vrot.slane %v7562_v60, %v7985_v20 }
0x174e   : > { %7563 = vrcp.f32 %v6189_v23  ;;  %v5766_v12 = vmul.f32 %v9842_v16, %v5732_v51  ;;  %v5765_v55 = vmul.f32 %v9840_v45, %v5728_v28  ;;  %v5769_v0 = vmul.f32 %v9864_v40, %v5744_v15 }
0x174f   : > { %v5767_v27 = vmul.f32 %v9852_v56, %v5736_v25  ;;  %v5771_v16 = vmul.f32 %v9902_v30, %v5752_v38  ;;  %v5768_v45 = vmul.f32 %v9854_v34, %v5740_v2  ;;  %v5770_v61 = vmul.f32 %v9878_v44, %v5748_v14 }
0x1750   : > { %5785 = vperm.xlu0 %7346, %v5766_v12   ;;  %5782 = vperm.xlu1 %7345, %v5765_v55   ;;  %v5756_v40 = vrot.slane %v7562_v60, %v7993_v24 }
0x1751   : > { %v6656_v63 = vpop.xlane.xlu0 %6655 }
0x1752   : > { %7565 = vrcp.f32 %v6656_v63  ;;  %v5772_v34 = vmul.f32 %v9920_v29, %v5756_v40 }
0x1754   : > { %5794 = vperm.xlu0 %7346, %v5769_v0   ;;  %5788 = vperm.xlu1 %7345, %v5767_v27  }
0x1755   : > { %v5845_v7 = vpop.permute.xlu0 %5844 }
0x1758   : > { %v7564_v48 = vpop.eup %7563  ;;  %5800 = vperm.xlu0 %7346, %v5771_v16   ;;  %5791 = vperm.xlu1 %7345, %v5768_v45  }
0x1759   : > { %v6199_v52 = vrot.slane %v7564_v48, %v7959_v6  ;;  %v6195_v36 = vrot.slane %v7564_v48, %v7956_v5  ;;  %v6207_v49 = vrot.slane %v7564_v48, %v7967_v9  ;;  %v6203_v8 = vrot.slane %v7564_v48, %v7970_v10 }
0x175a   : > { %v6211_v11 = vrot.slane %v7564_v48, %v7977_v18  ;;  %v6215_v57 = vrot.slane %v7564_v48, %v7985_v20  ;;  %v6219_v19 = vrot.slane %v7564_v48, %v7989_v22  ;;  %v6223_v54 = vrot.slane %v7564_v48, %v7993_v24 }
0x175b   : > { %v6233_v56 = vmul.f32 %v9876_v47, %v6199_v52  ;;  %v6232_v44 = vmul.f32 %v9866_v46, %v6195_v36  ;;  %v6235_v47 = vmul.f32 %v9912_v3, %v6207_v49  ;;  %v6234_v29 = vmul.f32 %v9888_v4, %v6203_v8 }
0x175c   : > { %v7566_v21 = vpop.eup %7565  ;;  %5797 = vperm.xlu1 %7345, %v5770_v61   ;;  %v6237_v3 = vmul.f32 %v9928_v31, %v6215_v57  ;;  %v6239_v31 = vmul.f32 %v9940_v43, %v6223_v54  ;;  %v10373_v48 = vmov 0.0  }
0x175d   : > { %6252 = vperm.xlu0 %7346, %v6233_v56   ;;  %v6662_v30 = vrot.slane %v7566_v21, %v7956_v5  ;;  %v6666_v5 = vrot.slane %v7566_v21, %v7959_v6  ;;  %v6670_v17 = vrot.slane %v7566_v21, %v7970_v10  ;;  %v6674_v6 = vrot.slane %v7566_v21, %v7967_v9 }
0x175e   : > { %v6678_v10 = vrot.slane %v7566_v21, %v7977_v18  ;;  %v6690_v58 = vrot.slane %v7566_v21, %v7993_v24  ;;  %v6682_v9 = vrot.slane %v7566_v21, %v7985_v20  ;;  %v10372_v18 = vld [vmem:[#allocation14_spill] sm:$0xff] }
0x175f   : > { %v6699_v50 = vmul.f32 %v9890_v37, %v6662_v30  ;;  %v6236_v37 = vmul.f32 %v9922_v35, %v6211_v11  ;;  %v6700_v46 = vmul.f32 %v9900_v42, %v6666_v5  ;;  %v6701_v4 = vmul.f32 %v9914_v39, %v6670_v17 }
0x1760   : > { %5803 = vperm.xlu1 %7345, %v5772_v34   ;;  %v6238_v35 = vmul.f32 %v9934_v41, %v6219_v19  ;;  %v6702_v42 = vmul.f32 %v9926_v13, %v6674_v6  ;;  %v6703_v39 = vmul.f32 %v9932_v59, %v6678_v10  ;;  %v6706_v41 = vmul.f32 %v9946_v33, %v6690_v58 }
0x1761   : > { %6716 = vperm.xlu0 %7346, %v6699_v50   ;;  %v6704_v32 = vmul.f32 %v10371_v53, %v6682_v9  ;;  %v6686_v13 = vrot.slane %v7566_v21, %v7989_v22 }
0x1763   : > { %v6705_v24 = vmul.f32 %v10372_v18, %v6686_v13 }
0x1764   : > { %6249 = vperm.xlu1 %7345, %v6232_v44  }
0x1765   : > { %6258 = vperm.xlu0 %7346, %v6235_v47  }
0x1768   : > { %6255 = vperm.xlu1 %7345, %v6234_v29  }
0x1769   : > { %6261 = vperm.xlu0 %7346, %v6236_v37  }
0x176c   : > { %6719 = vperm.xlu1 %7345, %v6700_v46  }
0x176d   : > { %6264 = vperm.xlu0 %7346, %v6237_v3  }
0x1770   : > { %6722 = vperm.xlu1 %7345, %v6701_v4  }
0x1771   : > { %6267 = vperm.xlu0 %7346, %v6238_v35  }
0x1774   : > { %6725 = vperm.xlu1 %7345, %v6702_v42  }
0x1775   : > { %6270 = vperm.xlu0 %7346, %v6239_v31  }
0x1778   : > { %6728 = vperm.xlu1 %7345, %v6703_v39  }
0x1779   : > { %6737 = vperm.xlu0 %7346, %v6706_v41  }
0x177b   : > { %v5308_v1 = vpop.permute.xlu1 %5307  ;;  %v5317_v60 = vpop.permute.xlu0 %5316 }
0x177c   : > { %6731 = vperm.xlu1 %7345, %v6704_v32   ;;  %v5333_v51 = vrot.slane %v5308_v1, %v8242_v62  ;;  %v5345_v55 = vrot.slane %v5317_v60, %v8242_v62 }
0x177d   : > { %6778 = vrot.lane.b32.xlu0 %v9459_v26, %s7715_s13 }
0x177f   : > { %v5311_v43 = vpop.permute.xlu1 %5310 }
0x1780   : > { %6734 = vperm.xlu1 %7345, %v6705_v24   ;;  %v5337_v20 = vrot.slane %v5311_v43, %v8242_v62 }
0x1782   : > { %v5362_v28 = vsel %vm866_vm3, %v5337_v20, %v5333_v51 }
0x1783   : > { %v5314_v59 = vpop.permute.xlu1 %5313 }
0x1784   : > { %6311 = vrot.lane.b32.xlu1 %v9459_v26, %s7714_s16  ;;  %v5341_v22 = vrot.slane %v5314_v59, %v8242_v62  ;;  %v5329_v26 = vpop.permute.xlu0 %5328 }
0x1785   : > { %v5361_v2 = vrot.slane %v5329_v26, %v8242_v62 }
0x1786   : > { %v5363_v15 = vsel %vm868_vm4, %v5341_v22, %v5362_v28 }
0x1787   : > { %v5320_v33 = vpop.permute.xlu1 %5319  ;;  %v5364_v63 = vsel %vm870_vm5, %v5345_v55, %v5363_v15 }
0x1788   : > { %v5349_v12 = vrot.slane %v5320_v33, %v8242_v62 }
0x178a   : > { %v5365_v0 = vsel %vm872_vm6, %v5349_v12, %v5364_v63 }
0x178b   : > { %v5323_v23 = vpop.permute.xlu1 %5322 }
0x178c   : > { %v5353_v25 = vrot.slane %v5323_v23, %v8242_v62 }
0x178e   : > { %v5366_v16 = vsel %vm874_vm7, %v5353_v25, %v5365_v0 }
0x178f   : > { %v5326_v38 = vpop.permute.xlu1 %5325 }
0x1790   : > { %v5357_v27 = vrot.slane %v5326_v38, %v8242_v62 }
0x1792   : > { %v5367_v45 = vsel %vm876_vm8, %v5357_v27, %v5366_v16 }
0x1793   : > { %v5368_v14 = vsel %vm878_vm9, %v5361_v2, %v5367_v45 }
0x1794   : > { %7219 = vmatmul.mubr.msk.f32.vlgmr.msra.gmra.mrb[14].mxu1 %vm702_vm2, %v5368_v14 }
0x1795   : > { %7222 = vmatpush3.msra.mxu1 %v5845_v7  ;;  %7223 = vmatprep.mubr.msk.f32.mxu1 %vm7705_vm0, %v10373_v48 }
0x1796   : > { %7231 = vmatprep.subr.mxu1 %v10373_v48 }
0x17cf   : > { %v5783_v52 = vpop.permute.xlu1 %5782  ;;  %v5786_v61 = vpop.permute.xlu0 %5785 }
0x17d0   : > { %v5808_v21 = vrot.slane %v5783_v52, %v8242_v62  ;;  %v5812_v30 = vrot.slane %v5786_v61, %v8242_v62 }
0x17d2   : > { %v5837_v49 = vsel %vm866_vm3, %v5812_v30, %v5808_v21 }
0x17d3   : > { %v5789_v40 = vpop.permute.xlu1 %5788  ;;  %v5795_v56 = vpop.permute.xlu0 %5794 }
0x17d4   : > { %v5816_v34 = vrot.slane %v5789_v40, %v8242_v62  ;;  %v5824_v11 = vrot.slane %v5795_v56, %v8242_v62 }
0x17d6   : > { %v5838_v8 = vsel %vm868_vm4, %v5816_v34, %v5837_v49  ;;  %v10374_v49 = vmov 0.0|0.0  }
0x17d7   : > { %v5792_v36 = vpop.permute.xlu1 %5791  ;;  %v5801_v50 = vpop.permute.xlu0 %5800 }
0x17d8   : > { %v5820_v44 = vrot.slane %v5792_v36, %v8242_v62  ;;  %v5832_v17 = vrot.slane %v5801_v50, %v8242_v62 }
0x17da   : > { %v5839_v47 = vsel %vm870_vm5, %v5820_v44, %v5838_v8 }
0x17db   : > { %v5798_v29 = vpop.permute.xlu1 %5797  ;;  %v5840_v57 = vsel %vm872_vm6, %v5824_v11, %v5839_v47 }
0x17dc   : > { %v5828_v5 = vrot.slane %v5798_v29, %v8242_v62  ;;  %v6253_v37 = vpop.permute.xlu0 %6252 }
0x17dd   : > { %v6279_v24 = vrot.slane %v6253_v37, %v8242_v62 }
0x17de   : > { %v5841_v46 = vsel %vm874_vm7, %v5828_v5, %v5840_v57 }
0x17df   : > { %v5804_v3 = vpop.permute.xlu1 %5803  ;;  %v5842_v6 = vsel %vm876_vm8, %v5832_v17, %v5841_v46 }
0x17e0   : > { %v5836_v19 = vrot.slane %v5804_v3, %v8242_v62  ;;  %v6717_v4 = vpop.permute.xlu0 %6716 }
0x17e1   : > { %v6742_v33 = vrot.slane %v6717_v4, %v8242_v62  ;;  %v10375_v4 = vld [vmem:[#allocation21_spill] sm:$0xff] }
0x17e2   : > { %v5843_v35 = vsel %vm878_vm9, %v5836_v19, %v5842_v6 }
0x17e3   : > { %v6250_v54 = vpop.permute.xlu1 %6249  ;;  %7224 = vmatmul.mubr.msk.f32.vlgmr.msra.gmra.mrb[16].mxu1 %vm702_vm2, %v5843_v35 }
0x17e4   : > { %v6259_v42 = vpop.permute.xlu0 %6258  ;;  %7233 = vmatprep.mubr.msk.f32.mxu1 %vm7705_vm0, %v10373_v48  ;;  %v6275_v13 = vrot.slane %v6250_v54, %v8242_v62 }
0x17e5   : > { %v6287_v28 = vrot.slane %v6259_v42, %v8242_v62 }
0x17e6   : > { %v6304_v7 = vsel %vm866_vm3, %v6279_v24, %v6275_v13 }
0x17e7   : > { %v6256_v10 = vpop.permute.xlu1 %6255 }
0x17e8   : > { %v6262_v31 = vpop.permute.xlu0 %6261  ;;  %v6283_v1 = vrot.slane %v6256_v10, %v8242_v62 }
0x17e9   : > { %v6291_v12 = vrot.slane %v6262_v31, %v8242_v62 }
0x17ea   : > { %v6305_v60 = vsel %vm868_vm4, %v6283_v1, %v6304_v7  ;;  %v7571_v7 = vld [vmem:[%s10213_s10] ss:$0 sm:$0xff] }
0x17eb   : > { %v6720_v58 = vpop.permute.xlu1 %6719  ;;  %v6306_v26 = vsel %vm870_vm5, %v6287_v28, %v6305_v60 }
0x17ec   : > { %v6265_v39 = vpop.permute.xlu0 %6264  ;;  %v6746_v59 = vrot.slane %v6720_v58, %v8242_v62  ;;  %v6307_v52 = vsel %vm872_vm6, %v6291_v12, %v6306_v26 }
0x17ed   : > { %v6295_v63 = vrot.slane %v6265_v39, %v8242_v62  ;;  %v6884_v39 = vld [vmem:[%s10211_s8] sm:$0xff] }
0x17ee   : > { %v6771_v55 = vsel %vm866_vm3, %v6746_v59, %v6742_v33  ;;  %v7572_v33 = vld [vmem:[%s10214_s11] ss:$0 sm:$0xff] }
0x17ef   : > { %v6723_v9 = vpop.permute.xlu1 %6722  ;;  %v6308_v56 = vsel %vm874_vm7, %v6295_v63, %v6307_v52 }
0x17f0   : > { %v6268_v41 = vpop.permute.xlu0 %6267  ;;  %v6750_v20 = vrot.slane %v6723_v9, %v8242_v62  ;;  %v6885_v9 = vld [vmem:[%s10211_s8 + $0x8] sm:$0xff] }
0x17f1   : > { %v6299_v0 = vrot.slane %v6268_v41, %v8242_v62  ;;  %v6886_v41 = vld [vmem:[%s10211_s8 + $0x10] sm:$0xff] }
0x17f2   : > { %v6772_v38 = vsel %vm868_vm4, %v6750_v20, %v6771_v55 }
0x17f3   : > { %v6726_v53 = vpop.permute.xlu1 %6725  ;;  %v6309_v30 = vsel %vm876_vm8, %v6299_v0, %v6308_v56 }
0x17f4   : > { %v6271_v32 = vpop.permute.xlu0 %6270  ;;  %v6754_v22 = vrot.slane %v6726_v53, %v8242_v62  ;;  %v7263_v53 = vpack.c.bf16 %v6885_v9, %v6884_v39 }
0x17f5   : > { %v6303_v16 = vrot.slane %v6271_v32, %v8242_v62  ;;  %v6887_v32 = vld [vmem:[%s10211_s8 + $0x18] sm:$0xff] }
0x17f6   : > { %v6773_v27 = vsel %vm870_vm5, %v6754_v22, %v6772_v38  ;;  %v7266_v13 = vpack.c.bf16 %v6887_v32, %v6886_v41  ;;  %v7101_v22 = vld [vmem:[#allocation2] ss:$0 sm:$0xff] }
0x17f7   : > { %v6729_v18 = vpop.permute.xlu1 %6728  ;;  %v6310_v50 = vsel %vm878_vm9, %v6303_v16, %v6309_v30 }
0x17f8   : > { %v6738_v43 = vpop.permute.xlu0 %6737  ;;  %v6758_v23 = vrot.slane %v6729_v18, %v8242_v62 }
0x17f9   : > { %v6770_v61 = vrot.slane %v6738_v43, %v8242_v62 }
0x17fa   : > { %v6774_v45 = vsel %vm872_vm6, %v6758_v23, %v6773_v27 }
0x17fb   : > { %v6732_v51 = vpop.permute.xlu1 %6731 }
0x17fc   : > { %v6779_v15 = vpop.permute.xlu0 %6778  ;;  %v6762_v25 = vrot.slane %v6732_v51, %v8242_v62 }
0x17fd   : > { %7232 = vmatpush3.msra.mxu1 %v6779_v15 }
0x17fe   : > { %v6775_v40 = vsel %vm874_vm7, %v6762_v25, %v6774_v45 }
0x17ff   : > { %v6735_v2 = vpop.permute.xlu1 %6734 }
0x1800   : > { %v6766_v14 = vrot.slane %v6735_v2, %v8242_v62 }
0x1802   : > { %v6776_v21 = vsel %vm876_vm8, %v6766_v14, %v6775_v40 }
0x1803   : > { %v6312_v34 = vpop.permute.xlu1 %6311  ;;  %v6777_v36 = vsel %vm878_vm9, %v6770_v61, %v6776_v21 }
0x1804   : > { %7227 = vmatpush3.msra.mxu0 %v6312_v34  ;;  %7234 = vmatmul.mubr.msk.f32.vlgmr.msra.gmra.mrb[18].mxu1 %vm702_vm2, %v6777_v36 }
0x1805   : > { %7229 = vmatmul.mubr.msk.f32.vlgmr.msra.gmra.mrb[8].mxu0 %vm702_vm2, %v6310_v50  ;;  %7262 = vmatprep.subr.bf16.mxu0 %v10374_v49 }
0x1806   : > { %7244 = vmatprep.mubr.msk.f32.mxu0 %vm7705_vm0, %v10373_v48  ;;  %7264 = vmatpush3.bf16.msra.mxu0 %v7263_v53 }
0x1807   : > { %7265 = vmatprep.subr.bf16.mxu0 %v10374_v49 }
0x180a   : > { %7267 = vmatpush3.bf16.msra.mxu0 %v7266_v13 }
0x1867   : > { %v5440_v62 = vpop.f32.mrb[14].mxu1 }
0x1868   : > { %v7220_v44 = vpop.f32.mrb[15].mxu1 }
0x18b6   : > { %v5915_v8 = vpop.f32.mrb[16].mxu1 }
0x18b7   : > { %6854 = vrot.lane.b32.xlu1 %v5915_v8, %s10341_s26  ;;  %v7225_v47 = vpop.f32.mrb[17].mxu1 }
0x18d7   : > { %v6849_v11 = vpop.f32.mrb[18].mxu1 }
0x18d8   : > { %6862 = vrot.lane.b32.xlu1 %v6849_v11, %s10343_s12  ;;  %v6382_v29 = vpop.f32.mrb[8].mxu0  ;;  %v7235_v5 = vpop.f32.mrb[19].mxu1 }
0x18d9   : > { %6858 = vrot.lane.b32.xlu0 %v6382_v29, %s10342_s23  ;;  %v7230_v37 = vpop.f32.mrb[9].mxu0 }
0x1929   : > { %v6855_v57 = vpop.permute.xlu1 %6854 }
0x192a   : > { %v6865_v46 = vsel %vm702_vm2, %v5440_v62, %v6855_v57 }
0x194a   : > { %v6863_v3 = vpop.permute.xlu1 %6862 }
0x194b   : > { %v6859_v17 = vpop.permute.xlu0 %6858 }
0x194c   : > { %v6866_v48 = vsel %vm483_vm1, %v6865_v46, %v6859_v17 }
0x194d   : > { %v6867_v19 = vsel %vm2643_vm10, %v6866_v48, %v6863_v3 }
0x194e   : > { %v6868_v6 = vadd.f32 %v6867_v19, %v10375_v4 }
0x1950   : > { %v6869_v35 = vsel %vm2645_vm11, %v6868_v6, 0.0 }
0x1951   : > { %6870 = vadd.xlane.f32.xlu0 %v6869_v35 }
0x19de   : > { %v6871_v54 = vpop.xlane.xlu0 %6870 }
0x19df   : > { %v6872_v42 = vmul.f32 0.03125, %v6871_v54 }
0x19e1   : > { %v6873_v10 = vsub.f32 %v6868_v6, %v6872_v42 }
0x19e3   : > { %v6874_v31 = vmul.f32 %v6873_v10, %v6873_v10 }
0x19e5   : > { %v6875_v58 = vsel %vm2645_vm11, %v6874_v31, 0.0 }
0x19e6   : > { %6876 = vadd.xlane.f32.xlu1 %v6875_v58 }
0x1a73   : > { %v6877_v1 = vpop.xlane.xlu1 %6876 }
0x1a74   : > { %v6878_v18 = vmul.f32 0.03125, %v6877_v1 }
0x1a76   : > { %v6879_v24 = vadd.f32 1e-05, %v6878_v18 }
0x1a78   : > { %7567 = vrsqrt.f32 %v6879_v24 }
0x1a82   : > { %v7568_v43 = vpop.eup %7567 }
0x1a83   : > { %v6881_v59 = vmul.f32 %v7568_v43, %v6873_v10 }
0x1a85   : > { %v6882_v20 = vmul.f32 %v7571_v7, %v6881_v59 }
0x1a87   : > { %v6883_v60 = vadd.f32 %v7572_v33, %v6882_v20 }
0x1a89   : > { %7245 = vmatmul.mubr.msk.f32.vlgmr.msra.gmra.mrb[10].mxu0 %vm2645_vm11, %v6883_v60 }
0x1b5c   : > { %v6964_v51 = vpop.f32.mrb[10].mxu0 }
0x1b5d   : > { %v6965_v28 = vadd.f32 %v7101_v22, %v6964_v51  ;;  %v7246_v23 = vpop.f32.mrb[11].mxu0 }
0x1b5f   : > { %v6968_v15 = vmul.f32 0.21, %v6965_v28 }
0x1b61   : > { %v6969_v12 = vmax.f32 %v6965_v28, %v6968_v15 }
0x1b63   : > { %6971 = vst.msk [vmem:[%s476_s19] sm:$0xff] %vm6970_vm12, %v6969_v12 }
0x1b64 PF: > { %p25_p9 = scmp.ge.s32.totalorder %s7880_s17, 4   ;;  %s10378_s23 = smov %s7689_s24 }
0x1b65   : > { %s10379_s24 = smov %s7693_s25  ;;  %s10380_s25 = smov %s7891_s20 }
0x1b66   : > { %s10381_s26 = smov %s7880_s17  ;;  %27 = sbr.rel (!%p25_p9) target bundleno = 7 (0x7), region = 119 }
0x1b6d   :  { %6991 = vsyncpa [#allocation4], 1 }
0x1b6e   :  { %6993 = vsyncpa [#allocation4 + $0x1], 1 }
0x1b6f   :  { %6994 = vsyncpa [#allocation6], 1 }

</bundles_post_ra>
